<compile_context>
chip_gen: v6e
topology: v6e:2x2x1
jax: 0.10.0
libtpu: 0.0.40
codegen_flags: <defaults>
</compile_context>

<pallas_src>
import functools
import math

import jax
import jax.numpy as jnp
from jax import lax
from jax.experimental import pallas as pl
from jax.experimental.pallas import tpu as pltpu


CFG = dict(vocab=100, hidden=32, layers=2, heads=2, head_dim=16, ffn=64, max_pos=16)

_VMEM = pl.BlockSpec(memory_space=pltpu.MemorySpace.VMEM)


# --------------------------------------------------------------------------
# Single fused kernel: full BERT stack + pooling + similarity + reward.
# All per-layer weights are passed stacked along a leading layer axis and
# indexed with static layer ids; intermediates never leave VMEM.
# --------------------------------------------------------------------------
def _fused_model_kernel(x0_ref, mask_ref, emb_g_ref, emb_b_ref,
                        wqkv_ref, bqkv_ref, wo_ref, bo_ref, aln_g_ref, aln_b_ref,
                        w1_ref, b1_ref, w2_ref, b2_ref, fln_g_ref, fln_b_ref,
                        reward_ref, sim_ref,
                        qkv_s, ctx_s, pooled_s,
                        *, L, Bc, Bs, Bk, S, H, nH, Dh, F, scale, eps):
    def layernorm(x, g, b):
        mu = jnp.mean(x, axis=-1, keepdims=True)
        var = jnp.mean((x - mu) ** 2, axis=-1, keepdims=True)
        return (x - mu) * lax.rsqrt(var + eps) * g + b

    # Embedding layernorm (embedding sum was computed as XLA glue outside).
    x = layernorm(x0_ref[...], emb_g_ref[...], emb_b_ref[...])          # (Bc*S, H)

    for l in range(L):
        # Fused Q|K|V projection: one MXU pass, lane width 3H.
        qkv = jnp.dot(x, wqkv_ref[l], preferred_element_type=jnp.float32) + bqkv_ref[l]
        qkv_s[...] = qkv                                                 # (Bc*S, 3H)

        # Per-(sequence, head) attention; everything stays in VMEM/vregs.
        for b in range(Bc):
            rs, re = b * S, (b + 1) * S
            bias_b = (mask_ref[b:b + 1, :] - 1.0) * 10000.0              # (1, S) additive mask
            for h in range(nH):
                cq = h * Dh
                q = qkv_s[rs:re, cq:cq + Dh]                             # (S, Dh)
                k = qkv_s[rs:re, H + cq:H + cq + Dh]
                v = qkv_s[rs:re, 2 * H + cq:2 * H + cq + Dh]
                s = lax.dot_general(q, k, (((1,), (1,)), ((), ())),
                                    preferred_element_type=jnp.float32) * scale + bias_b
                m = jnp.max(s, axis=-1, keepdims=True)
                p = jnp.exp(s - m)
                p = p / jnp.sum(p, axis=-1, keepdims=True)
                ctx_s[rs:re, cq:cq + Dh] = jnp.dot(p, v, preferred_element_type=jnp.float32)

        attn_out = jnp.dot(ctx_s[...], wo_ref[l],
                           preferred_element_type=jnp.float32) + bo_ref[l]
        x = layernorm(x + attn_out, aln_g_ref[l], aln_b_ref[l])

        inter = jnp.dot(x, w1_ref[l], preferred_element_type=jnp.float32) + b1_ref[l]
        inter = 0.5 * inter * (1.0 + lax.erf(inter * 0.7071067811865476))   # exact GELU
        ffn_out = jnp.dot(inter, w2_ref[l], preferred_element_type=jnp.float32) + b2_ref[l]
        x = layernorm(x + ffn_out, fln_g_ref[l], fln_b_ref[l])

    # Masked mean pooling (masked sum done as a (1,S)x(S,H) matmul).
    for b in range(Bc):
        rs, re = b * S, (b + 1) * S
        mb = mask_ref[b:b + 1, :]                                        # (1, S)
        ssum = jnp.dot(mb, x[rs:re, :], preferred_element_type=jnp.float32)  # (1, H)
        denom = jnp.maximum(jnp.sum(mb, axis=-1, keepdims=True), 1e-9)   # clamp(min=1e-9)
        pooled_s[b:b + 1, :] = ssum / denom

    src_mean = pooled_s[0:Bs, :]                                         # (Bs, H)
    kg_mean = pooled_s[Bs:Bc, :]                                         # (Bk, H)

    # similarity = kg_mean @ src_mean.T
    sim = lax.dot_general(kg_mean, src_mean, (((1,), (1,)), ((), ())),
                          preferred_element_type=jnp.float32)            # (Bk, Bs)
    sim_ref[...] = sim

    colsum = jnp.sum(sim, axis=0, keepdims=True)                         # (1, Bs)
    rows = lax.broadcasted_iota(jnp.int32, (Bk, Bs), 0)
    cols = lax.broadcasted_iota(jnp.int32, (Bk, Bs), 1)
    diag = jnp.sum(jnp.where(rows == cols, sim, 0.0), axis=1, keepdims=True)  # (Bk, 1)
    # reward[i, j] = sim[i,i] + sim[i,i] / colsum[j]
    reward_ref[...] = diag + diag / colsum


def fused_forward(prep, x0, mask, cfg, Bs, Bk, S):
    H, nH, Dh, F, L = cfg["hidden"], cfg["heads"], cfg["head_dim"], cfg["ffn"], cfg["layers"]
    Bc = Bs + Bk
    kern = functools.partial(
        _fused_model_kernel, L=L, Bc=Bc, Bs=Bs, Bk=Bk, S=S, H=H, nH=nH, Dh=Dh, F=F,
        scale=1.0 / math.sqrt(Dh), eps=1e-12)
    reward, sim = pl.pallas_call(
        kern,
        out_shape=(jax.ShapeDtypeStruct((Bk, Bs), jnp.float32),
                   jax.ShapeDtypeStruct((Bk, Bs), jnp.float32)),
        in_specs=[_VMEM] * 16,
        out_specs=(_VMEM, _VMEM),
        scratch_shapes=[pltpu.VMEM((Bc * S, 3 * H), jnp.float32),   # fused QKV
                        pltpu.VMEM((Bc * S, H), jnp.float32),        # attention context
                        pltpu.VMEM((Bc, H), jnp.float32)],           # pooled embeddings
        compiler_params=pltpu.CompilerParams(vmem_limit_bytes=32 * 1024 * 1024),
    )(x0, mask,
      prep["emb_ln_g"], prep["emb_ln_b"],
      prep["wqkv"], prep["bqkv"], prep["wo"], prep["bo"],
      prep["attn_ln_g"], prep["attn_ln_b"],
      prep["w1"], prep["b1"], prep["w2"], prep["b2"],
      prep["ffn_ln_g"], prep["ffn_ln_b"])
    return reward, sim


# --------------------------------------------------------------------------
# Mini BERT parameters (deterministic, in-script).
# --------------------------------------------------------------------------
def init_params(key, cfg):
    H, F, V, P = cfg["hidden"], cfg["ffn"], cfg["vocab"], cfg["max_pos"]
    keys = iter(jax.random.split(key, 64))

    def normal(shape):
        return 0.02 * jax.random.normal(next(keys), shape, jnp.float32)

    params = dict(
        word_emb=normal((V, H)),
        pos_emb=normal((P, H)),
        type_emb=normal((2, H)),
        emb_ln_g=jnp.ones((H,), jnp.float32),
        emb_ln_b=jnp.zeros((H,), jnp.float32),
        layers=[],
    )
    for _ in range(cfg["layers"]):
        params["layers"].append(dict(
            wq=normal((H, H)), bq=jnp.zeros((H,), jnp.float32),
            wk=normal((H, H)), bk=jnp.zeros((H,), jnp.float32),
            wv=normal((H, H)), bv=jnp.zeros((H,), jnp.float32),
            wo=normal((H, H)), bo=jnp.zeros((H,), jnp.float32),
            attn_ln_g=jnp.ones((H,), jnp.float32),
            attn_ln_b=jnp.zeros((H,), jnp.float32),
            w1=normal((H, F)), b1=jnp.zeros((F,), jnp.float32),
            w2=normal((F, H)), b2=jnp.zeros((H,), jnp.float32),
            ffn_ln_g=jnp.ones((H,), jnp.float32),
            ffn_ln_b=jnp.zeros((H,), jnp.float32),
        ))
    return params


def prepare_params(params, cfg):
    """One-time preprocessing: fuse Q|K|V weights, reshape biases to (1,N),
    stack per-layer tensors along a leading layer axis, cast to f32."""
    H, F = cfg["hidden"], cfg["ffn"]
    f32 = jnp.float32
    layers = params["layers"]

    def stack(fn):
        return jnp.stack([fn(l) for l in layers]).astype(f32)

    return dict(
        word_emb=params["word_emb"].astype(f32),
        pos_emb=params["pos_emb"].astype(f32),
        type_emb=params["type_emb"].astype(f32),
        emb_ln_g=params["emb_ln_g"].reshape(1, H).astype(f32),
        emb_ln_b=params["emb_ln_b"].reshape(1, H).astype(f32),
        wqkv=stack(lambda l: jnp.concatenate([l["wq"], l["wk"], l["wv"]], axis=1)),
        bqkv=stack(lambda l: jnp.concatenate([l["bq"], l["bk"], l["bv"]]).reshape(1, 3 * H)),
        wo=stack(lambda l: l["wo"]),
        bo=stack(lambda l: l["bo"].reshape(1, H)),
        attn_ln_g=stack(lambda l: l["attn_ln_g"].reshape(1, H)),
        attn_ln_b=stack(lambda l: l["attn_ln_b"].reshape(1, H)),
        w1=stack(lambda l: l["w1"]),
        b1=stack(lambda l: l["b1"].reshape(1, F)),
        w2=stack(lambda l: l["w2"]),
        b2=stack(lambda l: l["b2"].reshape(1, H)),
        ffn_ln_g=stack(lambda l: l["ffn_ln_g"].reshape(1, H)),
        ffn_ln_b=stack(lambda l: l["ffn_ln_b"].reshape(1, H)),
    )


def model_forward(prep, src, src_mask, kg, cfg):
    H = cfg["hidden"]
    src = src.astype(jnp.int32)
    kg_ids = kg.reshape(kg.shape[0], -1).astype(jnp.int32)
    src_m = src_mask.astype(jnp.float32)
    kg_m = jnp.ones(kg_ids.shape, jnp.float32)

    Bs, Ss = src.shape
    Bk, Sk = kg_ids.shape
    S = max(Ss, Sk)

    def pad(ids, m):
        p = S - ids.shape[1]
        if p:
            ids = jnp.pad(ids, ((0, 0), (0, p)))
            m = jnp.pad(m, ((0, 0), (0, p)))   # pads get mask 0 -> excluded everywhere
        return ids, m

    src, src_m = pad(src, src_m)
    kg_ids, kg_m = pad(kg_ids, kg_m)

    # Concatenate both branches -> one BERT pass, one kernel launch.
    ids = jnp.concatenate([src, kg_ids], axis=0)                # (Bs+Bk, S)
    mask = jnp.concatenate([src_m, kg_m], axis=0)               # (Bs+Bk, S)

    # Embedding gather + sum is cheap XLA glue; LN onward runs in the kernel.
    word = jnp.take(prep["word_emb"], ids, axis=0)              # (Bc, S, H)
    pos = prep["pos_emb"][:S][None, :, :]
    tok = prep["type_emb"][0][None, None, :]
    x0 = (word + pos + tok).reshape(-1, H).astype(jnp.float32)  # (Bc*S, H)

    return fused_forward(prep, x0, mask, cfg, Bs, Bk, S)


# --------------------------------------------------------------------------

if __name__ == "__main__":
    key = jax.random.PRNGKey(0)
    pkey, skey, kkey = jax.random.split(key, 3)

    params = init_params(pkey, CFG)
    prep = prepare_params(params, CFG)

    B, S = 2, 8
    src = jax.random.randint(skey, (B, S), 0, CFG["vocab"], dtype=jnp.int32)
    src_mask = jnp.array([[1, 1, 1, 1, 1, 1, 1, 1],
                          [1, 1, 1, 1, 1, 1, 0, 0]], dtype=jnp.int32)
    # kg batch matches src batch so the diagonal of `similarity` exists,
    # exactly like the original code requires.
    kg = jax.random.randint(kkey, (B, 2, 4), 0, CFG["vocab"], dtype=jnp.int32)

    fwd = jax.jit(lambda s, m, k: model_forward(prep, s, m, k, CFG))
    reward, similarity = fwd(src, src_mask, kg)
    jax.block_until_ready((reward, similarity))

    assert similarity.shape == (B, B)
    assert reward.shape == (B, B)
    assert bool(jnp.all(jnp.isfinite(similarity))) and bool(jnp.all(jnp.isfinite(reward)))
    print("KERNEL_OK")
</pallas_src>

<mosaic_0001>
module attributes {stable_mosaic.version = 11 : i64} {
  func.func @_fused_model_kernel(%arg0: memref<32x32xf32, #tpu.memory_space<vmem>>, %arg1: memref<4x8xf32, #tpu.memory_space<vmem>>, %arg2: memref<1x32xf32, #tpu.memory_space<vmem>>, %arg3: memref<1x32xf32, #tpu.memory_space<vmem>>, %arg4: memref<2x32x96xf32, #tpu.memory_space<vmem>>, %arg5: memref<2x1x96xf32, #tpu.memory_space<vmem>>, %arg6: memref<2x32x32xf32, #tpu.memory_space<vmem>>, %arg7: memref<2x1x32xf32, #tpu.memory_space<vmem>>, %arg8: memref<2x1x32xf32, #tpu.memory_space<vmem>>, %arg9: memref<2x1x32xf32, #tpu.memory_space<vmem>>, %arg10: memref<2x32x64xf32, #tpu.memory_space<vmem>>, %arg11: memref<2x1x64xf32, #tpu.memory_space<vmem>>, %arg12: memref<2x64x32xf32, #tpu.memory_space<vmem>>, %arg13: memref<2x1x32xf32, #tpu.memory_space<vmem>>, %arg14: memref<2x1x32xf32, #tpu.memory_space<vmem>>, %arg15: memref<2x1x32xf32, #tpu.memory_space<vmem>>, %arg16: memref<2x2xf32, #tpu.memory_space<vmem>>, %arg17: memref<2x2xf32, #tpu.memory_space<vmem>>, %arg18: memref<32x96xf32, #tpu.memory_space<vmem>>, %arg19: memref<32x32xf32, #tpu.memory_space<vmem>>, %arg20: memref<4x32xf32, #tpu.memory_space<vmem>>) attributes {dimension_semantics = [], scalar_prefetch = 0 : i64, scratch_operands = 3 : i64, tpu.core_type = #tpu.core_type<tc>} {
    %c0 = arith.constant 0 : index
    %c0_0 = arith.constant 0 : index
    %0 = vector.load %arg0[%c0, %c0_0] : memref<32x32xf32, #tpu.memory_space<vmem>>, vector<32x32xf32>
    %c0_1 = arith.constant 0 : index
    %c0_2 = arith.constant 0 : index
    %1 = vector.load %arg2[%c0_1, %c0_2] : memref<1x32xf32, #tpu.memory_space<vmem>>, vector<1x32xf32>
    %c0_3 = arith.constant 0 : index
    %c0_4 = arith.constant 0 : index
    %2 = vector.load %arg3[%c0_3, %c0_4] : memref<1x32xf32, #tpu.memory_space<vmem>>, vector<1x32xf32>
    %cst = arith.constant dense<0.000000e+00> : vector<32xf32>
    %3 = vector.multi_reduction <add>, %0, %cst [1] : vector<32x32xf32> to vector<32xf32>
    %4 = vector.shape_cast %3 : vector<32xf32> to vector<32x1xf32>
    %cst_5 = arith.constant 3.200000e+01 : f32
    %5 = vector.broadcast %cst_5 : f32 to vector<32x1xf32>
    %6 = arith.divf %4, %5 : vector<32x1xf32>
    %7 = vector.broadcast %6 : vector<32x1xf32> to vector<32x32xf32>
    %8 = arith.subf %0, %7 : vector<32x32xf32>
    %9 = arith.mulf %8, %8 : vector<32x32xf32>
    %cst_6 = arith.constant dense<0.000000e+00> : vector<32xf32>
    %10 = vector.multi_reduction <add>, %9, %cst_6 [1] : vector<32x32xf32> to vector<32xf32>
    %11 = vector.shape_cast %10 : vector<32xf32> to vector<32x1xf32>
    %cst_7 = arith.constant 3.200000e+01 : f32
    %12 = vector.broadcast %cst_7 : f32 to vector<32x1xf32>
    %13 = arith.divf %11, %12 : vector<32x1xf32>
    %14 = vector.broadcast %6 : vector<32x1xf32> to vector<32x32xf32>
    %15 = arith.subf %0, %14 : vector<32x32xf32>
    %cst_8 = arith.constant 9.99999996E-13 : f32
    %16 = vector.broadcast %cst_8 : f32 to vector<32x1xf32>
    %17 = arith.addf %13, %16 : vector<32x1xf32>
    %18 = math.rsqrt %17 : vector<32x1xf32>
    %19 = vector.broadcast %18 : vector<32x1xf32> to vector<32x32xf32>
    %20 = arith.mulf %15, %19 : vector<32x32xf32>
    %21 = vector.broadcast %1 : vector<1x32xf32> to vector<32x32xf32>
    %22 = arith.mulf %20, %21 : vector<32x32xf32>
    %23 = vector.broadcast %2 : vector<1x32xf32> to vector<32x32xf32>
    %24 = arith.addf %22, %23 : vector<32x32xf32>
    %c0_9 = arith.constant 0 : index
    %c0_10 = arith.constant 0 : index
    %c0_11 = arith.constant 0 : index
    %25 = vector.load %arg4[%c0_9, %c0_10, %c0_11] : memref<2x32x96xf32, #tpu.memory_space<vmem>>, vector<1x32x96xf32>
    %26 = vector.shape_cast %25 : vector<1x32x96xf32> to vector<32x96xf32>
    %cst_12 = arith.constant dense<0.000000e+00> : vector<32x96xf32>
    %27 = tpu.matmul %24, %26, %cst_12 {dimension_numbers = #tpu.dot_dimension_numbers<[1], [0], [0], [1], [0, 0, 1, 1], [], []>} : vector<32x32xf32>, vector<32x96xf32>, vector<32x96xf32> -> vector<32x96xf32>
    %c0_13 = arith.constant 0 : index
    %c0_14 = arith.constant 0 : index
    %c0_15 = arith.constant 0 : index
    %28 = vector.load %arg5[%c0_13, %c0_14, %c0_15] : memref<2x1x96xf32, #tpu.memory_space<vmem>>, vector<1x1x96xf32>
    %29 = vector.shape_cast %28 : vector<1x1x96xf32> to vector<1x96xf32>
    %30 = vector.broadcast %29 : vector<1x96xf32> to vector<32x96xf32>
    %31 = arith.addf %27, %30 : vector<32x96xf32>
    %c0_16 = arith.constant 0 : index
    %c0_17 = arith.constant 0 : index
    %32 = vector.load %arg18[%c0_16, %c0_17] : memref<32x96xf32, #tpu.memory_space<vmem>>, vector<32x96xf32>
    tpu.vector_store %arg18[%c0_16, %c0_17], %31 {strides = array<i32>} : memref<32x96xf32, #tpu.memory_space<vmem>>, vector<32x96xf32>,
    %c0_18 = arith.constant 0 : index
    %c0_19 = arith.constant 0 : index
    %33 = vector.load %arg1[%c0_18, %c0_19] : memref<4x8xf32, #tpu.memory_space<vmem>>, vector<1x8xf32>
    %cst_20 = arith.constant 1.000000e+00 : f32
    %34 = vector.broadcast %cst_20 : f32 to vector<1x8xf32>
    %35 = arith.subf %33, %34 : vector<1x8xf32>
    %cst_21 = arith.constant 1.000000e+04 : f32
    %36 = vector.broadcast %cst_21 : f32 to vector<1x8xf32>
    %37 = arith.mulf %35, %36 : vector<1x8xf32>
    %c0_22 = arith.constant 0 : index
    %c0_23 = arith.constant 0 : index
    %38 = vector.load %arg18[%c0_22, %c0_23] : memref<32x96xf32, #tpu.memory_space<vmem>>, vector<8x16xf32>
    %c0_24 = arith.constant 0 : index
    %c32 = arith.constant 32 : index
    %39 = vector.load %arg18[%c0_24, %c32] : memref<32x96xf32, #tpu.memory_space<vmem>>, vector<8x16xf32>
    %c0_25 = arith.constant 0 : index
    %c64 = arith.constant 64 : index
    %40 = vector.load %arg18[%c0_25, %c64] : memref<32x96xf32, #tpu.memory_space<vmem>>, vector<8x16xf32>
    %cst_26 = arith.constant dense<0.000000e+00> : vector<8x8xf32>
    %41 = tpu.matmul %38, %39, %cst_26 {dimension_numbers = #tpu.dot_dimension_numbers<[1], [1], [0], [0], [0, 0, 1, 0], [], []>} : vector<8x16xf32>, vector<8x16xf32>, vector<8x8xf32> -> vector<8x8xf32>
    %cst_27 = arith.constant 2.500000e-01 : f32
    %42 = vector.broadcast %cst_27 : f32 to vector<8x8xf32>
    %43 = arith.mulf %41, %42 : vector<8x8xf32>
    %44 = vector.broadcast %37 : vector<1x8xf32> to vector<8x8xf32>
    %45 = arith.addf %43, %44 : vector<8x8xf32>
    %cst_28 = arith.constant dense<0xFF800000> : vector<8xf32>
    %46 = vector.multi_reduction <maximumf>, %45, %cst_28 [1] : vector<8x8xf32> to vector<8xf32>
    %47 = vector.shape_cast %46 : vector<8xf32> to vector<8x1xf32>
    %48 = vector.broadcast %47 : vector<8x1xf32> to vector<8x8xf32>
    %49 = arith.subf %45, %48 : vector<8x8xf32>
    %50 = math.exp %49 : vector<8x8xf32>
    %cst_29 = arith.constant dense<0.000000e+00> : vector<8xf32>
    %51 = vector.multi_reduction <add>, %50, %cst_29 [1] : vector<8x8xf32> to vector<8xf32>
    %52 = vector.shape_cast %51 : vector<8xf32> to vector<8x1xf32>
    %53 = vector.broadcast %52 : vector<8x1xf32> to vector<8x8xf32>
    %54 = arith.divf %50, %53 : vector<8x8xf32>
    %cst_30 = arith.constant dense<0.000000e+00> : vector<8x16xf32>
    %55 = tpu.matmul %54, %40, %cst_30 {dimension_numbers = #tpu.dot_dimension_numbers<[1], [0], [0], [1], [0, 0, 1, 1], [], []>} : vector<8x8xf32>, vector<8x16xf32>, vector<8x16xf32> -> vector<8x16xf32>
    %c0_31 = arith.constant 0 : index
    %c0_32 = arith.constant 0 : index
    %56 = vector.load %arg19[%c0_31, %c0_32] : memref<32x32xf32, #tpu.memory_space<vmem>>, vector<8x16xf32>
    tpu.vector_store %arg19[%c0_31, %c0_32], %55 {strides = array<i32>} : memref<32x32xf32, #tpu.memory_space<vmem>>, vector<8x16xf32>,
    %c0_33 = arith.constant 0 : index
    %c16 = arith.constant 16 : index
    %57 = vector.load %arg18[%c0_33, %c16] : memref<32x96xf32, #tpu.memory_space<vmem>>, vector<8x16xf32>
    %c0_34 = arith.constant 0 : index
    %c48 = arith.constant 48 : index
    %58 = vector.load %arg18[%c0_34, %c48] : memref<32x96xf32, #tpu.memory_space<vmem>>, vector<8x16xf32>
    %c0_35 = arith.constant 0 : index
    %c80 = arith.constant 80 : index
    %59 = vector.load %arg18[%c0_35, %c80] : memref<32x96xf32, #tpu.memory_space<vmem>>, vector<8x16xf32>
    %cst_36 = arith.constant dense<0.000000e+00> : vector<8x8xf32>
    %60 = tpu.matmul %57, %58, %cst_36 {dimension_numbers = #tpu.dot_dimension_numbers<[1], [1], [0], [0], [0, 0, 1, 0], [], []>} : vector<8x16xf32>, vector<8x16xf32>, vector<8x8xf32> -> vector<8x8xf32>
    %cst_37 = arith.constant 2.500000e-01 : f32
    %61 = vector.broadcast %cst_37 : f32 to vector<8x8xf32>
    %62 = arith.mulf %60, %61 : vector<8x8xf32>
    %63 = vector.broadcast %37 : vector<1x8xf32> to vector<8x8xf32>
    %64 = arith.addf %62, %63 : vector<8x8xf32>
    %cst_38 = arith.constant dense<0xFF800000> : vector<8xf32>
    %65 = vector.multi_reduction <maximumf>, %64, %cst_38 [1] : vector<8x8xf32> to vector<8xf32>
    %66 = vector.shape_cast %65 : vector<8xf32> to vector<8x1xf32>
    %67 = vector.broadcast %66 : vector<8x1xf32> to vector<8x8xf32>
    %68 = arith.subf %64, %67 : vector<8x8xf32>
    %69 = math.exp %68 : vector<8x8xf32>
    %cst_39 = arith.constant dense<0.000000e+00> : vector<8xf32>
    %70 = vector.multi_reduction <add>, %69, %cst_39 [1] : vector<8x8xf32> to vector<8xf32>
    %71 = vector.shape_cast %70 : vector<8xf32> to vector<8x1xf32>
    %72 = vector.broadcast %71 : vector<8x1xf32> to vector<8x8xf32>
    %73 = arith.divf %69, %72 : vector<8x8xf32>
    %cst_40 = arith.constant dense<0.000000e+00> : vector<8x16xf32>
    %74 = tpu.matmul %73, %59, %cst_40 {dimension_numbers = #tpu.dot_dimension_numbers<[1], [0], [0], [1], [0, 0, 1, 1], [], []>} : vector<8x8xf32>, vector<8x16xf32>, vector<8x16xf32> -> vector<8x16xf32>
    %c0_41 = arith.constant 0 : index
    %c16_42 = arith.constant 16 : index
    %75 = vector.load %arg19[%c0_41, %c16_42] : memref<32x32xf32, #tpu.memory_space<vmem>>, vector<8x16xf32>
    tpu.vector_store %arg19[%c0_41, %c16_42], %74 {strides = array<i32>} : memref<32x32xf32, #tpu.memory_space<vmem>>, vector<8x16xf32>,
    %c1 = arith.constant 1 : index
    %c0_43 = arith.constant 0 : index
    %76 = vector.load %arg1[%c1, %c0_43] : memref<4x8xf32, #tpu.memory_space<vmem>>, vector<1x8xf32>
    %cst_44 = arith.constant 1.000000e+00 : f32
    %77 = vector.broadcast %cst_44 : f32 to vector<1x8xf32>
    %78 = arith.subf %76, %77 : vector<1x8xf32>
    %cst_45 = arith.constant 1.000000e+04 : f32
    %79 = vector.broadcast %cst_45 : f32 to vector<1x8xf32>
    %80 = arith.mulf %78, %79 : vector<1x8xf32>
    %c8 = arith.constant 8 : index
    %c0_46 = arith.constant 0 : index
    %81 = vector.load %arg18[%c8, %c0_46] : memref<32x96xf32, #tpu.memory_space<vmem>>, vector<8x16xf32>
    %c8_47 = arith.constant 8 : index
    %c32_48 = arith.constant 32 : index
    %82 = vector.load %arg18[%c8_47, %c32_48] : memref<32x96xf32, #tpu.memory_space<vmem>>, vector<8x16xf32>
    %c8_49 = arith.constant 8 : index
    %c64_50 = arith.constant 64 : index
    %83 = vector.load %arg18[%c8_49, %c64_50] : memref<32x96xf32, #tpu.memory_space<vmem>>, vector<8x16xf32>
    %cst_51 = arith.constant dense<0.000000e+00> : vector<8x8xf32>
    %84 = tpu.matmul %81, %82, %cst_51 {dimension_numbers = #tpu.dot_dimension_numbers<[1], [1], [0], [0], [0, 0, 1, 0], [], []>} : vector<8x16xf32>, vector<8x16xf32>, vector<8x8xf32> -> vector<8x8xf32>
    %cst_52 = arith.constant 2.500000e-01 : f32
    %85 = vector.broadcast %cst_52 : f32 to vector<8x8xf32>
    %86 = arith.mulf %84, %85 : vector<8x8xf32>
    %87 = vector.broadcast %80 : vector<1x8xf32> to vector<8x8xf32>
    %88 = arith.addf %86, %87 : vector<8x8xf32>
    %cst_53 = arith.constant dense<0xFF800000> : vector<8xf32>
    %89 = vector.multi_reduction <maximumf>, %88, %cst_53 [1] : vector<8x8xf32> to vector<8xf32>
    %90 = vector.shape_cast %89 : vector<8xf32> to vector<8x1xf32>
    %91 = vector.broadcast %90 : vector<8x1xf32> to vector<8x8xf32>
    %92 = arith.subf %88, %91 : vector<8x8xf32>
    %93 = math.exp %92 : vector<8x8xf32>
    %cst_54 = arith.constant dense<0.000000e+00> : vector<8xf32>
    %94 = vector.multi_reduction <add>, %93, %cst_54 [1] : vector<8x8xf32> to vector<8xf32>
    %95 = vector.shape_cast %94 : vector<8xf32> to vector<8x1xf32>
    %96 = vector.broadcast %95 : vector<8x1xf32> to vector<8x8xf32>
    %97 = arith.divf %93, %96 : vector<8x8xf32>
    %cst_55 = arith.constant dense<0.000000e+00> : vector<8x16xf32>
    %98 = tpu.matmul %97, %83, %cst_55 {dimension_numbers = #tpu.dot_dimension_numbers<[1], [0], [0], [1], [0, 0, 1, 1], [], []>} : vector<8x8xf32>, vector<8x16xf32>, vector<8x16xf32> -> vector<8x16xf32>
    %c8_56 = arith.constant 8 : index
    %c0_57 = arith.constant 0 : index
    %99 = vector.load %arg19[%c8_56, %c0_57] : memref<32x32xf32, #tpu.memory_space<vmem>>, vector<8x16xf32>
    tpu.vector_store %arg19[%c8_56, %c0_57], %98 {strides = array<i32>} : memref<32x32xf32, #tpu.memory_space<vmem>>, vector<8x16xf32>,
    %c8_58 = arith.constant 8 : index
    %c16_59 = arith.constant 16 : index
    %100 = vector.load %arg18[%c8_58, %c16_59] : memref<32x96xf32, #tpu.memory_space<vmem>>, vector<8x16xf32>
    %c8_60 = arith.constant 8 : index
    %c48_61 = arith.constant 48 : index
    %101 = vector.load %arg18[%c8_60, %c48_61] : memref<32x96xf32, #tpu.memory_space<vmem>>, vector<8x16xf32>
    %c8_62 = arith.constant 8 : index
    %c80_63 = arith.constant 80 : index
    %102 = vector.load %arg18[%c8_62, %c80_63] : memref<32x96xf32, #tpu.memory_space<vmem>>, vector<8x16xf32>
    %cst_64 = arith.constant dense<0.000000e+00> : vector<8x8xf32>
    %103 = tpu.matmul %100, %101, %cst_64 {dimension_numbers = #tpu.dot_dimension_numbers<[1], [1], [0], [0], [0, 0, 1, 0], [], []>} : vector<8x16xf32>, vector<8x16xf32>, vector<8x8xf32> -> vector<8x8xf32>
    %cst_65 = arith.constant 2.500000e-01 : f32
    %104 = vector.broadcast %cst_65 : f32 to vector<8x8xf32>
    %105 = arith.mulf %103, %104 : vector<8x8xf32>
    %106 = vector.broadcast %80 : vector<1x8xf32> to vector<8x8xf32>
    %107 = arith.addf %105, %106 : vector<8x8xf32>
    %cst_66 = arith.constant dense<0xFF800000> : vector<8xf32>
    %108 = vector.multi_reduction <maximumf>, %107, %cst_66 [1] : vector<8x8xf32> to vector<8xf32>
    %109 = vector.shape_cast %108 : vector<8xf32> to vector<8x1xf32>
    %110 = vector.broadcast %109 : vector<8x1xf32> to vector<8x8xf32>
    %111 = arith.subf %107, %110 : vector<8x8xf32>
    %112 = math.exp %111 : vector<8x8xf32>
    %cst_67 = arith.constant dense<0.000000e+00> : vector<8xf32>
    %113 = vector.multi_reduction <add>, %112, %cst_67 [1] : vector<8x8xf32> to vector<8xf32>
    %114 = vector.shape_cast %113 : vector<8xf32> to vector<8x1xf32>
    %115 = vector.broadcast %114 : vector<8x1xf32> to vector<8x8xf32>
    %116 = arith.divf %112, %115 : vector<8x8xf32>
    %cst_68 = arith.constant dense<0.000000e+00> : vector<8x16xf32>
    %117 = tpu.matmul %116, %102, %cst_68 {dimension_numbers = #tpu.dot_dimension_numbers<[1], [0], [0], [1], [0, 0, 1, 1], [], []>} : vector<8x8xf32>, vector<8x16xf32>, vector<8x16xf32> -> vector<8x16xf32>
    %c8_69 = arith.constant 8 : index
    %c16_70 = arith.constant 16 : index
    %118 = vector.load %arg19[%c8_69, %c16_70] : memref<32x32xf32, #tpu.memory_space<vmem>>, vector<8x16xf32>
    tpu.vector_store %arg19[%c8_69, %c16_70], %117 {strides = array<i32>} : memref<32x32xf32, #tpu.memory_space<vmem>>, vector<8x16xf32>,
    %c2 = arith.constant 2 : index
    %c0_71 = arith.constant 0 : index
    %119 = vector.load %arg1[%c2, %c0_71] : memref<4x8xf32, #tpu.memory_space<vmem>>, vector<1x8xf32>
    %cst_72 = arith.constant 1.000000e+00 : f32
    %120 = vector.broadcast %cst_72 : f32 to vector<1x8xf32>
    %121 = arith.subf %119, %120 : vector<1x8xf32>
    %cst_73 = arith.constant 1.000000e+04 : f32
    %122 = vector.broadcast %cst_73 : f32 to vector<1x8xf32>
    %123 = arith.mulf %121, %122 : vector<1x8xf32>
    %c16_74 = arith.constant 16 : index
    %c0_75 = arith.constant 0 : index
    %124 = vector.load %arg18[%c16_74, %c0_75] : memref<32x96xf32, #tpu.memory_space<vmem>>, vector<8x16xf32>
    %c16_76 = arith.constant 16 : index
    %c32_77 = arith.constant 32 : index
    %125 = vector.load %arg18[%c16_76, %c32_77] : memref<32x96xf32, #tpu.memory_space<vmem>>, vector<8x16xf32>
    %c16_78 = arith.constant 16 : index
    %c64_79 = arith.constant 64 : index
    %126 = vector.load %arg18[%c16_78, %c64_79] : memref<32x96xf32, #tpu.memory_space<vmem>>, vector<8x16xf32>
    %cst_80 = arith.constant dense<0.000000e+00> : vector<8x8xf32>
    %127 = tpu.matmul %124, %125, %cst_80 {dimension_numbers = #tpu.dot_dimension_numbers<[1], [1], [0], [0], [0, 0, 1, 0], [], []>} : vector<8x16xf32>, vector<8x16xf32>, vector<8x8xf32> -> vector<8x8xf32>
    %cst_81 = arith.constant 2.500000e-01 : f32
    %128 = vector.broadcast %cst_81 : f32 to vector<8x8xf32>
    %129 = arith.mulf %127, %128 : vector<8x8xf32>
    %130 = vector.broadcast %123 : vector<1x8xf32> to vector<8x8xf32>
    %131 = arith.addf %129, %130 : vector<8x8xf32>
    %cst_82 = arith.constant dense<0xFF800000> : vector<8xf32>
    %132 = vector.multi_reduction <maximumf>, %131, %cst_82 [1] : vector<8x8xf32> to vector<8xf32>
    %133 = vector.shape_cast %132 : vector<8xf32> to vector<8x1xf32>
    %134 = vector.broadcast %133 : vector<8x1xf32> to vector<8x8xf32>
    %135 = arith.subf %131, %134 : vector<8x8xf32>
    %136 = math.exp %135 : vector<8x8xf32>
    %cst_83 = arith.constant dense<0.000000e+00> : vector<8xf32>
    %137 = vector.multi_reduction <add>, %136, %cst_83 [1] : vector<8x8xf32> to vector<8xf32>
    %138 = vector.shape_cast %137 : vector<8xf32> to vector<8x1xf32>
    %139 = vector.broadcast %138 : vector<8x1xf32> to vector<8x8xf32>
    %140 = arith.divf %136, %139 : vector<8x8xf32>
    %cst_84 = arith.constant dense<0.000000e+00> : vector<8x16xf32>
    %141 = tpu.matmul %140, %126, %cst_84 {dimension_numbers = #tpu.dot_dimension_numbers<[1], [0], [0], [1], [0, 0, 1, 1], [], []>} : vector<8x8xf32>, vector<8x16xf32>, vector<8x16xf32> -> vector<8x16xf32>
    %c16_85 = arith.constant 16 : index
    %c0_86 = arith.constant 0 : index
    %142 = vector.load %arg19[%c16_85, %c0_86] : memref<32x32xf32, #tpu.memory_space<vmem>>, vector<8x16xf32>
    tpu.vector_store %arg19[%c16_85, %c0_86], %141 {strides = array<i32>} : memref<32x32xf32, #tpu.memory_space<vmem>>, vector<8x16xf32>,
    %c16_87 = arith.constant 16 : index
    %c16_88 = arith.constant 16 : index
    %143 = vector.load %arg18[%c16_87, %c16_88] : memref<32x96xf32, #tpu.memory_space<vmem>>, vector<8x16xf32>
    %c16_89 = arith.constant 16 : index
    %c48_90 = arith.constant 48 : index
    %144 = vector.load %arg18[%c16_89, %c48_90] : memref<32x96xf32, #tpu.memory_space<vmem>>, vector<8x16xf32>
    %c16_91 = arith.constant 16 : index
    %c80_92 = arith.constant 80 : index
    %145 = vector.load %arg18[%c16_91, %c80_92] : memref<32x96xf32, #tpu.memory_space<vmem>>, vector<8x16xf32>
    %cst_93 = arith.constant dense<0.000000e+00> : vector<8x8xf32>
    %146 = tpu.matmul %143, %144, %cst_93 {dimension_numbers = #tpu.dot_dimension_numbers<[1], [1], [0], [0], [0, 0, 1, 0], [], []>} : vector<8x16xf32>, vector<8x16xf32>, vector<8x8xf32> -> vector<8x8xf32>
    %cst_94 = arith.constant 2.500000e-01 : f32
    %147 = vector.broadcast %cst_94 : f32 to vector<8x8xf32>
    %148 = arith.mulf %146, %147 : vector<8x8xf32>
    %149 = vector.broadcast %123 : vector<1x8xf32> to vector<8x8xf32>
    %150 = arith.addf %148, %149 : vector<8x8xf32>
    %cst_95 = arith.constant dense<0xFF800000> : vector<8xf32>
    %151 = vector.multi_reduction <maximumf>, %150, %cst_95 [1] : vector<8x8xf32> to vector<8xf32>
    %152 = vector.shape_cast %151 : vector<8xf32> to vector<8x1xf32>
    %153 = vector.broadcast %152 : vector<8x1xf32> to vector<8x8xf32>
    %154 = arith.subf %150, %153 : vector<8x8xf32>
    %155 = math.exp %154 : vector<8x8xf32>
    %cst_96 = arith.constant dense<0.000000e+00> : vector<8xf32>
    %156 = vector.multi_reduction <add>, %155, %cst_96 [1] : vector<8x8xf32> to vector<8xf32>
    %157 = vector.shape_cast %156 : vector<8xf32> to vector<8x1xf32>
    %158 = vector.broadcast %157 : vector<8x1xf32> to vector<8x8xf32>
    %159 = arith.divf %155, %158 : vector<8x8xf32>
    %cst_97 = arith.constant dense<0.000000e+00> : vector<8x16xf32>
    %160 = tpu.matmul %159, %145, %cst_97 {dimension_numbers = #tpu.dot_dimension_numbers<[1], [0], [0], [1], [0, 0, 1, 1], [], []>} : vector<8x8xf32>, vector<8x16xf32>, vector<8x16xf32> -> vector<8x16xf32>
    %c16_98 = arith.constant 16 : index
    %c16_99 = arith.constant 16 : index
    %161 = vector.load %arg19[%c16_98, %c16_99] : memref<32x32xf32, #tpu.memory_space<vmem>>, vector<8x16xf32>
    tpu.vector_store %arg19[%c16_98, %c16_99], %160 {strides = array<i32>} : memref<32x32xf32, #tpu.memory_space<vmem>>, vector<8x16xf32>,
    %c3 = arith.constant 3 : index
    %c0_100 = arith.constant 0 : index
    %162 = vector.load %arg1[%c3, %c0_100] : memref<4x8xf32, #tpu.memory_space<vmem>>, vector<1x8xf32>
    %cst_101 = arith.constant 1.000000e+00 : f32
    %163 = vector.broadcast %cst_101 : f32 to vector<1x8xf32>
    %164 = arith.subf %162, %163 : vector<1x8xf32>
    %cst_102 = arith.constant 1.000000e+04 : f32
    %165 = vector.broadcast %cst_102 : f32 to vector<1x8xf32>
    %166 = arith.mulf %164, %165 : vector<1x8xf32>
    %c24 = arith.constant 24 : index
    %c0_103 = arith.constant 0 : index
    %167 = vector.load %arg18[%c24, %c0_103] : memref<32x96xf32, #tpu.memory_space<vmem>>, vector<8x16xf32>
    %c24_104 = arith.constant 24 : index
    %c32_105 = arith.constant 32 : index
    %168 = vector.load %arg18[%c24_104, %c32_105] : memref<32x96xf32, #tpu.memory_space<vmem>>, vector<8x16xf32>
    %c24_106 = arith.constant 24 : index
    %c64_107 = arith.constant 64 : index
    %169 = vector.load %arg18[%c24_106, %c64_107] : memref<32x96xf32, #tpu.memory_space<vmem>>, vector<8x16xf32>
    %cst_108 = arith.constant dense<0.000000e+00> : vector<8x8xf32>
    %170 = tpu.matmul %167, %168, %cst_108 {dimension_numbers = #tpu.dot_dimension_numbers<[1], [1], [0], [0], [0, 0, 1, 0], [], []>} : vector<8x16xf32>, vector<8x16xf32>, vector<8x8xf32> -> vector<8x8xf32>
    %cst_109 = arith.constant 2.500000e-01 : f32
    %171 = vector.broadcast %cst_109 : f32 to vector<8x8xf32>
    %172 = arith.mulf %170, %171 : vector<8x8xf32>
    %173 = vector.broadcast %166 : vector<1x8xf32> to vector<8x8xf32>
    %174 = arith.addf %172, %173 : vector<8x8xf32>
    %cst_110 = arith.constant dense<0xFF800000> : vector<8xf32>
    %175 = vector.multi_reduction <maximumf>, %174, %cst_110 [1] : vector<8x8xf32> to vector<8xf32>
    %176 = vector.shape_cast %175 : vector<8xf32> to vector<8x1xf32>
    %177 = vector.broadcast %176 : vector<8x1xf32> to vector<8x8xf32>
    %178 = arith.subf %174, %177 : vector<8x8xf32>
    %179 = math.exp %178 : vector<8x8xf32>
    %cst_111 = arith.constant dense<0.000000e+00> : vector<8xf32>
    %180 = vector.multi_reduction <add>, %179, %cst_111 [1] : vector<8x8xf32> to vector<8xf32>
    %181 = vector.shape_cast %180 : vector<8xf32> to vector<8x1xf32>
    %182 = vector.broadcast %181 : vector<8x1xf32> to vector<8x8xf32>
    %183 = arith.divf %179, %182 : vector<8x8xf32>
    %cst_112 = arith.constant dense<0.000000e+00> : vector<8x16xf32>
    %184 = tpu.matmul %183, %169, %cst_112 {dimension_numbers = #tpu.dot_dimension_numbers<[1], [0], [0], [1], [0, 0, 1, 1], [], []>} : vector<8x8xf32>, vector<8x16xf32>, vector<8x16xf32> -> vector<8x16xf32>
    %c24_113 = arith.constant 24 : index
    %c0_114 = arith.constant 0 : index
    %185 = vector.load %arg19[%c24_113, %c0_114] : memref<32x32xf32, #tpu.memory_space<vmem>>, vector<8x16xf32>
    tpu.vector_store %arg19[%c24_113, %c0_114], %184 {strides = array<i32>} : memref<32x32xf32, #tpu.memory_space<vmem>>, vector<8x16xf32>,
    %c24_115 = arith.constant 24 : index
    %c16_116 = arith.constant 16 : index
    %186 = vector.load %arg18[%c24_115, %c16_116] : memref<32x96xf32, #tpu.memory_space<vmem>>, vector<8x16xf32>
    %c24_117 = arith.constant 24 : index
    %c48_118 = arith.constant 48 : index
    %187 = vector.load %arg18[%c24_117, %c48_118] : memref<32x96xf32, #tpu.memory_space<vmem>>, vector<8x16xf32>
    %c24_119 = arith.constant 24 : index
    %c80_120 = arith.constant 80 : index
    %188 = vector.load %arg18[%c24_119, %c80_120] : memref<32x96xf32, #tpu.memory_space<vmem>>, vector<8x16xf32>
    %cst_121 = arith.constant dense<0.000000e+00> : vector<8x8xf32>
    %189 = tpu.matmul %186, %187, %cst_121 {dimension_numbers = #tpu.dot_dimension_numbers<[1], [1], [0], [0], [0, 0, 1, 0], [], []>} : vector<8x16xf32>, vector<8x16xf32>, vector<8x8xf32> -> vector<8x8xf32>
    %cst_122 = arith.constant 2.500000e-01 : f32
    %190 = vector.broadcast %cst_122 : f32 to vector<8x8xf32>
    %191 = arith.mulf %189, %190 : vector<8x8xf32>
    %192 = vector.broadcast %166 : vector<1x8xf32> to vector<8x8xf32>
    %193 = arith.addf %191, %192 : vector<8x8xf32>
    %cst_123 = arith.constant dense<0xFF800000> : vector<8xf32>
    %194 = vector.multi_reduction <maximumf>, %193, %cst_123 [1] : vector<8x8xf32> to vector<8xf32>
    %195 = vector.shape_cast %194 : vector<8xf32> to vector<8x1xf32>
    %196 = vector.broadcast %195 : vector<8x1xf32> to vector<8x8xf32>
    %197 = arith.subf %193, %196 : vector<8x8xf32>
    %198 = math.exp %197 : vector<8x8xf32>
    %cst_124 = arith.constant dense<0.000000e+00> : vector<8xf32>
    %199 = vector.multi_reduction <add>, %198, %cst_124 [1] : vector<8x8xf32> to vector<8xf32>
    %200 = vector.shape_cast %199 : vector<8xf32> to vector<8x1xf32>
    %201 = vector.broadcast %200 : vector<8x1xf32> to vector<8x8xf32>
    %202 = arith.divf %198, %201 : vector<8x8xf32>
    %cst_125 = arith.constant dense<0.000000e+00> : vector<8x16xf32>
    %203 = tpu.matmul %202, %188, %cst_125 {dimension_numbers = #tpu.dot_dimension_numbers<[1], [0], [0], [1], [0, 0, 1, 1], [], []>} : vector<8x8xf32>, vector<8x16xf32>, vector<8x16xf32> -> vector<8x16xf32>
    %c24_126 = arith.constant 24 : index
    %c16_127 = arith.constant 16 : index
    %204 = vector.load %arg19[%c24_126, %c16_127] : memref<32x32xf32, #tpu.memory_space<vmem>>, vector<8x16xf32>
    tpu.vector_store %arg19[%c24_126, %c16_127], %203 {strides = array<i32>} : memref<32x32xf32, #tpu.memory_space<vmem>>, vector<8x16xf32>,
    %c0_128 = arith.constant 0 : index
    %c0_129 = arith.constant 0 : index
    %205 = vector.load %arg19[%c0_128, %c0_129] : memref<32x32xf32, #tpu.memory_space<vmem>>, vector<32x32xf32>
    %c0_130 = arith.constant 0 : index
    %c0_131 = arith.constant 0 : index
    %c0_132 = arith.constant 0 : index
    %206 = vector.load %arg6[%c0_130, %c0_131, %c0_132] : memref<2x32x32xf32, #tpu.memory_space<vmem>>, vector<1x32x32xf32>
    %207 = vector.shape_cast %206 : vector<1x32x32xf32> to vector<32x32xf32>
    %cst_133 = arith.constant dense<0.000000e+00> : vector<32x32xf32>
    %208 = tpu.matmul %205, %207, %cst_133 {dimension_numbers = #tpu.dot_dimension_numbers<[1], [0], [0], [1], [0, 0, 1, 1], [], []>} : vector<32x32xf32>, vector<32x32xf32>, vector<32x32xf32> -> vector<32x32xf32>
    %c0_134 = arith.constant 0 : index
    %c0_135 = arith.constant 0 : index
    %c0_136 = arith.constant 0 : index
    %209 = vector.load %arg7[%c0_134, %c0_135, %c0_136] : memref<2x1x32xf32, #tpu.memory_space<vmem>>, vector<1x1x32xf32>
    %210 = vector.shape_cast %209 : vector<1x1x32xf32> to vector<1x32xf32>
    %211 = vector.broadcast %210 : vector<1x32xf32> to vector<32x32xf32>
    %212 = arith.addf %208, %211 : vector<32x32xf32>
    %213 = arith.addf %24, %212 : vector<32x32xf32>
    %c0_137 = arith.constant 0 : index
    %c0_138 = arith.constant 0 : index
    %c0_139 = arith.constant 0 : index
    %214 = vector.load %arg8[%c0_137, %c0_138, %c0_139] : memref<2x1x32xf32, #tpu.memory_space<vmem>>, vector<1x1x32xf32>
    %215 = vector.shape_cast %214 : vector<1x1x32xf32> to vector<1x32xf32>
    %c0_140 = arith.constant 0 : index
    %c0_141 = arith.constant 0 : index
    %c0_142 = arith.constant 0 : index
    %216 = vector.load %arg9[%c0_140, %c0_141, %c0_142] : memref<2x1x32xf32, #tpu.memory_space<vmem>>, vector<1x1x32xf32>
    %217 = vector.shape_cast %216 : vector<1x1x32xf32> to vector<1x32xf32>
    %cst_143 = arith.constant dense<0.000000e+00> : vector<32xf32>
    %218 = vector.multi_reduction <add>, %213, %cst_143 [1] : vector<32x32xf32> to vector<32xf32>
    %219 = vector.shape_cast %218 : vector<32xf32> to vector<32x1xf32>
    %cst_144 = arith.constant 3.200000e+01 : f32
    %220 = vector.broadcast %cst_144 : f32 to vector<32x1xf32>
    %221 = arith.divf %219, %220 : vector<32x1xf32>
    %222 = vector.broadcast %221 : vector<32x1xf32> to vector<32x32xf32>
    %223 = arith.subf %213, %222 : vector<32x32xf32>
    %224 = arith.mulf %223, %223 : vector<32x32xf32>
    %cst_145 = arith.constant dense<0.000000e+00> : vector<32xf32>
    %225 = vector.multi_reduction <add>, %224, %cst_145 [1] : vector<32x32xf32> to vector<32xf32>
    %226 = vector.shape_cast %225 : vector<32xf32> to vector<32x1xf32>
    %cst_146 = arith.constant 3.200000e+01 : f32
    %227 = vector.broadcast %cst_146 : f32 to vector<32x1xf32>
    %228 = arith.divf %226, %227 : vector<32x1xf32>
    %229 = vector.broadcast %221 : vector<32x1xf32> to vector<32x32xf32>
    %230 = arith.subf %213, %229 : vector<32x32xf32>
    %cst_147 = arith.constant 9.99999996E-13 : f32
    %231 = vector.broadcast %cst_147 : f32 to vector<32x1xf32>
    %232 = arith.addf %228, %231 : vector<32x1xf32>
    %233 = math.rsqrt %232 : vector<32x1xf32>
    %234 = vector.broadcast %233 : vector<32x1xf32> to vector<32x32xf32>
    %235 = arith.mulf %230, %234 : vector<32x32xf32>
    %236 = vector.broadcast %215 : vector<1x32xf32> to vector<32x32xf32>
    %237 = arith.mulf %235, %236 : vector<32x32xf32>
    %238 = vector.broadcast %217 : vector<1x32xf32> to vector<32x32xf32>
    %239 = arith.addf %237, %238 : vector<32x32xf32>
    %c0_148 = arith.constant 0 : index
    %c0_149 = arith.constant 0 : index
    %c0_150 = arith.constant 0 : index
    %240 = vector.load %arg10[%c0_148, %c0_149, %c0_150] : memref<2x32x64xf32, #tpu.memory_space<vmem>>, vector<1x32x64xf32>
    %241 = vector.shape_cast %240 : vector<1x32x64xf32> to vector<32x64xf32>
    %cst_151 = arith.constant dense<0.000000e+00> : vector<32x64xf32>
    %242 = tpu.matmul %239, %241, %cst_151 {dimension_numbers = #tpu.dot_dimension_numbers<[1], [0], [0], [1], [0, 0, 1, 1], [], []>} : vector<32x32xf32>, vector<32x64xf32>, vector<32x64xf32> -> vector<32x64xf32>
    %c0_152 = arith.constant 0 : index
    %c0_153 = arith.constant 0 : index
    %c0_154 = arith.constant 0 : index
    %243 = vector.load %arg11[%c0_152, %c0_153, %c0_154] : memref<2x1x64xf32, #tpu.memory_space<vmem>>, vector<1x1x64xf32>
    %244 = vector.shape_cast %243 : vector<1x1x64xf32> to vector<1x64xf32>
    %245 = vector.broadcast %244 : vector<1x64xf32> to vector<32x64xf32>
    %246 = arith.addf %242, %245 : vector<32x64xf32>
    %cst_155 = arith.constant 5.000000e-01 : f32
    %247 = vector.broadcast %cst_155 : f32 to vector<32x64xf32>
    %248 = arith.mulf %247, %246 : vector<32x64xf32>
    %cst_156 = arith.constant 0.707106769 : f32
    %249 = vector.broadcast %cst_156 : f32 to vector<32x64xf32>
    %250 = arith.mulf %246, %249 : vector<32x64xf32>
    %251 = math.erf %250 : vector<32x64xf32>
    %cst_157 = arith.constant 1.000000e+00 : f32
    %252 = vector.broadcast %cst_157 : f32 to vector<32x64xf32>
    %253 = arith.addf %252, %251 : vector<32x64xf32>
    %254 = arith.mulf %248, %253 : vector<32x64xf32>
    %c0_158 = arith.constant 0 : index
    %c0_159 = arith.constant 0 : index
    %c0_160 = arith.constant 0 : index
    %255 = vector.load %arg12[%c0_158, %c0_159, %c0_160] : memref<2x64x32xf32, #tpu.memory_space<vmem>>, vector<1x64x32xf32>
    %256 = vector.shape_cast %255 : vector<1x64x32xf32> to vector<64x32xf32>
    %cst_161 = arith.constant dense<0.000000e+00> : vector<32x32xf32>
    %257 = tpu.matmul %254, %256, %cst_161 {dimension_numbers = #tpu.dot_dimension_numbers<[1], [0], [0], [1], [0, 0, 1, 1], [], []>} : vector<32x64xf32>, vector<64x32xf32>, vector<32x32xf32> -> vector<32x32xf32>
    %c0_162 = arith.constant 0 : index
    %c0_163 = arith.constant 0 : index
    %c0_164 = arith.constant 0 : index
    %258 = vector.load %arg13[%c0_162, %c0_163, %c0_164] : memref<2x1x32xf32, #tpu.memory_space<vmem>>, vector<1x1x32xf32>
    %259 = vector.shape_cast %258 : vector<1x1x32xf32> to vector<1x32xf32>
    %260 = vector.broadcast %259 : vector<1x32xf32> to vector<32x32xf32>
    %261 = arith.addf %257, %260 : vector<32x32xf32>
    %262 = arith.addf %239, %261 : vector<32x32xf32>
    %c0_165 = arith.constant 0 : index
    %c0_166 = arith.constant 0 : index
    %c0_167 = arith.constant 0 : index
    %263 = vector.load %arg14[%c0_165, %c0_166, %c0_167] : memref<2x1x32xf32, #tpu.memory_space<vmem>>, vector<1x1x32xf32>
    %264 = vector.shape_cast %263 : vector<1x1x32xf32> to vector<1x32xf32>
    %c0_168 = arith.constant 0 : index
    %c0_169 = arith.constant 0 : index
    %c0_170 = arith.constant 0 : index
    %265 = vector.load %arg15[%c0_168, %c0_169, %c0_170] : memref<2x1x32xf32, #tpu.memory_space<vmem>>, vector<1x1x32xf32>
    %266 = vector.shape_cast %265 : vector<1x1x32xf32> to vector<1x32xf32>
    %cst_171 = arith.constant dense<0.000000e+00> : vector<32xf32>
    %267 = vector.multi_reduction <add>, %262, %cst_171 [1] : vector<32x32xf32> to vector<32xf32>
    %268 = vector.shape_cast %267 : vector<32xf32> to vector<32x1xf32>
    %cst_172 = arith.constant 3.200000e+01 : f32
    %269 = vector.broadcast %cst_172 : f32 to vector<32x1xf32>
    %270 = arith.divf %268, %269 : vector<32x1xf32>
    %271 = vector.broadcast %270 : vector<32x1xf32> to vector<32x32xf32>
    %272 = arith.subf %262, %271 : vector<32x32xf32>
    %273 = arith.mulf %272, %272 : vector<32x32xf32>
    %cst_173 = arith.constant dense<0.000000e+00> : vector<32xf32>
    %274 = vector.multi_reduction <add>, %273, %cst_173 [1] : vector<32x32xf32> to vector<32xf32>
    %275 = vector.shape_cast %274 : vector<32xf32> to vector<32x1xf32>
    %cst_174 = arith.constant 3.200000e+01 : f32
    %276 = vector.broadcast %cst_174 : f32 to vector<32x1xf32>
    %277 = arith.divf %275, %276 : vector<32x1xf32>
    %278 = vector.broadcast %270 : vector<32x1xf32> to vector<32x32xf32>
    %279 = arith.subf %262, %278 : vector<32x32xf32>
    %cst_175 = arith.constant 9.99999996E-13 : f32
    %280 = vector.broadcast %cst_175 : f32 to vector<32x1xf32>
    %281 = arith.addf %277, %280 : vector<32x1xf32>
    %282 = math.rsqrt %281 : vector<32x1xf32>
    %283 = vector.broadcast %282 : vector<32x1xf32> to vector<32x32xf32>
    %284 = arith.mulf %279, %283 : vector<32x32xf32>
    %285 = vector.broadcast %264 : vector<1x32xf32> to vector<32x32xf32>
    %286 = arith.mulf %284, %285 : vector<32x32xf32>
    %287 = vector.broadcast %266 : vector<1x32xf32> to vector<32x32xf32>
    %288 = arith.addf %286, %287 : vector<32x32xf32>
    %c1_176 = arith.constant 1 : index
    %c0_177 = arith.constant 0 : index
    %c0_178 = arith.constant 0 : index
    %289 = vector.load %arg4[%c1_176, %c0_177, %c0_178] : memref<2x32x96xf32, #tpu.memory_space<vmem>>, vector<1x32x96xf32>
    %290 = vector.shape_cast %289 : vector<1x32x96xf32> to vector<32x96xf32>
    %cst_179 = arith.constant dense<0.000000e+00> : vector<32x96xf32>
    %291 = tpu.matmul %288, %290, %cst_179 {dimension_numbers = #tpu.dot_dimension_numbers<[1], [0], [0], [1], [0, 0, 1, 1], [], []>} : vector<32x32xf32>, vector<32x96xf32>, vector<32x96xf32> -> vector<32x96xf32>
    %c1_180 = arith.constant 1 : index
    %c0_181 = arith.constant 0 : index
    %c0_182 = arith.constant 0 : index
    %292 = vector.load %arg5[%c1_180, %c0_181, %c0_182] : memref<2x1x96xf32, #tpu.memory_space<vmem>>, vector<1x1x96xf32>
    %293 = vector.shape_cast %292 : vector<1x1x96xf32> to vector<1x96xf32>
    %294 = vector.broadcast %293 : vector<1x96xf32> to vector<32x96xf32>
    %295 = arith.addf %291, %294 : vector<32x96xf32>
    %c0_183 = arith.constant 0 : index
    %c0_184 = arith.constant 0 : index
    %296 = vector.load %arg18[%c0_183, %c0_184] : memref<32x96xf32, #tpu.memory_space<vmem>>, vector<32x96xf32>
    tpu.vector_store %arg18[%c0_183, %c0_184], %295 {strides = array<i32>} : memref<32x96xf32, #tpu.memory_space<vmem>>, vector<32x96xf32>,
    %c0_185 = arith.constant 0 : index
    %c0_186 = arith.constant 0 : index
    %297 = vector.load %arg1[%c0_185, %c0_186] : memref<4x8xf32, #tpu.memory_space<vmem>>, vector<1x8xf32>
    %cst_187 = arith.constant 1.000000e+00 : f32
    %298 = vector.broadcast %cst_187 : f32 to vector<1x8xf32>
    %299 = arith.subf %297, %298 : vector<1x8xf32>
    %cst_188 = arith.constant 1.000000e+04 : f32
    %300 = vector.broadcast %cst_188 : f32 to vector<1x8xf32>
    %301 = arith.mulf %299, %300 : vector<1x8xf32>
    %c0_189 = arith.constant 0 : index
    %c0_190 = arith.constant 0 : index
    %302 = vector.load %arg18[%c0_189, %c0_190] : memref<32x96xf32, #tpu.memory_space<vmem>>, vector<8x16xf32>
    %c0_191 = arith.constant 0 : index
    %c32_192 = arith.constant 32 : index
    %303 = vector.load %arg18[%c0_191, %c32_192] : memref<32x96xf32, #tpu.memory_space<vmem>>, vector<8x16xf32>
    %c0_193 = arith.constant 0 : index
    %c64_194 = arith.constant 64 : index
    %304 = vector.load %arg18[%c0_193, %c64_194] : memref<32x96xf32, #tpu.memory_space<vmem>>, vector<8x16xf32>
    %cst_195 = arith.constant dense<0.000000e+00> : vector<8x8xf32>
    %305 = tpu.matmul %302, %303, %cst_195 {dimension_numbers = #tpu.dot_dimension_numbers<[1], [1], [0], [0], [0, 0, 1, 0], [], []>} : vector<8x16xf32>, vector<8x16xf32>, vector<8x8xf32> -> vector<8x8xf32>
    %cst_196 = arith.constant 2.500000e-01 : f32
    %306 = vector.broadcast %cst_196 : f32 to vector<8x8xf32>
    %307 = arith.mulf %305, %306 : vector<8x8xf32>
    %308 = vector.broadcast %301 : vector<1x8xf32> to vector<8x8xf32>
    %309 = arith.addf %307, %308 : vector<8x8xf32>
    %cst_197 = arith.constant dense<0xFF800000> : vector<8xf32>
    %310 = vector.multi_reduction <maximumf>, %309, %cst_197 [1] : vector<8x8xf32> to vector<8xf32>
    %311 = vector.shape_cast %310 : vector<8xf32> to vector<8x1xf32>
    %312 = vector.broadcast %311 : vector<8x1xf32> to vector<8x8xf32>
    %313 = arith.subf %309, %312 : vector<8x8xf32>
    %314 = math.exp %313 : vector<8x8xf32>
    %cst_198 = arith.constant dense<0.000000e+00> : vector<8xf32>
    %315 = vector.multi_reduction <add>, %314, %cst_198 [1] : vector<8x8xf32> to vector<8xf32>
    %316 = vector.shape_cast %315 : vector<8xf32> to vector<8x1xf32>
    %317 = vector.broadcast %316 : vector<8x1xf32> to vector<8x8xf32>
    %318 = arith.divf %314, %317 : vector<8x8xf32>
    %cst_199 = arith.constant dense<0.000000e+00> : vector<8x16xf32>
    %319 = tpu.matmul %318, %304, %cst_199 {dimension_numbers = #tpu.dot_dimension_numbers<[1], [0], [0], [1], [0, 0, 1, 1], [], []>} : vector<8x8xf32>, vector<8x16xf32>, vector<8x16xf32> -> vector<8x16xf32>
    %c0_200 = arith.constant 0 : index
    %c0_201 = arith.constant 0 : index
    %320 = vector.load %arg19[%c0_200, %c0_201] : memref<32x32xf32, #tpu.memory_space<vmem>>, vector<8x16xf32>
    tpu.vector_store %arg19[%c0_200, %c0_201], %319 {strides = array<i32>} : memref<32x32xf32, #tpu.memory_space<vmem>>, vector<8x16xf32>,
    %c0_202 = arith.constant 0 : index
    %c16_203 = arith.constant 16 : index
    %321 = vector.load %arg18[%c0_202, %c16_203] : memref<32x96xf32, #tpu.memory_space<vmem>>, vector<8x16xf32>
    %c0_204 = arith.constant 0 : index
    %c48_205 = arith.constant 48 : index
    %322 = vector.load %arg18[%c0_204, %c48_205] : memref<32x96xf32, #tpu.memory_space<vmem>>, vector<8x16xf32>
    %c0_206 = arith.constant 0 : index
    %c80_207 = arith.constant 80 : index
    %323 = vector.load %arg18[%c0_206, %c80_207] : memref<32x96xf32, #tpu.memory_space<vmem>>, vector<8x16xf32>
    %cst_208 = arith.constant dense<0.000000e+00> : vector<8x8xf32>
    %324 = tpu.matmul %321, %322, %cst_208 {dimension_numbers = #tpu.dot_dimension_numbers<[1], [1], [0], [0], [0, 0, 1, 0], [], []>} : vector<8x16xf32>, vector<8x16xf32>, vector<8x8xf32> -> vector<8x8xf32>
    %cst_209 = arith.constant 2.500000e-01 : f32
    %325 = vector.broadcast %cst_209 : f32 to vector<8x8xf32>
    %326 = arith.mulf %324, %325 : vector<8x8xf32>
    %327 = vector.broadcast %301 : vector<1x8xf32> to vector<8x8xf32>
    %328 = arith.addf %326, %327 : vector<8x8xf32>
    %cst_210 = arith.constant dense<0xFF800000> : vector<8xf32>
    %329 = vector.multi_reduction <maximumf>, %328, %cst_210 [1] : vector<8x8xf32> to vector<8xf32>
    %330 = vector.shape_cast %329 : vector<8xf32> to vector<8x1xf32>
    %331 = vector.broadcast %330 : vector<8x1xf32> to vector<8x8xf32>
    %332 = arith.subf %328, %331 : vector<8x8xf32>
    %333 = math.exp %332 : vector<8x8xf32>
    %cst_211 = arith.constant dense<0.000000e+00> : vector<8xf32>
    %334 = vector.multi_reduction <add>, %333, %cst_211 [1] : vector<8x8xf32> to vector<8xf32>
    %335 = vector.shape_cast %334 : vector<8xf32> to vector<8x1xf32>
    %336 = vector.broadcast %335 : vector<8x1xf32> to vector<8x8xf32>
    %337 = arith.divf %333, %336 : vector<8x8xf32>
    %cst_212 = arith.constant dense<0.000000e+00> : vector<8x16xf32>
    %338 = tpu.matmul %337, %323, %cst_212 {dimension_numbers = #tpu.dot_dimension_numbers<[1], [0], [0], [1], [0, 0, 1, 1], [], []>} : vector<8x8xf32>, vector<8x16xf32>, vector<8x16xf32> -> vector<8x16xf32>
    %c0_213 = arith.constant 0 : index
    %c16_214 = arith.constant 16 : index
    %339 = vector.load %arg19[%c0_213, %c16_214] : memref<32x32xf32, #tpu.memory_space<vmem>>, vector<8x16xf32>
    tpu.vector_store %arg19[%c0_213, %c16_214], %338 {strides = array<i32>} : memref<32x32xf32, #tpu.memory_space<vmem>>, vector<8x16xf32>,
    %c1_215 = arith.constant 1 : index
    %c0_216 = arith.constant 0 : index
    %340 = vector.load %arg1[%c1_215, %c0_216] : memref<4x8xf32, #tpu.memory_space<vmem>>, vector<1x8xf32>
    %cst_217 = arith.constant 1.000000e+00 : f32
    %341 = vector.broadcast %cst_217 : f32 to vector<1x8xf32>
    %342 = arith.subf %340, %341 : vector<1x8xf32>
    %cst_218 = arith.constant 1.000000e+04 : f32
    %343 = vector.broadcast %cst_218 : f32 to vector<1x8xf32>
    %344 = arith.mulf %342, %343 : vector<1x8xf32>
    %c8_219 = arith.constant 8 : index
    %c0_220 = arith.constant 0 : index
    %345 = vector.load %arg18[%c8_219, %c0_220] : memref<32x96xf32, #tpu.memory_space<vmem>>, vector<8x16xf32>
    %c8_221 = arith.constant 8 : index
    %c32_222 = arith.constant 32 : index
    %346 = vector.load %arg18[%c8_221, %c32_222] : memref<32x96xf32, #tpu.memory_space<vmem>>, vector<8x16xf32>
    %c8_223 = arith.constant 8 : index
    %c64_224 = arith.constant 64 : index
    %347 = vector.load %arg18[%c8_223, %c64_224] : memref<32x96xf32, #tpu.memory_space<vmem>>, vector<8x16xf32>
    %cst_225 = arith.constant dense<0.000000e+00> : vector<8x8xf32>
    %348 = tpu.matmul %345, %346, %cst_225 {dimension_numbers = #tpu.dot_dimension_numbers<[1], [1], [0], [0], [0, 0, 1, 0], [], []>} : vector<8x16xf32>, vector<8x16xf32>, vector<8x8xf32> -> vector<8x8xf32>
    %cst_226 = arith.constant 2.500000e-01 : f32
    %349 = vector.broadcast %cst_226 : f32 to vector<8x8xf32>
    %350 = arith.mulf %348, %349 : vector<8x8xf32>
    %351 = vector.broadcast %344 : vector<1x8xf32> to vector<8x8xf32>
    %352 = arith.addf %350, %351 : vector<8x8xf32>
    %cst_227 = arith.constant dense<0xFF800000> : vector<8xf32>
    %353 = vector.multi_reduction <maximumf>, %352, %cst_227 [1] : vector<8x8xf32> to vector<8xf32>
    %354 = vector.shape_cast %353 : vector<8xf32> to vector<8x1xf32>
    %355 = vector.broadcast %354 : vector<8x1xf32> to vector<8x8xf32>
    %356 = arith.subf %352, %355 : vector<8x8xf32>
    %357 = math.exp %356 : vector<8x8xf32>
    %cst_228 = arith.constant dense<0.000000e+00> : vector<8xf32>
    %358 = vector.multi_reduction <add>, %357, %cst_228 [1] : vector<8x8xf32> to vector<8xf32>
    %359 = vector.shape_cast %358 : vector<8xf32> to vector<8x1xf32>
    %360 = vector.broadcast %359 : vector<8x1xf32> to vector<8x8xf32>
    %361 = arith.divf %357, %360 : vector<8x8xf32>
    %cst_229 = arith.constant dense<0.000000e+00> : vector<8x16xf32>
    %362 = tpu.matmul %361, %347, %cst_229 {dimension_numbers = #tpu.dot_dimension_numbers<[1], [0], [0], [1], [0, 0, 1, 1], [], []>} : vector<8x8xf32>, vector<8x16xf32>, vector<8x16xf32> -> vector<8x16xf32>
    %c8_230 = arith.constant 8 : index
    %c0_231 = arith.constant 0 : index
    %363 = vector.load %arg19[%c8_230, %c0_231] : memref<32x32xf32, #tpu.memory_space<vmem>>, vector<8x16xf32>
    tpu.vector_store %arg19[%c8_230, %c0_231], %362 {strides = array<i32>} : memref<32x32xf32, #tpu.memory_space<vmem>>, vector<8x16xf32>,
    %c8_232 = arith.constant 8 : index
    %c16_233 = arith.constant 16 : index
    %364 = vector.load %arg18[%c8_232, %c16_233] : memref<32x96xf32, #tpu.memory_space<vmem>>, vector<8x16xf32>
    %c8_234 = arith.constant 8 : index
    %c48_235 = arith.constant 48 : index
    %365 = vector.load %arg18[%c8_234, %c48_235] : memref<32x96xf32, #tpu.memory_space<vmem>>, vector<8x16xf32>
    %c8_236 = arith.constant 8 : index
    %c80_237 = arith.constant 80 : index
    %366 = vector.load %arg18[%c8_236, %c80_237] : memref<32x96xf32, #tpu.memory_space<vmem>>, vector<8x16xf32>
    %cst_238 = arith.constant dense<0.000000e+00> : vector<8x8xf32>
    %367 = tpu.matmul %364, %365, %cst_238 {dimension_numbers = #tpu.dot_dimension_numbers<[1], [1], [0], [0], [0, 0, 1, 0], [], []>} : vector<8x16xf32>, vector<8x16xf32>, vector<8x8xf32> -> vector<8x8xf32>
    %cst_239 = arith.constant 2.500000e-01 : f32
    %368 = vector.broadcast %cst_239 : f32 to vector<8x8xf32>
    %369 = arith.mulf %367, %368 : vector<8x8xf32>
    %370 = vector.broadcast %344 : vector<1x8xf32> to vector<8x8xf32>
    %371 = arith.addf %369, %370 : vector<8x8xf32>
    %cst_240 = arith.constant dense<0xFF800000> : vector<8xf32>
    %372 = vector.multi_reduction <maximumf>, %371, %cst_240 [1] : vector<8x8xf32> to vector<8xf32>
    %373 = vector.shape_cast %372 : vector<8xf32> to vector<8x1xf32>
    %374 = vector.broadcast %373 : vector<8x1xf32> to vector<8x8xf32>
    %375 = arith.subf %371, %374 : vector<8x8xf32>
    %376 = math.exp %375 : vector<8x8xf32>
    %cst_241 = arith.constant dense<0.000000e+00> : vector<8xf32>
    %377 = vector.multi_reduction <add>, %376, %cst_241 [1] : vector<8x8xf32> to vector<8xf32>
    %378 = vector.shape_cast %377 : vector<8xf32> to vector<8x1xf32>
    %379 = vector.broadcast %378 : vector<8x1xf32> to vector<8x8xf32>
    %380 = arith.divf %376, %379 : vector<8x8xf32>
    %cst_242 = arith.constant dense<0.000000e+00> : vector<8x16xf32>
    %381 = tpu.matmul %380, %366, %cst_242 {dimension_numbers = #tpu.dot_dimension_numbers<[1], [0], [0], [1], [0, 0, 1, 1], [], []>} : vector<8x8xf32>, vector<8x16xf32>, vector<8x16xf32> -> vector<8x16xf32>
    %c8_243 = arith.constant 8 : index
    %c16_244 = arith.constant 16 : index
    %382 = vector.load %arg19[%c8_243, %c16_244] : memref<32x32xf32, #tpu.memory_space<vmem>>, vector<8x16xf32>
    tpu.vector_store %arg19[%c8_243, %c16_244], %381 {strides = array<i32>} : memref<32x32xf32, #tpu.memory_space<vmem>>, vector<8x16xf32>,
    %c2_245 = arith.constant 2 : index
    %c0_246 = arith.constant 0 : index
    %383 = vector.load %arg1[%c2_245, %c0_246] : memref<4x8xf32, #tpu.memory_space<vmem>>, vector<1x8xf32>
    %cst_247 = arith.constant 1.000000e+00 : f32
    %384 = vector.broadcast %cst_247 : f32 to vector<1x8xf32>
    %385 = arith.subf %383, %384 : vector<1x8xf32>
    %cst_248 = arith.constant 1.000000e+04 : f32
    %386 = vector.broadcast %cst_248 : f32 to vector<1x8xf32>
    %387 = arith.mulf %385, %386 : vector<1x8xf32>
    %c16_249 = arith.constant 16 : index
    %c0_250 = arith.constant 0 : index
    %388 = vector.load %arg18[%c16_249, %c0_250] : memref<32x96xf32, #tpu.memory_space<vmem>>, vector<8x16xf32>
    %c16_251 = arith.constant 16 : index
    %c32_252 = arith.constant 32 : index
    %389 = vector.load %arg18[%c16_251, %c32_252] : memref<32x96xf32, #tpu.memory_space<vmem>>, vector<8x16xf32>
    %c16_253 = arith.constant 16 : index
    %c64_254 = arith.constant 64 : index
    %390 = vector.load %arg18[%c16_253, %c64_254] : memref<32x96xf32, #tpu.memory_space<vmem>>, vector<8x16xf32>
    %cst_255 = arith.constant dense<0.000000e+00> : vector<8x8xf32>
    %391 = tpu.matmul %388, %389, %cst_255 {dimension_numbers = #tpu.dot_dimension_numbers<[1], [1], [0], [0], [0, 0, 1, 0], [], []>} : vector<8x16xf32>, vector<8x16xf32>, vector<8x8xf32> -> vector<8x8xf32>
    %cst_256 = arith.constant 2.500000e-01 : f32
    %392 = vector.broadcast %cst_256 : f32 to vector<8x8xf32>
    %393 = arith.mulf %391, %392 : vector<8x8xf32>
    %394 = vector.broadcast %387 : vector<1x8xf32> to vector<8x8xf32>
    %395 = arith.addf %393, %394 : vector<8x8xf32>
    %cst_257 = arith.constant dense<0xFF800000> : vector<8xf32>
    %396 = vector.multi_reduction <maximumf>, %395, %cst_257 [1] : vector<8x8xf32> to vector<8xf32>
    %397 = vector.shape_cast %396 : vector<8xf32> to vector<8x1xf32>
    %398 = vector.broadcast %397 : vector<8x1xf32> to vector<8x8xf32>
    %399 = arith.subf %395, %398 : vector<8x8xf32>
    %400 = math.exp %399 : vector<8x8xf32>
    %cst_258 = arith.constant dense<0.000000e+00> : vector<8xf32>
    %401 = vector.multi_reduction <add>, %400, %cst_258 [1] : vector<8x8xf32> to vector<8xf32>
    %402 = vector.shape_cast %401 : vector<8xf32> to vector<8x1xf32>
    %403 = vector.broadcast %402 : vector<8x1xf32> to vector<8x8xf32>
    %404 = arith.divf %400, %403 : vector<8x8xf32>
    %cst_259 = arith.constant dense<0.000000e+00> : vector<8x16xf32>
    %405 = tpu.matmul %404, %390, %cst_259 {dimension_numbers = #tpu.dot_dimension_numbers<[1], [0], [0], [1], [0, 0, 1, 1], [], []>} : vector<8x8xf32>, vector<8x16xf32>, vector<8x16xf32> -> vector<8x16xf32>
    %c16_260 = arith.constant 16 : index
    %c0_261 = arith.constant 0 : index
    %406 = vector.load %arg19[%c16_260, %c0_261] : memref<32x32xf32, #tpu.memory_space<vmem>>, vector<8x16xf32>
    tpu.vector_store %arg19[%c16_260, %c0_261], %405 {strides = array<i32>} : memref<32x32xf32, #tpu.memory_space<vmem>>, vector<8x16xf32>,
    %c16_262 = arith.constant 16 : index
    %c16_263 = arith.constant 16 : index
    %407 = vector.load %arg18[%c16_262, %c16_263] : memref<32x96xf32, #tpu.memory_space<vmem>>, vector<8x16xf32>
    %c16_264 = arith.constant 16 : index
    %c48_265 = arith.constant 48 : index
    %408 = vector.load %arg18[%c16_264, %c48_265] : memref<32x96xf32, #tpu.memory_space<vmem>>, vector<8x16xf32>
    %c16_266 = arith.constant 16 : index
    %c80_267 = arith.constant 80 : index
    %409 = vector.load %arg18[%c16_266, %c80_267] : memref<32x96xf32, #tpu.memory_space<vmem>>, vector<8x16xf32>
    %cst_268 = arith.constant dense<0.000000e+00> : vector<8x8xf32>
    %410 = tpu.matmul %407, %408, %cst_268 {dimension_numbers = #tpu.dot_dimension_numbers<[1], [1], [0], [0], [0, 0, 1, 0], [], []>} : vector<8x16xf32>, vector<8x16xf32>, vector<8x8xf32> -> vector<8x8xf32>
    %cst_269 = arith.constant 2.500000e-01 : f32
    %411 = vector.broadcast %cst_269 : f32 to vector<8x8xf32>
    %412 = arith.mulf %410, %411 : vector<8x8xf32>
    %413 = vector.broadcast %387 : vector<1x8xf32> to vector<8x8xf32>
    %414 = arith.addf %412, %413 : vector<8x8xf32>
    %cst_270 = arith.constant dense<0xFF800000> : vector<8xf32>
    %415 = vector.multi_reduction <maximumf>, %414, %cst_270 [1] : vector<8x8xf32> to vector<8xf32>
    %416 = vector.shape_cast %415 : vector<8xf32> to vector<8x1xf32>
    %417 = vector.broadcast %416 : vector<8x1xf32> to vector<8x8xf32>
    %418 = arith.subf %414, %417 : vector<8x8xf32>
    %419 = math.exp %418 : vector<8x8xf32>
    %cst_271 = arith.constant dense<0.000000e+00> : vector<8xf32>
    %420 = vector.multi_reduction <add>, %419, %cst_271 [1] : vector<8x8xf32> to vector<8xf32>
    %421 = vector.shape_cast %420 : vector<8xf32> to vector<8x1xf32>
    %422 = vector.broadcast %421 : vector<8x1xf32> to vector<8x8xf32>
    %423 = arith.divf %419, %422 : vector<8x8xf32>
    %cst_272 = arith.constant dense<0.000000e+00> : vector<8x16xf32>
    %424 = tpu.matmul %423, %409, %cst_272 {dimension_numbers = #tpu.dot_dimension_numbers<[1], [0], [0], [1], [0, 0, 1, 1], [], []>} : vector<8x8xf32>, vector<8x16xf32>, vector<8x16xf32> -> vector<8x16xf32>
    %c16_273 = arith.constant 16 : index
    %c16_274 = arith.constant 16 : index
    %425 = vector.load %arg19[%c16_273, %c16_274] : memref<32x32xf32, #tpu.memory_space<vmem>>, vector<8x16xf32>
    tpu.vector_store %arg19[%c16_273, %c16_274], %424 {strides = array<i32>} : memref<32x32xf32, #tpu.memory_space<vmem>>, vector<8x16xf32>,
    %c3_275 = arith.constant 3 : index
    %c0_276 = arith.constant 0 : index
    %426 = vector.load %arg1[%c3_275, %c0_276] : memref<4x8xf32, #tpu.memory_space<vmem>>, vector<1x8xf32>
    %cst_277 = arith.constant 1.000000e+00 : f32
    %427 = vector.broadcast %cst_277 : f32 to vector<1x8xf32>
    %428 = arith.subf %426, %427 : vector<1x8xf32>
    %cst_278 = arith.constant 1.000000e+04 : f32
    %429 = vector.broadcast %cst_278 : f32 to vector<1x8xf32>
    %430 = arith.mulf %428, %429 : vector<1x8xf32>
    %c24_279 = arith.constant 24 : index
    %c0_280 = arith.constant 0 : index
    %431 = vector.load %arg18[%c24_279, %c0_280] : memref<32x96xf32, #tpu.memory_space<vmem>>, vector<8x16xf32>
    %c24_281 = arith.constant 24 : index
    %c32_282 = arith.constant 32 : index
    %432 = vector.load %arg18[%c24_281, %c32_282] : memref<32x96xf32, #tpu.memory_space<vmem>>, vector<8x16xf32>
    %c24_283 = arith.constant 24 : index
    %c64_284 = arith.constant 64 : index
    %433 = vector.load %arg18[%c24_283, %c64_284] : memref<32x96xf32, #tpu.memory_space<vmem>>, vector<8x16xf32>
    %cst_285 = arith.constant dense<0.000000e+00> : vector<8x8xf32>
    %434 = tpu.matmul %431, %432, %cst_285 {dimension_numbers = #tpu.dot_dimension_numbers<[1], [1], [0], [0], [0, 0, 1, 0], [], []>} : vector<8x16xf32>, vector<8x16xf32>, vector<8x8xf32> -> vector<8x8xf32>
    %cst_286 = arith.constant 2.500000e-01 : f32
    %435 = vector.broadcast %cst_286 : f32 to vector<8x8xf32>
    %436 = arith.mulf %434, %435 : vector<8x8xf32>
    %437 = vector.broadcast %430 : vector<1x8xf32> to vector<8x8xf32>
    %438 = arith.addf %436, %437 : vector<8x8xf32>
    %cst_287 = arith.constant dense<0xFF800000> : vector<8xf32>
    %439 = vector.multi_reduction <maximumf>, %438, %cst_287 [1] : vector<8x8xf32> to vector<8xf32>
    %440 = vector.shape_cast %439 : vector<8xf32> to vector<8x1xf32>
    %441 = vector.broadcast %440 : vector<8x1xf32> to vector<8x8xf32>
    %442 = arith.subf %438, %441 : vector<8x8xf32>
    %443 = math.exp %442 : vector<8x8xf32>
    %cst_288 = arith.constant dense<0.000000e+00> : vector<8xf32>
    %444 = vector.multi_reduction <add>, %443, %cst_288 [1] : vector<8x8xf32> to vector<8xf32>
    %445 = vector.shape_cast %444 : vector<8xf32> to vector<8x1xf32>
    %446 = vector.broadcast %445 : vector<8x1xf32> to vector<8x8xf32>
    %447 = arith.divf %443, %446 : vector<8x8xf32>
    %cst_289 = arith.constant dense<0.000000e+00> : vector<8x16xf32>
    %448 = tpu.matmul %447, %433, %cst_289 {dimension_numbers = #tpu.dot_dimension_numbers<[1], [0], [0], [1], [0, 0, 1, 1], [], []>} : vector<8x8xf32>, vector<8x16xf32>, vector<8x16xf32> -> vector<8x16xf32>
    %c24_290 = arith.constant 24 : index
    %c0_291 = arith.constant 0 : index
    %449 = vector.load %arg19[%c24_290, %c0_291] : memref<32x32xf32, #tpu.memory_space<vmem>>, vector<8x16xf32>
    tpu.vector_store %arg19[%c24_290, %c0_291], %448 {strides = array<i32>} : memref<32x32xf32, #tpu.memory_space<vmem>>, vector<8x16xf32>,
    %c24_292 = arith.constant 24 : index
    %c16_293 = arith.constant 16 : index
    %450 = vector.load %arg18[%c24_292, %c16_293] : memref<32x96xf32, #tpu.memory_space<vmem>>, vector<8x16xf32>
    %c24_294 = arith.constant 24 : index
    %c48_295 = arith.constant 48 : index
    %451 = vector.load %arg18[%c24_294, %c48_295] : memref<32x96xf32, #tpu.memory_space<vmem>>, vector<8x16xf32>
    %c24_296 = arith.constant 24 : index
    %c80_297 = arith.constant 80 : index
    %452 = vector.load %arg18[%c24_296, %c80_297] : memref<32x96xf32, #tpu.memory_space<vmem>>, vector<8x16xf32>
    %cst_298 = arith.constant dense<0.000000e+00> : vector<8x8xf32>
    %453 = tpu.matmul %450, %451, %cst_298 {dimension_numbers = #tpu.dot_dimension_numbers<[1], [1], [0], [0], [0, 0, 1, 0], [], []>} : vector<8x16xf32>, vector<8x16xf32>, vector<8x8xf32> -> vector<8x8xf32>
    %cst_299 = arith.constant 2.500000e-01 : f32
    %454 = vector.broadcast %cst_299 : f32 to vector<8x8xf32>
    %455 = arith.mulf %453, %454 : vector<8x8xf32>
    %456 = vector.broadcast %430 : vector<1x8xf32> to vector<8x8xf32>
    %457 = arith.addf %455, %456 : vector<8x8xf32>
    %cst_300 = arith.constant dense<0xFF800000> : vector<8xf32>
    %458 = vector.multi_reduction <maximumf>, %457, %cst_300 [1] : vector<8x8xf32> to vector<8xf32>
    %459 = vector.shape_cast %458 : vector<8xf32> to vector<8x1xf32>
    %460 = vector.broadcast %459 : vector<8x1xf32> to vector<8x8xf32>
    %461 = arith.subf %457, %460 : vector<8x8xf32>
    %462 = math.exp %461 : vector<8x8xf32>
    %cst_301 = arith.constant dense<0.000000e+00> : vector<8xf32>
    %463 = vector.multi_reduction <add>, %462, %cst_301 [1] : vector<8x8xf32> to vector<8xf32>
    %464 = vector.shape_cast %463 : vector<8xf32> to vector<8x1xf32>
    %465 = vector.broadcast %464 : vector<8x1xf32> to vector<8x8xf32>
    %466 = arith.divf %462, %465 : vector<8x8xf32>
    %cst_302 = arith.constant dense<0.000000e+00> : vector<8x16xf32>
    %467 = tpu.matmul %466, %452, %cst_302 {dimension_numbers = #tpu.dot_dimension_numbers<[1], [0], [0], [1], [0, 0, 1, 1], [], []>} : vector<8x8xf32>, vector<8x16xf32>, vector<8x16xf32> -> vector<8x16xf32>
    %c24_303 = arith.constant 24 : index
    %c16_304 = arith.constant 16 : index
    %468 = vector.load %arg19[%c24_303, %c16_304] : memref<32x32xf32, #tpu.memory_space<vmem>>, vector<8x16xf32>
    tpu.vector_store %arg19[%c24_303, %c16_304], %467 {strides = array<i32>} : memref<32x32xf32, #tpu.memory_space<vmem>>, vector<8x16xf32>,
    %c0_305 = arith.constant 0 : index
    %c0_306 = arith.constant 0 : index
    %469 = vector.load %arg19[%c0_305, %c0_306] : memref<32x32xf32, #tpu.memory_space<vmem>>, vector<32x32xf32>
    %c1_307 = arith.constant 1 : index
    %c0_308 = arith.constant 0 : index
    %c0_309 = arith.constant 0 : index
    %470 = vector.load %arg6[%c1_307, %c0_308, %c0_309] : memref<2x32x32xf32, #tpu.memory_space<vmem>>, vector<1x32x32xf32>
    %471 = vector.shape_cast %470 : vector<1x32x32xf32> to vector<32x32xf32>
    %cst_310 = arith.constant dense<0.000000e+00> : vector<32x32xf32>
    %472 = tpu.matmul %469, %471, %cst_310 {dimension_numbers = #tpu.dot_dimension_numbers<[1], [0], [0], [1], [0, 0, 1, 1], [], []>} : vector<32x32xf32>, vector<32x32xf32>, vector<32x32xf32> -> vector<32x32xf32>
    %c1_311 = arith.constant 1 : index
    %c0_312 = arith.constant 0 : index
    %c0_313 = arith.constant 0 : index
    %473 = vector.load %arg7[%c1_311, %c0_312, %c0_313] : memref<2x1x32xf32, #tpu.memory_space<vmem>>, vector<1x1x32xf32>
    %474 = vector.shape_cast %473 : vector<1x1x32xf32> to vector<1x32xf32>
    %475 = vector.broadcast %474 : vector<1x32xf32> to vector<32x32xf32>
    %476 = arith.addf %472, %475 : vector<32x32xf32>
    %477 = arith.addf %288, %476 : vector<32x32xf32>
    %c1_314 = arith.constant 1 : index
    %c0_315 = arith.constant 0 : index
    %c0_316 = arith.constant 0 : index
    %478 = vector.load %arg8[%c1_314, %c0_315, %c0_316] : memref<2x1x32xf32, #tpu.memory_space<vmem>>, vector<1x1x32xf32>
    %479 = vector.shape_cast %478 : vector<1x1x32xf32> to vector<1x32xf32>
    %c1_317 = arith.constant 1 : index
    %c0_318 = arith.constant 0 : index
    %c0_319 = arith.constant 0 : index
    %480 = vector.load %arg9[%c1_317, %c0_318, %c0_319] : memref<2x1x32xf32, #tpu.memory_space<vmem>>, vector<1x1x32xf32>
    %481 = vector.shape_cast %480 : vector<1x1x32xf32> to vector<1x32xf32>
    %cst_320 = arith.constant dense<0.000000e+00> : vector<32xf32>
    %482 = vector.multi_reduction <add>, %477, %cst_320 [1] : vector<32x32xf32> to vector<32xf32>
    %483 = vector.shape_cast %482 : vector<32xf32> to vector<32x1xf32>
    %cst_321 = arith.constant 3.200000e+01 : f32
    %484 = vector.broadcast %cst_321 : f32 to vector<32x1xf32>
    %485 = arith.divf %483, %484 : vector<32x1xf32>
    %486 = vector.broadcast %485 : vector<32x1xf32> to vector<32x32xf32>
    %487 = arith.subf %477, %486 : vector<32x32xf32>
    %488 = arith.mulf %487, %487 : vector<32x32xf32>
    %cst_322 = arith.constant dense<0.000000e+00> : vector<32xf32>
    %489 = vector.multi_reduction <add>, %488, %cst_322 [1] : vector<32x32xf32> to vector<32xf32>
    %490 = vector.shape_cast %489 : vector<32xf32> to vector<32x1xf32>
    %cst_323 = arith.constant 3.200000e+01 : f32
    %491 = vector.broadcast %cst_323 : f32 to vector<32x1xf32>
    %492 = arith.divf %490, %491 : vector<32x1xf32>
    %493 = vector.broadcast %485 : vector<32x1xf32> to vector<32x32xf32>
    %494 = arith.subf %477, %493 : vector<32x32xf32>
    %cst_324 = arith.constant 9.99999996E-13 : f32
    %495 = vector.broadcast %cst_324 : f32 to vector<32x1xf32>
    %496 = arith.addf %492, %495 : vector<32x1xf32>
    %497 = math.rsqrt %496 : vector<32x1xf32>
    %498 = vector.broadcast %497 : vector<32x1xf32> to vector<32x32xf32>
    %499 = arith.mulf %494, %498 : vector<32x32xf32>
    %500 = vector.broadcast %479 : vector<1x32xf32> to vector<32x32xf32>
    %501 = arith.mulf %499, %500 : vector<32x32xf32>
    %502 = vector.broadcast %481 : vector<1x32xf32> to vector<32x32xf32>
    %503 = arith.addf %501, %502 : vector<32x32xf32>
    %c1_325 = arith.constant 1 : index
    %c0_326 = arith.constant 0 : index
    %c0_327 = arith.constant 0 : index
    %504 = vector.load %arg10[%c1_325, %c0_326, %c0_327] : memref<2x32x64xf32, #tpu.memory_space<vmem>>, vector<1x32x64xf32>
    %505 = vector.shape_cast %504 : vector<1x32x64xf32> to vector<32x64xf32>
    %cst_328 = arith.constant dense<0.000000e+00> : vector<32x64xf32>
    %506 = tpu.matmul %503, %505, %cst_328 {dimension_numbers = #tpu.dot_dimension_numbers<[1], [0], [0], [1], [0, 0, 1, 1], [], []>} : vector<32x32xf32>, vector<32x64xf32>, vector<32x64xf32> -> vector<32x64xf32>
    %c1_329 = arith.constant 1 : index
    %c0_330 = arith.constant 0 : index
    %c0_331 = arith.constant 0 : index
    %507 = vector.load %arg11[%c1_329, %c0_330, %c0_331] : memref<2x1x64xf32, #tpu.memory_space<vmem>>, vector<1x1x64xf32>
    %508 = vector.shape_cast %507 : vector<1x1x64xf32> to vector<1x64xf32>
    %509 = vector.broadcast %508 : vector<1x64xf32> to vector<32x64xf32>
    %510 = arith.addf %506, %509 : vector<32x64xf32>
    %cst_332 = arith.constant 5.000000e-01 : f32
    %511 = vector.broadcast %cst_332 : f32 to vector<32x64xf32>
    %512 = arith.mulf %511, %510 : vector<32x64xf32>
    %cst_333 = arith.constant 0.707106769 : f32
    %513 = vector.broadcast %cst_333 : f32 to vector<32x64xf32>
    %514 = arith.mulf %510, %513 : vector<32x64xf32>
    %515 = math.erf %514 : vector<32x64xf32>
    %cst_334 = arith.constant 1.000000e+00 : f32
    %516 = vector.broadcast %cst_334 : f32 to vector<32x64xf32>
    %517 = arith.addf %516, %515 : vector<32x64xf32>
    %518 = arith.mulf %512, %517 : vector<32x64xf32>
    %c1_335 = arith.constant 1 : index
    %c0_336 = arith.constant 0 : index
    %c0_337 = arith.constant 0 : index
    %519 = vector.load %arg12[%c1_335, %c0_336, %c0_337] : memref<2x64x32xf32, #tpu.memory_space<vmem>>, vector<1x64x32xf32>
    %520 = vector.shape_cast %519 : vector<1x64x32xf32> to vector<64x32xf32>
    %cst_338 = arith.constant dense<0.000000e+00> : vector<32x32xf32>
    %521 = tpu.matmul %518, %520, %cst_338 {dimension_numbers = #tpu.dot_dimension_numbers<[1], [0], [0], [1], [0, 0, 1, 1], [], []>} : vector<32x64xf32>, vector<64x32xf32>, vector<32x32xf32> -> vector<32x32xf32>
    %c1_339 = arith.constant 1 : index
    %c0_340 = arith.constant 0 : index
    %c0_341 = arith.constant 0 : index
    %522 = vector.load %arg13[%c1_339, %c0_340, %c0_341] : memref<2x1x32xf32, #tpu.memory_space<vmem>>, vector<1x1x32xf32>
    %523 = vector.shape_cast %522 : vector<1x1x32xf32> to vector<1x32xf32>
    %524 = vector.broadcast %523 : vector<1x32xf32> to vector<32x32xf32>
    %525 = arith.addf %521, %524 : vector<32x32xf32>
    %526 = arith.addf %503, %525 : vector<32x32xf32>
    %c1_342 = arith.constant 1 : index
    %c0_343 = arith.constant 0 : index
    %c0_344 = arith.constant 0 : index
    %527 = vector.load %arg14[%c1_342, %c0_343, %c0_344] : memref<2x1x32xf32, #tpu.memory_space<vmem>>, vector<1x1x32xf32>
    %528 = vector.shape_cast %527 : vector<1x1x32xf32> to vector<1x32xf32>
    %c1_345 = arith.constant 1 : index
    %c0_346 = arith.constant 0 : index
    %c0_347 = arith.constant 0 : index
    %529 = vector.load %arg15[%c1_345, %c0_346, %c0_347] : memref<2x1x32xf32, #tpu.memory_space<vmem>>, vector<1x1x32xf32>
    %530 = vector.shape_cast %529 : vector<1x1x32xf32> to vector<1x32xf32>
    %cst_348 = arith.constant dense<0.000000e+00> : vector<32xf32>
    %531 = vector.multi_reduction <add>, %526, %cst_348 [1] : vector<32x32xf32> to vector<32xf32>
    %532 = vector.shape_cast %531 : vector<32xf32> to vector<32x1xf32>
    %cst_349 = arith.constant 3.200000e+01 : f32
    %533 = vector.broadcast %cst_349 : f32 to vector<32x1xf32>
    %534 = arith.divf %532, %533 : vector<32x1xf32>
    %535 = vector.broadcast %534 : vector<32x1xf32> to vector<32x32xf32>
    %536 = arith.subf %526, %535 : vector<32x32xf32>
    %537 = arith.mulf %536, %536 : vector<32x32xf32>
    %cst_350 = arith.constant dense<0.000000e+00> : vector<32xf32>
    %538 = vector.multi_reduction <add>, %537, %cst_350 [1] : vector<32x32xf32> to vector<32xf32>
    %539 = vector.shape_cast %538 : vector<32xf32> to vector<32x1xf32>
    %cst_351 = arith.constant 3.200000e+01 : f32
    %540 = vector.broadcast %cst_351 : f32 to vector<32x1xf32>
    %541 = arith.divf %539, %540 : vector<32x1xf32>
    %542 = vector.broadcast %534 : vector<32x1xf32> to vector<32x32xf32>
    %543 = arith.subf %526, %542 : vector<32x32xf32>
    %cst_352 = arith.constant 9.99999996E-13 : f32
    %544 = vector.broadcast %cst_352 : f32 to vector<32x1xf32>
    %545 = arith.addf %541, %544 : vector<32x1xf32>
    %546 = math.rsqrt %545 : vector<32x1xf32>
    %547 = vector.broadcast %546 : vector<32x1xf32> to vector<32x32xf32>
    %548 = arith.mulf %543, %547 : vector<32x32xf32>
    %549 = vector.broadcast %528 : vector<1x32xf32> to vector<32x32xf32>
    %550 = arith.mulf %548, %549 : vector<32x32xf32>
    %551 = vector.broadcast %530 : vector<1x32xf32> to vector<32x32xf32>
    %552 = arith.addf %550, %551 : vector<32x32xf32>
    %c0_353 = arith.constant 0 : index
    %c0_354 = arith.constant 0 : index
    %553 = vector.load %arg1[%c0_353, %c0_354] : memref<4x8xf32, #tpu.memory_space<vmem>>, vector<1x8xf32>
    %554 = vector.extract_strided_slice %552 {offsets = [0, 0], sizes = [8, 32], strides = [1, 1]} : vector<32x32xf32> to vector<8x32xf32>
    %cst_355 = arith.constant dense<0.000000e+00> : vector<1x32xf32>
    %555 = tpu.matmul %553, %554, %cst_355 {dimension_numbers = #tpu.dot_dimension_numbers<[1], [0], [0], [1], [0, 0, 1, 1], [], []>} : vector<1x8xf32>, vector<8x32xf32>, vector<1x32xf32> -> vector<1x32xf32>
    %cst_356 = arith.constant dense<0.000000e+00> : vector<1xf32>
    %556 = vector.multi_reduction <add>, %553, %cst_356 [1] : vector<1x8xf32> to vector<1xf32>
    %557 = vector.shape_cast %556 : vector<1xf32> to vector<1x1xf32>
    %cst_357 = arith.constant 9.99999971E-10 : f32
    %558 = vector.broadcast %cst_357 : f32 to vector<1x1xf32>
    %559 = arith.maximumf %557, %558 : vector<1x1xf32>
    %560 = vector.broadcast %559 : vector<1x1xf32> to vector<1x32xf32>
    %561 = arith.divf %555, %560 : vector<1x32xf32>
    %c0_358 = arith.constant 0 : index
    %c0_359 = arith.constant 0 : index
    %562 = vector.load %arg20[%c0_358, %c0_359] : memref<4x32xf32, #tpu.memory_space<vmem>>, vector<1x32xf32>
    tpu.vector_store %arg20[%c0_358, %c0_359], %561 {strides = array<i32>} : memref<4x32xf32, #tpu.memory_space<vmem>>, vector<1x32xf32>,
    %c1_360 = arith.constant 1 : index
    %c0_361 = arith.constant 0 : index
    %563 = vector.load %arg1[%c1_360, %c0_361] : memref<4x8xf32, #tpu.memory_space<vmem>>, vector<1x8xf32>
    %564 = vector.extract_strided_slice %552 {offsets = [8, 0], sizes = [8, 32], strides = [1, 1]} : vector<32x32xf32> to vector<8x32xf32>
    %cst_362 = arith.constant dense<0.000000e+00> : vector<1x32xf32>
    %565 = tpu.matmul %563, %564, %cst_362 {dimension_numbers = #tpu.dot_dimension_numbers<[1], [0], [0], [1], [0, 0, 1, 1], [], []>} : vector<1x8xf32>, vector<8x32xf32>, vector<1x32xf32> -> vector<1x32xf32>
    %cst_363 = arith.constant dense<0.000000e+00> : vector<1xf32>
    %566 = vector.multi_reduction <add>, %563, %cst_363 [1] : vector<1x8xf32> to vector<1xf32>
    %567 = vector.shape_cast %566 : vector<1xf32> to vector<1x1xf32>
    %cst_364 = arith.constant 9.99999971E-10 : f32
    %568 = vector.broadcast %cst_364 : f32 to vector<1x1xf32>
    %569 = arith.maximumf %567, %568 : vector<1x1xf32>
    %570 = vector.broadcast %569 : vector<1x1xf32> to vector<1x32xf32>
    %571 = arith.divf %565, %570 : vector<1x32xf32>
    %c1_365 = arith.constant 1 : index
    %c0_366 = arith.constant 0 : index
    %572 = vector.load %arg20[%c1_365, %c0_366] : memref<4x32xf32, #tpu.memory_space<vmem>>, vector<1x32xf32>
    tpu.vector_store %arg20[%c1_365, %c0_366], %571 {strides = array<i32>} : memref<4x32xf32, #tpu.memory_space<vmem>>, vector<1x32xf32>,
    %c2_367 = arith.constant 2 : index
    %c0_368 = arith.constant 0 : index
    %573 = vector.load %arg1[%c2_367, %c0_368] : memref<4x8xf32, #tpu.memory_space<vmem>>, vector<1x8xf32>
    %574 = vector.extract_strided_slice %552 {offsets = [16, 0], sizes = [8, 32], strides = [1, 1]} : vector<32x32xf32> to vector<8x32xf32>
    %cst_369 = arith.constant dense<0.000000e+00> : vector<1x32xf32>
    %575 = tpu.matmul %573, %574, %cst_369 {dimension_numbers = #tpu.dot_dimension_numbers<[1], [0], [0], [1], [0, 0, 1, 1], [], []>} : vector<1x8xf32>, vector<8x32xf32>, vector<1x32xf32> -> vector<1x32xf32>
    %cst_370 = arith.constant dense<0.000000e+00> : vector<1xf32>
    %576 = vector.multi_reduction <add>, %573, %cst_370 [1] : vector<1x8xf32> to vector<1xf32>
    %577 = vector.shape_cast %576 : vector<1xf32> to vector<1x1xf32>
    %cst_371 = arith.constant 9.99999971E-10 : f32
    %578 = vector.broadcast %cst_371 : f32 to vector<1x1xf32>
    %579 = arith.maximumf %577, %578 : vector<1x1xf32>
    %580 = vector.broadcast %579 : vector<1x1xf32> to vector<1x32xf32>
    %581 = arith.divf %575, %580 : vector<1x32xf32>
    %c2_372 = arith.constant 2 : index
    %c0_373 = arith.constant 0 : index
    %582 = vector.load %arg20[%c2_372, %c0_373] : memref<4x32xf32, #tpu.memory_space<vmem>>, vector<1x32xf32>
    tpu.vector_store %arg20[%c2_372, %c0_373], %581 {strides = array<i32>} : memref<4x32xf32, #tpu.memory_space<vmem>>, vector<1x32xf32>,
    %c3_374 = arith.constant 3 : index
    %c0_375 = arith.constant 0 : index
    %583 = vector.load %arg1[%c3_374, %c0_375] : memref<4x8xf32, #tpu.memory_space<vmem>>, vector<1x8xf32>
    %584 = vector.extract_strided_slice %552 {offsets = [24, 0], sizes = [8, 32], strides = [1, 1]} : vector<32x32xf32> to vector<8x32xf32>
    %cst_376 = arith.constant dense<0.000000e+00> : vector<1x32xf32>
    %585 = tpu.matmul %583, %584, %cst_376 {dimension_numbers = #tpu.dot_dimension_numbers<[1], [0], [0], [1], [0, 0, 1, 1], [], []>} : vector<1x8xf32>, vector<8x32xf32>, vector<1x32xf32> -> vector<1x32xf32>
    %cst_377 = arith.constant dense<0.000000e+00> : vector<1xf32>
    %586 = vector.multi_reduction <add>, %583, %cst_377 [1] : vector<1x8xf32> to vector<1xf32>
    %587 = vector.shape_cast %586 : vector<1xf32> to vector<1x1xf32>
    %cst_378 = arith.constant 9.99999971E-10 : f32
    %588 = vector.broadcast %cst_378 : f32 to vector<1x1xf32>
    %589 = arith.maximumf %587, %588 : vector<1x1xf32>
    %590 = vector.broadcast %589 : vector<1x1xf32> to vector<1x32xf32>
    %591 = arith.divf %585, %590 : vector<1x32xf32>
    %c3_379 = arith.constant 3 : index
    %c0_380 = arith.constant 0 : index
    %592 = vector.load %arg20[%c3_379, %c0_380] : memref<4x32xf32, #tpu.memory_space<vmem>>, vector<1x32xf32>
    tpu.vector_store %arg20[%c3_379, %c0_380], %591 {strides = array<i32>} : memref<4x32xf32, #tpu.memory_space<vmem>>, vector<1x32xf32>,
    %c0_381 = arith.constant 0 : index
    %c0_382 = arith.constant 0 : index
    %593 = vector.load %arg20[%c0_381, %c0_382] : memref<4x32xf32, #tpu.memory_space<vmem>>, vector<2x32xf32>
    %c2_383 = arith.constant 2 : index
    %c0_384 = arith.constant 0 : index
    %594 = vector.load %arg20[%c2_383, %c0_384] : memref<4x32xf32, #tpu.memory_space<vmem>>, vector<2x32xf32>
    %cst_385 = arith.constant dense<0.000000e+00> : vector<2x2xf32>
    %595 = tpu.matmul %594, %593, %cst_385 {dimension_numbers = #tpu.dot_dimension_numbers<[1], [1], [0], [0], [0, 0, 1, 0], [], []>} : vector<2x32xf32>, vector<2x32xf32>, vector<2x2xf32> -> vector<2x2xf32>
    %c0_386 = arith.constant 0 : index
    %c0_387 = arith.constant 0 : index
    %596 = vector.load %arg17[%c0_386, %c0_387] : memref<2x2xf32, #tpu.memory_space<vmem>>, vector<2x2xf32>
    tpu.vector_store %arg17[%c0_386, %c0_387], %595 {strides = array<i32>} : memref<2x2xf32, #tpu.memory_space<vmem>>, vector<2x2xf32>,
    %cst_388 = arith.constant dense<0.000000e+00> : vector<2xf32>
    %597 = vector.multi_reduction <add>, %595, %cst_388 [0] : vector<2x2xf32> to vector<2xf32>
    %598 = vector.shape_cast %597 : vector<2xf32> to vector<1x2xf32>
    %599 = tpu.iota {dimensions = array<i32: 0>} : vector<2x2xi32>
    %600 = tpu.iota {dimensions = array<i32: 1>} : vector<2x2xi32>
    %601 = arith.cmpi eq, %599, %600 : vector<2x2xi32>
    %cst_389 = arith.constant 0.000000e+00 : f32
    %602 = vector.broadcast %cst_389 : f32 to vector<2x2xf32>
    %603 = arith.select %601, %595, %602 : vector<2x2xi1>, vector<2x2xf32>
    %cst_390 = arith.constant dense<0.000000e+00> : vector<2xf32>
    %604 = vector.multi_reduction <add>, %603, %cst_390 [1] : vector<2x2xf32> to vector<2xf32>
    %605 = vector.shape_cast %604 : vector<2xf32> to vector<2x1xf32>
    %606 = vector.broadcast %605 : vector<2x1xf32> to vector<2x2xf32>
    %607 = vector.broadcast %598 : vector<1x2xf32> to vector<2x2xf32>
    %608 = arith.divf %606, %607 : vector<2x2xf32>
    %609 = vector.broadcast %605 : vector<2x1xf32> to vector<2x2xf32>
    %610 = arith.addf %609, %608 : vector<2x2xf32>
    %c0_391 = arith.constant 0 : index
    %c0_392 = arith.constant 0 : index
    %611 = vector.load %arg16[%c0_391, %c0_392] : memref<2x2xf32, #tpu.memory_space<vmem>>, vector<2x2xf32>
    tpu.vector_store %arg16[%c0_391, %c0_392], %610 {strides = array<i32>} : memref<2x2xf32, #tpu.memory_space<vmem>>, vector<2x2xf32>,
    return
  }
}

</mosaic_0001>

<bundles_post_ra>
// kernel: _lambda_.1
= control target key start
LH: loop header
LB: loop body
LE: loop exit
PB: predicated region body
PF: predicated region fallthrough
CT: control target
= control target key end

     0   :  { %s6272_s0 = inlined_call_operand.vmem [shape: f32[32,32], index: 0, kind: input, shape index: {}]   ;;  %s6273_s1 = inlined_call_operand.vmem [shape: f32[4,8], index: 1, kind: input, shape index: {}]   ;;  %s6274_s2 = inlined_call_operand.vmem [shape: f32[1,32], index: 2, kind: input, shape index: {}]   ;;  %s6275_s3 = inlined_call_operand.vmem [shape: f32[1,32], index: 3, kind: input, shape index: {}]   ;;  %s6276_s4 = inlined_call_operand.vmem [shape: f32[2,32,96], index: 4, kind: input, shape index: {}]   ;;  %s6277_s5 = inlined_call_operand.vmem [shape: f32[2,1,96], index: 5, kind: input, shape index: {}]   ;;  %s6278_s6 = inlined_call_operand.vmem [shape: f32[2,32,32], index: 6, kind: input, shape index: {}]   ;;  %s6279_s7 = inlined_call_operand.vmem [shape: f32[2,1,32], index: 7, kind: input, shape index: {}, may-alias: {7,9,13,15}]   ;;  %s6280_s8 = inlined_call_operand.vmem [shape: f32[2,1,32], index: 8, kind: input, shape index: {}, may-alias: {8,14}]   ;;  %s6281_s9 = inlined_call_operand.vmem [shape: f32[2,1,32], index: 9, kind: input, shape index: {}, may-alias: {7,9,13,15}]   ;;  %s6282_s10 = inlined_call_operand.vmem [shape: f32[2,32,64], index: 10, kind: input, shape index: {}]   ;;  %s6283_s11 = inlined_call_operand.vmem [shape: f32[2,1,64], index: 11, kind: input, shape index: {}]   ;;  %s6284_s12 = inlined_call_operand.vmem [shape: f32[2,64,32], index: 12, kind: input, shape index: {}]   ;;  %s6285_s13 = inlined_call_operand.vmem [shape: f32[2,1,32], index: 13, kind: input, shape index: {}, may-alias: {7,9,13,15}]   ;;  %s6286_s14 = inlined_call_operand.vmem [shape: f32[2,1,32], index: 14, kind: input, shape index: {}, may-alias: {8,14}]   ;;  %s6287_s15 = inlined_call_operand.vmem [shape: f32[2,1,32], index: 15, kind: input, shape index: {}, may-alias: {7,9,13,15}]   ;;  %s6288_s16 = inlined_call_operand.hbm [shape: f32[2,2], index: 16, kind: output, shape index: {0}]   ;;  %s6289_s17 = inlined_call_operand.hbm [shape: f32[2,2], index: 17, kind: output, shape index: {1}]  }
   0x1   :  { %6292 = sst [smem:[#allocation11_spill]] %s6272_s0 }
   0x2   :  { %6293 = sst [smem:[#allocation12_spill]] %s6273_s1 }
   0x3   :  { %23 = vsyncpa [#allocation6], 0  ;;  %s6294_s26 = sld [smem:[#allocation11_spill]]  ;;  %vm63_vm0 = vcmask 261120  }
   0x9   :  { %v57_v0 = vld [vmem:[%s6294_s26] sm:$0xff]  ;;  %v58_v1 = vld [vmem:[%s6294_s26 + $0x8] sm:$0xff] }
   0xa   :  { %24 = vsyncpa [#allocation8], 0  ;;  %v64_v2 = vsel %vm63_vm0, %v57_v0, 0.0  ;;  %v67_v3 = vsel %vm63_vm0, %v58_v1, 0.0  ;;  %v140_v14 = vld [vmem:[%s6276_s4 + $0x18] sm:$0xff]  ;;  %v139_v15 = vld [vmem:[%s6276_s4 + $0x10] sm:$0xff] }
   0xb   :  { %65 = vadd.xlane.f32.xlu0 %v64_v2  ;;  %4926 = vmatprep.subr.mxu0 %v140_v14  ;;  %v138_v16 = vld [vmem:[%s6276_s4 + $0x8] sm:$0xff]  ;;  %v137_v17 = vld [vmem:[%s6276_s4] sm:$0xff]  ;;  %v59_v18 = vld [vmem:[%s6294_s26 + $0x10] sm:$0xff]  ;;  %v5423_v48 = vmov 0.0   ;;  %vm245_vm1 = vcmask 785408   ;;  %vm5424_vm2 = vmmov 0  }
   0xc   :  { %4927 = vmatpush3.msra.mxu0 %v140_v14  ;;  %v60_v19 = vld [vmem:[%s6294_s26 + $0x18] sm:$0xff]  ;;  %v70_v20 = vsel %vm63_vm0, %v59_v18, 0.0  ;;  %v4640_v29 = vld [vmem:[%s6274_s2] ss:$0 sm:$0xff]  ;;  %4940 = vmatprep.subr.mxu1 %v5423_v48  ;;  %s5425_s0 = smov 96   ;;  %s5426_s30 = smov 64   ;;  %v333_v14 = vlaneseq }
   0xd   :  { %4928 = vmatprep.subr.mxu0 %v139_v15  ;;  %v73_v21 = vsel %vm63_vm0, %v60_v19, 0.0  ;;  %v4641_v31 = vld [vmem:[%s6275_s3] ss:$0 sm:$0xff]  ;;  %4942 = vmatprep.mubr.msk.f32.mxu1 %vm5424_vm2, %v5423_v48  ;;  %s5427_s18 = smov 112   ;;  %s5428_s19 = smov 80   ;;  %vm257_vm3 = vcmask 130048  }
   0xe   :  { %4929 = vmatpush3.msra.mxu0 %v139_v15  ;;  %v4642_v49 = vld [vmem:[%s6277_s5] ss:$0 sm:$0xff]  ;;  %s6295_s21 = sld [smem:[#allocation12_spill]]  ;;  %vm338_vm4 = vcmask 64512   ;;  %s5429_s26 = smov 48   ;;  %vm600_vm5 = vcmask 261248  }
   0xf   :  { %68 = vadd.xlane.f32.xlu0 %v67_v3  ;;  %4930 = vmatprep.subr.mxu0 %v138_v16  ;;  %s5430_s29 = smov 16   ;;  %vm1982_vm6 = vcmask 523264   ;;  %vm4260_vm7 = vcmask 57344   ;;  %vm4267_vm8 = vcmask 253952   ;;  %vm4590_vm9 = vcmask 9216  }
  0x10   :  { %4931 = vmatpush3.msra.mxu0 %v138_v16 }
  0x11   :  { %4932 = vmatprep.subr.mxu0 %v137_v17 }
  0x12   :  { %4933 = vmatpush3.msra.mxu0 %v137_v17  ;;  %v5627_v17 = vshrl.u32 %v333_v14, 7 }
  0x13   :  { %4955 = vmatprep.subr.mxu0 %v5423_v48 }
  0x14   :  { %v250_v15 = vld [vmem:[%s6295_s21] sm:$0x1] }
  0x15   :  { %v4647_v16 = vadd.f32 -1.0, %v250_v15 }
  0x94   :  { %v66_v4 = vpop.xlane.xlu0 %65 }
  0x95   :  { %v77_v5 = vmul.f32 0.03125, %v66_v4 }
  0x97   :  { %v81_v6 = vsub.f32 %v57_v0, %v77_v5 }
  0x98   :  { %v69_v7 = vpop.xlane.xlu0 %68 }
  0x99   :  { %v78_v8 = vmul.f32 0.03125, %v69_v7  ;;  %v85_v9 = vmul.f32 %v81_v6, %v81_v6 }
  0x9b   :  { %v82_v10 = vsub.f32 %v58_v1, %v78_v8  ;;  %v89_v11 = vsel %vm63_vm0, %v85_v9, 0.0 }
  0x9c   :  { %90 = vadd.xlane.f32.xlu1 %v89_v11 }
  0x9d   :  { %v86_v12 = vmul.f32 %v82_v10, %v82_v10 }
  0x9f   :  { %v92_v13 = vsel %vm63_vm0, %v86_v12, 0.0 }
  0xa0   :  { %93 = vadd.xlane.f32.xlu1 %v92_v13 }
  0xa4   :  { %71 = vadd.xlane.f32.xlu1 %v70_v20 }
  0xa8   :  { %74 = vadd.xlane.f32.xlu1 %v73_v21 }
 0x125   :  { %v91_v22 = vpop.xlane.xlu1 %90 }
 0x126   :  { %v101_v23 = vmul.f32 0.03125, %v91_v22 }
 0x128   :  { %v105_v24 = vadd.f32 1e-12, %v101_v23 }
 0x129   :  { %v94_v25 = vpop.xlane.xlu1 %93 }
 0x12a   :  { %5249 = vrsqrt.f32 %v105_v24  ;;  %v102_v26 = vmul.f32 0.03125, %v94_v25 }
 0x12c   :  { %v106_v27 = vadd.f32 1e-12, %v102_v26 }
 0x12d   :  { %v72_v38 = vpop.xlane.xlu1 %71 }
 0x12e   :  { %5251 = vrsqrt.f32 %v106_v27  ;;  %v79_v39 = vmul.f32 0.03125, %v72_v38 }
 0x130   :  { %v83_v40 = vsub.f32 %v59_v18, %v79_v39  ;;  %v252_v18 = vmul.f32 10000.0, %v4647_v16 }
 0x131   :  { %v75_v43 = vpop.xlane.xlu1 %74 }
 0x132   :  { %v87_v41 = vmul.f32 %v83_v40, %v83_v40  ;;  %v80_v44 = vmul.f32 0.03125, %v75_v43 }
 0x134   :  { %v95_v42 = vsel %vm63_vm0, %v87_v41, 0.0  ;;  %v84_v45 = vsub.f32 %v60_v19, %v80_v44  ;;  %v5630_v19 = vsub.s32 0, %v5627_v17 }
 0x135   :  { %96 = vadd.xlane.f32.xlu1 %v95_v42 }
 0x136   :  { %v88_v46 = vmul.f32 %v84_v45, %v84_v45  ;;  %v5633_v20 = vrot.slane %v252_v18, %v5630_v19 }
 0x137   :  { %v5250_v28 = vpop.eup %5249 }
 0x138   :  { %v113_v30 = vmul.f32 %v5250_v28, %v81_v6  ;;  %v98_v47 = vsel %vm63_vm0, %v88_v46, 0.0 }
 0x139   :  { %99 = vadd.xlane.f32.xlu1 %v98_v47  ;;  %v602_v47 = vld [vmem:[%s6295_s21 + $0x1] sm:$0x1] }
 0x13a   :  { %v123_v32 = vmul.f32 %v4640_v29, %v113_v30 }
 0x13b   :  { %v5252_v33 = vpop.eup %5251 }
 0x13c   :  { %v5559_v34 = vadd.f32 %v4641_v31, %v123_v32  ;;  %v114_v35 = vmul.f32 %v5252_v33, %v82_v10 }
 0x13e   :  { %4934 = vmatprep.mubr.msk.f32.mxu0 %vm63_vm0, %v5559_v34  ;;  %v124_v36 = vmul.f32 %v4640_v29, %v114_v35 }
 0x140   :  { %v5563_v37 = vadd.f32 %v4641_v31, %v124_v36 }
 0x142   :  { %4935 = vmatmul.mubr.msk.f32.vlgmr.msra.gmra.mxu0 %vm63_vm0, %v5563_v37 }
 0x1be   :  { %v97_v54 = vpop.xlane.xlu1 %96 }
 0x1bf   :  { %v103_v55 = vmul.f32 0.03125, %v97_v54  ;;  %v951_v54 = vld [vmem:[%s6295_s21 + $0x2] sm:$0x1] }
 0x1c1   :  { %v107_v56 = vadd.f32 1e-12, %v103_v55 }
 0x1c2   :  { %v100_v57 = vpop.xlane.xlu1 %99 }
 0x1c3   :  { %5253 = vrsqrt.f32 %v107_v56  ;;  %v104_v59 = vmul.f32 0.03125, %v100_v57 }
 0x1c5   :  { %v108_v60 = vadd.f32 1e-12, %v104_v59 }
 0x1c7   :  { %5255 = vrsqrt.f32 %v108_v60  ;;  %v4661_v60 = vadd.f32 -1.0, %v951_v54 }
 0x1d0   :  { %v5254_v62 = vpop.eup %5253 }
 0x1d1   :  { %v115_v63 = vmul.f32 %v5254_v62, %v83_v40 }
 0x1d3   :  { %v125_v0 = vmul.f32 %v4640_v29, %v115_v63 }
 0x1d4   :  { %v5256_v1 = vpop.eup %5255 }
 0x1d5   :  { %v5592_v2 = vadd.f32 %v4641_v31, %v125_v0  ;;  %v116_v3 = vmul.f32 %v5256_v1, %v84_v45 }
 0x1d7   :  { %4937 = vmatprep.mubr.msk.f32.mxu0 %vm63_vm0, %v5592_v2  ;;  %v126_v4 = vmul.f32 %v4640_v29, %v116_v3 }
 0x1d9   :  { %v5598_v5 = vadd.f32 %v4641_v31, %v126_v4  ;;  %v953_v4 = vmul.f32 10000.0, %v4661_v60 }
 0x1db   :  { %4938 = vmatmul.mubr.msk.f32.gmra.mxu0 %vm63_vm0, %v5598_v5  ;;  %v1036_v15 = vrot.slane %v953_v4, %v5630_v19 }
 0x1dc   :  { %4957 = vmatprep.mubr.msk.f32.mxu0 %vm5424_vm2, %v5423_v48 }
 0x202   :  { %v4936_v50 = vpop.f32.mrf.mxu0 }
 0x203   :  { %v232_v51 = vadd.f32 %v4936_v50, %v4642_v49 }
 0x204   :  { %v226_v52 = vpop.f32.mrf.mxu0 }
 0x205   :  { %247 = vst.msk [vmem:[#allocation2 + $0x8] sm:$0xff] %vm245_vm1, %v232_v51  ;;  %v227_v53 = vadd.f32 %v4642_v49, %v226_v52 }
 0x207   :  { %246 = vst.msk [vmem:[#allocation2] sm:$0xff] %vm245_vm1, %v227_v53 }
 0x20c   :  { %v5586_v61 = vld [vmem:[#allocation2 + $0x8] sm:$0xff] }
 0x20e   :  { %v5578_v58 = vld [vmem:[#allocation2] sm:$0xff] }
 0x20f   :  { %255 = vrot.lane.b32.xlu0 %v5578_v58, %s5425_s0 }
 0x213   :  { %350 = vrot.lane.b32.xlu0 %v5578_v58, %s5426_s30 }
 0x217   :  { %429 = vrot.lane.b32.xlu0 %v5578_v58, %s5427_s18 }
 0x21b   :  { %607 = vrot.lane.b32.xlu0 %v5586_v61, %s5425_s0 }
 0x21f   :  { %781 = vrot.lane.b32.xlu0 %v5586_v61, %s5428_s19 }
 0x223   :  { %779 = vrot.lane.b32.xlu0 %v5586_v61, %s5427_s18 }
 0x281   :  { %v256_v6 = vpop.permute.xlu0 %255 }
 0x282   :  { %4941 = vmatpush3.xpose.msk.msra.mxu1 %vm257_vm3, %v256_v6 }
 0x283   :  { %4945 = vmatprep.subr.mxu1 %v5423_v48 }
 0x285   :  { %4943 = vmatmul.mubr.msk.f32.vlgmr.msra.gmra.mxu1 %vm257_vm3, %v5578_v58  ;;  %v351_v7 = vpop.permute.xlu0 %350 }
 0x286   :  { %4946 = vmatpush3.msra.mxu1 %v351_v7  ;;  %4947 = vmatprep.mubr.msk.f32.mxu1 %vm5424_vm2, %v5423_v48  ;;  %v1300_v7 = vld [vmem:[%s6295_s21 + $0x3] sm:$0x1] }
 0x287   :  { %4950 = vmatprep.subr.mxu1 %v5423_v48  ;;  %v4668_v16 = vadd.f32 -1.0, %v1300_v7 }
 0x289   :  { %v430_v32 = vpop.permute.xlu0 %429 }
 0x28d   :  { %v608_v35 = vpop.permute.xlu0 %607 }
 0x291   :  { %v782_v39 = vpop.permute.xlu0 %781 }
 0x295   :  { %v780_v40 = vpop.permute.xlu0 %779 }
 0x29b   :  { %v4939_v8 = vpop.f32.mrf.mxu0 }
 0x29c   :  { %v242_v9 = vadd.f32 %v4939_v8, %v4642_v49 }
 0x29d   :  { %v236_v10 = vpop.f32.mrf.mxu0 }
 0x29e   :  { %249 = vst.msk [vmem:[#allocation2 + $0x18] sm:$0xff] %vm245_vm1, %v242_v9  ;;  %v237_v11 = vadd.f32 %v4642_v49, %v236_v10  ;;  %v4654_v49 = vadd.f32 -1.0, %v602_v47 }
 0x2a0   :  { %248 = vst.msk [vmem:[#allocation2 + $0x10] sm:$0xff] %vm245_vm1, %v237_v11  ;;  %v604_v52 = vmul.f32 10000.0, %v4654_v49 }
 0x2a2   :  { %v687_v59 = vrot.slane %v604_v52, %v5630_v19 }
 0x2a5   :  { %v5617_v13 = vld [vmem:[#allocation2 + $0x18] sm:$0xff] }
 0x2a7   :  { %v5613_v12 = vld [vmem:[#allocation2 + $0x10] sm:$0xff] }
 0x2a8   :  { %1130 = vrot.lane.b32.xlu0 %v5613_v12, %s5428_s19 }
 0x2ac   :  { %1305 = vrot.lane.b32.xlu0 %v5617_v13, %s5425_s0 }
 0x2b0   :  { %1477 = vrot.lane.b32.xlu0 %v5617_v13, %s5427_s18 }
 0x31a   :  { %v1131_v42 = vpop.permute.xlu0 %1130 }
 0x31e   :  { %v1306_v44 = vpop.permute.xlu0 %1305 }
 0x322   :  { %v1478_v46 = vpop.permute.xlu0 %1477 }
 0x345   :  { %v328_v21 = vpop.f32.mrf.mxu1 }
 0x346   :  { %v332_v22 = vmul.f32 0.25, %v328_v21 }
 0x347   :  { %v4944_v23 = vpop.f32.mrf.mxu1 }
 0x348   :  { %v337_v24 = vadd.f32 %v5633_v20, %v332_v22 }
 0x34a   :  { %v339_v25 = vsel %vm338_vm4, %v337_v24, -inf }
 0x34b   :  { %340 = vmax.xlane.f32.xlu1 %v339_v25 }
 0x3d4   :  { %v341_v26 = vpop.xlane.xlu1 %340 }
 0x3d5   :  { %v342_v27 = vsub.f32 %v337_v24, %v341_v26  ;;  %v1302_v24 = vmul.f32 10000.0, %v4668_v16 }
 0x3d7   :  { %v343_v28 = vmul.f32 1.442695, %v342_v27 }
 0x3d9   :  { %5257 = vpow2.f32 %v343_v28 }
 0x3e6   :  { %v5258_v29 = vpop.eup %5257 }
 0x3e7   :  { %v345_v30 = vsel %vm338_vm4, %v5258_v29, 0.0 }
 0x3e8   :  { %346 = vadd.xlane.f32.xlu1 %v345_v30  ;;  %v1385_v30 = vrot.slane %v1302_v24, %v5630_v19 }
 0x3f9   :  { %431 = vrot.lane.b32.xlu1 %v5578_v58, %s5428_s19 }
 0x3fd   :  { %956 = vrot.lane.b32.xlu1 %v5613_v12, %s5425_s0 }
 0x401   :  { %1128 = vrot.lane.b32.xlu1 %v5613_v12, %s5427_s18 }
 0x405   :  { %1479 = vrot.lane.b32.xlu1 %v5617_v13, %s5428_s19 }
 0x471   :  { %v347_v31 = vpop.xlane.xlu1 %346 }
 0x472   :  { %5259 = vrcp.f32 %v347_v31 }
 0x475   :  { %v432_v38 = vpop.permute.xlu1 %431 }
 0x479   :  { %v957_v41 = vpop.permute.xlu1 %956 }
 0x47d   :  { %v1129_v43 = vpop.permute.xlu1 %1128 }
 0x47f   :  { %v5260_v33 = vpop.eup %5259 }
 0x480   :  { %v349_v36 = vmul.f32 %v5260_v33, %v5258_v29 }
 0x481   :  { %v1480_v45 = vpop.permute.xlu1 %1479 }
 0x482   :  { %4948 = vmatmul.mubr.msk.f32.vlgmr.msra.gmra.mxu1 %vm338_vm4, %v349_v36 }
 0x483   :  { %4951 = vmatpush3.xpose.msk.msra.mxu1 %vm257_vm3, %v432_v38  ;;  %4952 = vmatprep.mubr.msk.f32.mxu1 %vm5424_vm2, %v5423_v48 }
 0x484   :  { %4960 = vmatprep.subr.mxu1 %v5423_v48 }
 0x486   :  { %4953 = vmatmul.mubr.msk.f32.vlgmr.msra.gmra.mxu1 %vm257_vm3, %v430_v32 }
 0x487   :  { %4961 = vmatpush3.xpose.msk.msra.mxu1 %vm257_vm3, %v608_v35  ;;  %4962 = vmatprep.mubr.msk.f32.mxu1 %vm5424_vm2, %v5423_v48 }
 0x488   :  { %4970 = vmatprep.subr.mxu1 %v5423_v48 }
 0x48a   :  { %4963 = vmatmul.mubr.msk.f32.vlgmr.msra.gmra.mxu1 %vm257_vm3, %v5586_v61 }
 0x48b   :  { %4971 = vmatpush3.xpose.msk.msra.mxu1 %vm257_vm3, %v782_v39  ;;  %4972 = vmatprep.mubr.msk.f32.mxu1 %vm5424_vm2, %v5423_v48 }
 0x48c   :  { %4980 = vmatprep.subr.mxu1 %v5423_v48 }
 0x48e   :  { %4973 = vmatmul.mubr.msk.f32.vlgmr.msra.gmra.mxu1 %vm257_vm3, %v780_v40 }
 0x48f   :  { %4981 = vmatpush3.xpose.msk.msra.mxu1 %vm257_vm3, %v957_v41  ;;  %4982 = vmatprep.mubr.msk.f32.mxu1 %vm5424_vm2, %v5423_v48 }
 0x490   :  { %4990 = vmatprep.subr.mxu1 %v5423_v48 }
 0x492   :  { %4983 = vmatmul.mubr.msk.f32.vlgmr.msra.gmra.mxu1 %vm257_vm3, %v5613_v12 }
 0x493   :  { %4991 = vmatpush3.xpose.msk.msra.mxu1 %vm257_vm3, %v1131_v42  ;;  %4992 = vmatprep.mubr.msk.f32.mxu1 %vm5424_vm2, %v5423_v48 }
 0x494   :  { %5000 = vmatprep.subr.mxu1 %v5423_v48 }
 0x496   :  { %4993 = vmatmul.mubr.msk.f32.vlgmr.msra.gmra.mxu1 %vm257_vm3, %v1129_v43 }
 0x497   :  { %5001 = vmatpush3.xpose.msk.msra.mxu1 %vm257_vm3, %v1306_v44  ;;  %5002 = vmatprep.mubr.msk.f32.mxu1 %vm5424_vm2, %v5423_v48 }
 0x498   :  { %5010 = vmatprep.subr.mxu1 %v5423_v48 }
 0x49a   :  { %5003 = vmatmul.mubr.msk.f32.vlgmr.msra.gmra.mxu1 %vm257_vm3, %v5617_v13 }
 0x49b   :  { %5011 = vmatpush3.xpose.msk.msra.mxu1 %vm257_vm3, %v1480_v45  ;;  %5012 = vmatprep.mubr.msk.f32.mxu1 %vm5424_vm2, %v5423_v48 }
 0x49e   :  { %5013 = vmatmul.mubr.msk.f32.vlgmr.msra.gmra.mxu1 %vm257_vm3, %v1478_v46 }
 0x542   :  { %v422_v50 = vpop.f32.mrf.mxu1 }
 0x543   :  { %426 = vst.msk [vmem:[#allocation3] sm:$0xff] %vm257_vm3, %v422_v50 }
 0x544   :  { %v4949_v51 = vpop.f32.mrf.mxu1 }
 0x546   :  { %v503_v53 = vpop.f32.mrf.mxu1 }
 0x547   :  { %v507_v55 = vmul.f32 0.25, %v503_v53 }
 0x548   :  { %v4954_v56 = vpop.f32.mrf.mxu1 }
 0x549   :  { %v508_v57 = vadd.f32 %v507_v55, %v5633_v20 }
 0x54a   :  { %v679_v62 = vpop.f32.mrf.mxu1 }
 0x54b   :  { %v683_v63 = vmul.f32 0.25, %v679_v62  ;;  %v509_v0 = vsel %vm338_vm4, %v508_v57, -inf }
 0x54c   :  { %510 = vmax.xlane.f32.xlu1 %v509_v0  ;;  %v4964_v1 = vpop.f32.mrf.mxu1 }
 0x54d   :  { %v688_v3 = vadd.f32 %v687_v59, %v683_v63 }
 0x54e   :  { %v853_v6 = vpop.f32.mrf.mxu1 }
 0x54f   :  { %v857_v8 = vmul.f32 0.25, %v853_v6  ;;  %v689_v9 = vsel %vm338_vm4, %v688_v3, -inf }
 0x550   :  { %690 = vmax.xlane.f32.xlu0 %v689_v9  ;;  %v4974_v10 = vpop.f32.mrf.mxu1 }
 0x551   :  { %v858_v11 = vadd.f32 %v857_v8, %v687_v59 }
 0x552   :  { %v1028_v18 = vpop.f32.mrf.mxu1 }
 0x553   :  { %v1032_v20 = vmul.f32 0.25, %v1028_v18  ;;  %v859_v21 = vsel %vm338_vm4, %v858_v11, -inf }
 0x554   :  { %860 = vmax.xlane.f32.xlu0 %v859_v21  ;;  %v4984_v22 = vpop.f32.mrf.mxu1 }
 0x555   :  { %v1037_v23 = vadd.f32 %v1036_v15, %v1032_v20 }
 0x556   :  { %v1202_v25 = vpop.f32.mrf.mxu1 }
 0x557   :  { %v1206_v26 = vmul.f32 0.25, %v1202_v25  ;;  %v1038_v27 = vsel %vm338_vm4, %v1037_v23, -inf }
 0x558   :  { %1039 = vmax.xlane.f32.xlu0 %v1038_v27  ;;  %v4994_v28 = vpop.f32.mrf.mxu1 }
 0x559   :  { %v1207_v29 = vadd.f32 %v1206_v26, %v1036_v15 }
 0x55a   :  { %v1377_v31 = vpop.f32.mrf.mxu1 }
 0x55b   :  { %v1381_v32 = vmul.f32 0.25, %v1377_v31  ;;  %v1208_v33 = vsel %vm338_vm4, %v1207_v29, -inf }
 0x55c   :  { %1209 = vmax.xlane.f32.xlu1 %v1208_v33  ;;  %v5004_v35 = vpop.f32.mrf.mxu1 }
 0x55d   :  { %v1386_v36 = vadd.f32 %v1385_v30, %v1381_v32 }
 0x55e   :  { %v1551_v38 = vpop.f32.mrf.mxu1 }
 0x55f   :  { %v1387_v39 = vsel %vm338_vm4, %v1386_v36, -inf  ;;  %v1555_v41 = vmul.f32 0.25, %v1551_v38 }
 0x560   :  { %1388 = vmax.xlane.f32.xlu0 %v1387_v39  ;;  %v5014_v40 = vpop.f32.mrf.mxu1 }
 0x561   :  { %v1556_v42 = vadd.f32 %v1555_v41, %v1385_v30 }
 0x563   :  { %v1557_v43 = vsel %vm338_vm4, %v1556_v42, -inf }
 0x56d   :  { %520 = vrot.lane.b32.xlu1 %v5578_v58, %s5429_s26 }
 0x591   :  { %1558 = vmax.xlane.f32.xlu1 %v1557_v43 }
 0x5a2   :  { %870 = vrot.lane.b32.xlu1 %v5586_v61, %s5429_s26 }
 0x5a6   :  { %1049 = vrot.lane.b32.xlu1 %v5613_v12, %s5426_s30 }
 0x5d5   :  { %v511_v44 = vpop.xlane.xlu1 %510 }
 0x5d6   :  { %v512_v45 = vsub.f32 %v508_v57, %v511_v44 }
 0x5d8   :  { %v513_v46 = vmul.f32 1.442695, %v512_v45 }
 0x5d9   :  { %v691_v47 = vpop.xlane.xlu0 %690 }
 0x5da   :  { %5261 = vpow2.f32 %v513_v46  ;;  %v692_v49 = vsub.f32 %v688_v3, %v691_v47 }
 0x5dc   :  { %v693_v50 = vmul.f32 1.442695, %v692_v49 }
 0x5dd   :  { %v861_v56 = vpop.xlane.xlu0 %860 }
 0x5de   :  { %5263 = vpow2.f32 %v693_v50  ;;  %v862_v57 = vsub.f32 %v858_v11, %v861_v56  ;;  %v1655_v56 = vld [vmem:[%s6278_s6 + $0x10] sm:$0xff] }
 0x5e0   :  { %v863_v62 = vmul.f32 1.442695, %v862_v57  ;;  %v1654_v57 = vld [vmem:[%s6278_s6 + $0x8] sm:$0xff] }
 0x5e1   :  { %v1040_v59 = vpop.xlane.xlu0 %1039 }
 0x5e2   :  { %v1041_v60 = vsub.f32 %v1037_v23, %v1040_v59  ;;  %5265 = vpow2.f32 %v863_v62  ;;  %v1653_v59 = vld [vmem:[%s6278_s6] sm:$0xff] }
 0x5e4   :  { %v1042_v1 = vmul.f32 1.442695, %v1041_v60 }
 0x5e5   :  { %v1210_v58 = vpop.xlane.xlu1 %1209 }
 0x5e6   :  { %v1211_v63 = vsub.f32 %v1207_v29, %v1210_v58  ;;  %5267 = vpow2.f32 %v1042_v1 }
 0x5e7   :  { %v5262_v51 = vpop.eup %5261 }
 0x5e8   :  { %v515_v52 = vsel %vm338_vm4, %v5262_v51, 0.0  ;;  %v1212_v3 = vmul.f32 1.442695, %v1211_v63 }
 0x5e9   :  { %516 = vadd.xlane.f32.xlu0 %v515_v52  ;;  %v521_v53 = vpop.permute.xlu1 %520  ;;  %v1389_v0 = vpop.xlane.xlu0 %1388 }
 0x5ea   :  { %4956 = vmatpush3.msra.mxu0 %v521_v53  ;;  %v1390_v4 = vsub.f32 %v1386_v36, %v1389_v0  ;;  %5269 = vpow2.f32 %v1212_v3 }
 0x5eb   :  { %v5264_v54 = vpop.eup %5263  ;;  %4965 = vmatprep.subr.mxu0 %v5423_v48 }
 0x5ec   :  { %v695_v55 = vsel %vm338_vm4, %v5264_v54, 0.0  ;;  %v1391_v6 = vmul.f32 1.442695, %v1390_v4 }
 0x5ed   :  { %696 = vadd.xlane.f32.xlu1 %v695_v55  ;;  %v1656_v55 = vld [vmem:[%s6278_s6 + $0x18] sm:$0xff] }
 0x5ee   :  { %5271 = vpow2.f32 %v1391_v6  ;;  %5020 = vmatprep.subr.mxu1 %v1656_v55 }
 0x5ef   :  { %v5266_v7 = vpop.eup %5265  ;;  %5021 = vmatpush3.msra.mxu1 %v1656_v55  ;;  %v1841_v55 = vld [vmem:[%s6282_s10 + $0x10] sm:$0xff] }
 0x5f0   :  { %5022 = vmatprep.subr.mxu1 %v1655_v56 }
 0x5f1   :  { %5023 = vmatpush3.msra.mxu1 %v1655_v56  ;;  %v1840_v56 = vld [vmem:[%s6282_s10 + $0x8] sm:$0xff] }
 0x5f2   :  { %5024 = vmatprep.subr.mxu1 %v1654_v57 }
 0x5f3   :  { %v5268_v9 = vpop.eup %5267  ;;  %5025 = vmatpush3.msra.mxu1 %v1654_v57  ;;  %v1839_v57 = vld [vmem:[%s6282_s10] sm:$0xff] }
 0x5f4   :  { %v1044_v15 = vsel %vm338_vm4, %v5268_v9, 0.0  ;;  %5026 = vmatprep.subr.mxu1 %v1653_v59 }
 0x5f5   :  { %5027 = vmatpush3.msra.mxu1 %v1653_v59 }
 0x5f7   :  { %v5270_v11 = vpop.eup %5269 }
 0x5f8   :  { %v1214_v16 = vsel %vm338_vm4, %v5270_v11, 0.0 }
 0x5fb   :  { %v5272_v18 = vpop.eup %5271 }
 0x5fc   :  { %v1393_v20 = vsel %vm338_vm4, %v5272_v18, 0.0 }
 0x5fe   :  { %1219 = vrot.lane.b32.xlu1 %v5613_v12, %s5429_s26 }
 0x5ff   :  { %700 = vrot.lane.b32.xlu0 %v5586_v61, %s5426_s30  ;;  %v865_v61 = vsel %vm338_vm4, %v5266_v7, 0.0 }
 0x61a   :  { %v1559_v12 = vpop.xlane.xlu1 %1558 }
 0x61b   :  { %v1560_v8 = vsub.f32 %v1556_v42, %v1559_v12 }
 0x61d   :  { %v1561_v10 = vmul.f32 1.442695, %v1560_v8 }
 0x61e   :  { %866 = vadd.xlane.f32.xlu0 %v865_v61  ;;  %v871_v23 = vpop.permute.xlu1 %870 }
 0x61f   :  { %5273 = vpow2.f32 %v1561_v10 }
 0x622   :  { %1045 = vadd.xlane.f32.xlu1 %v1044_v15  ;;  %1215 = vadd.xlane.f32.xlu0 %v1214_v16  ;;  %v1050_v24 = vpop.permute.xlu1 %1049 }
 0x626   :  { %1394 = vadd.xlane.f32.xlu1 %v1393_v20  ;;  %v4675_v20 = vld [vmem:[%s6279_s7] ss:$0 sm:$0xff] }
 0x62c   :  { %v5274_v21 = vpop.eup %5273 }
 0x62d   :  { %v1563_v22 = vsel %vm338_vm4, %v5274_v21, 0.0 }
 0x62e   :  { %1564 = vadd.xlane.f32.xlu0 %v1563_v22 }
 0x637   :  { %1568 = vrot.lane.b32.xlu1 %v5617_v13, %s5429_s26 }
 0x644   :  { %1398 = vrot.lane.b32.xlu0 %v5617_v13, %s5426_s30 }
 0x672   :  { %v517_v25 = vpop.xlane.xlu0 %516 }
 0x673   :  { %5275 = vrcp.f32 %v517_v25 }
 0x676   :  { %v697_v26 = vpop.xlane.xlu1 %696  ;;  %v701_v29 = vpop.permute.xlu0 %700 }
 0x677   :  { %5277 = vrcp.f32 %v697_v26 }
 0x67a   :  { %v1220_v13 = vpop.permute.xlu1 %1219 }
 0x680   :  { %v5276_v27 = vpop.eup %5275 }
 0x681   :  { %v519_v28 = vmul.f32 %v5276_v27, %v5262_v51 }
 0x683   :  { %4958 = vmatmul.mubr.msk.f32.vlgmr.msra.gmra.mxu0 %vm338_vm4, %v519_v28 }
 0x684   :  { %v5278_v30 = vpop.eup %5277  ;;  %4966 = vmatpush3.msra.mxu0 %v701_v29  ;;  %4967 = vmatprep.mubr.msk.f32.mxu0 %vm5424_vm2, %v5423_v48 }
 0x685   :  { %4975 = vmatprep.subr.mxu0 %v5423_v48  ;;  %v699_v31 = vmul.f32 %v5278_v30, %v5264_v54 }
 0x687   :  { %4968 = vmatmul.mubr.msk.f32.vlgmr.msra.gmra.mxu0 %vm338_vm4, %v699_v31 }
 0x688   :  { %4976 = vmatpush3.msra.mxu0 %v871_v23  ;;  %4977 = vmatprep.mubr.msk.f32.mxu0 %vm5424_vm2, %v5423_v48 }
 0x689   :  { %4985 = vmatprep.subr.mxu0 %v5423_v48 }
 0x6a7   :  { %v867_v32 = vpop.xlane.xlu0 %866 }
 0x6a8   :  { %5279 = vrcp.f32 %v867_v32 }
 0x6ab   :  { %v1046_v33 = vpop.xlane.xlu1 %1045  ;;  %v1216_v35 = vpop.xlane.xlu0 %1215 }
 0x6ac   :  { %5281 = vrcp.f32 %v1046_v33 }
 0x6ad   :  { %5283 = vrcp.f32 %v1216_v35 }
 0x6af   :  { %v1395_v36 = vpop.xlane.xlu1 %1394 }
 0x6b0   :  { %5285 = vrcp.f32 %v1395_v36 }
 0x6b3   :  { %v1569_v50 = vpop.permute.xlu1 %1568 }
 0x6b5   :  { %v5280_v38 = vpop.eup %5279 }
 0x6b6   :  { %v869_v39 = vmul.f32 %v5280_v38, %v5266_v7 }
 0x6b7   :  { %v1565_v40 = vpop.xlane.xlu0 %1564 }
 0x6b8   :  { %5287 = vrcp.f32 %v1565_v40  ;;  %4978 = vmatmul.mubr.msk.f32.vlgmr.msra.gmra.mxu0 %vm338_vm4, %v869_v39 }
 0x6b9   :  { %4986 = vmatpush3.msra.mxu0 %v1050_v24  ;;  %4987 = vmatprep.mubr.msk.f32.mxu0 %vm5424_vm2, %v5423_v48  ;;  %v5282_v41 = vpop.eup %5281 }
 0x6ba   :  { %4995 = vmatprep.subr.mxu0 %v5423_v48  ;;  %v1048_v42 = vmul.f32 %v5282_v41, %v5268_v9  ;;  %v5284_v43 = vpop.eup %5283 }
 0x6bb   :  { %v1218_v44 = vmul.f32 %v5284_v43, %v5270_v11  ;;  %v1399_v46 = vpop.permute.xlu0 %1398 }
 0x6bc   :  { %4988 = vmatmul.mubr.msk.f32.vlgmr.msra.gmra.mxu0 %vm338_vm4, %v1048_v42 }
 0x6bd   :  { %4996 = vmatpush3.msra.mxu0 %v1220_v13  ;;  %4997 = vmatprep.mubr.msk.f32.mxu0 %vm5424_vm2, %v5423_v48  ;;  %v5286_v45 = vpop.eup %5285 }
 0x6be   :  { %5005 = vmatprep.subr.mxu0 %v5423_v48  ;;  %v1397_v47 = vmul.f32 %v5286_v45, %v5272_v18 }
 0x6c0   :  { %4998 = vmatmul.mubr.msk.f32.vlgmr.msra.gmra.mxu0 %vm338_vm4, %v1218_v44 }
 0x6c1   :  { %5006 = vmatpush3.msra.mxu0 %v1399_v46  ;;  %5007 = vmatprep.mubr.msk.f32.mxu0 %vm5424_vm2, %v5423_v48 }
 0x6c2   :  { %5015 = vmatprep.subr.mxu0 %v5423_v48 }
 0x6c4   :  { %5008 = vmatmul.mubr.msk.f32.vlgmr.msra.gmra.mxu0 %vm338_vm4, %v1397_v47 }
 0x6c5   :  { %v5288_v49 = vpop.eup %5287  ;;  %5016 = vmatpush3.msra.mxu0 %v1569_v50  ;;  %5017 = vmatprep.mubr.msk.f32.mxu0 %vm5424_vm2, %v5423_v48 }
 0x6c6   :  { %v1567_v58 = vmul.f32 %v5288_v49, %v5274_v21 }
 0x6c8   :  { %5018 = vmatmul.mubr.msk.f32.vlgmr.msra.gmra.mxu0 %vm338_vm4, %v1567_v58 }
 0x743   :  { %v592_v51 = vpop.f32.mrf.mxu0 }
 0x744   :  { %597 = vrot.lane.b32.xlu0 %v592_v51, %s5430_s29 }
 0x745   :  { %v4959_v52 = vpop.f32.mrf.mxu0 }
 0x747   :  { %v772_v53 = vpop.f32.mrf.mxu0 }
 0x748   :  { %776 = vst.msk [vmem:[#allocation3 + $0x8] sm:$0xff] %vm257_vm3, %v772_v53 }
 0x749   :  { %v4969_v54 = vpop.f32.mrf.mxu0 }
 0x74a   :  { %v1842_v54 = vld [vmem:[%s6282_s10 + $0x18] sm:$0xff] }
 0x74b   :  { %5034 = vmatprep.subr.mxu0 %v1842_v54 }
 0x74c   :  { %5035 = vmatpush3.msra.mxu0 %v1842_v54 }
 0x74d   :  { %5036 = vmatprep.subr.mxu0 %v1841_v55 }
 0x74e   :  { %5037 = vmatpush3.msra.mxu0 %v1841_v55 }
 0x74f   :  { %5038 = vmatprep.subr.mxu0 %v1840_v56 }
 0x750   :  { %5039 = vmatpush3.msra.mxu0 %v1840_v56 }
 0x751   :  { %5040 = vmatprep.subr.mxu0 %v1839_v57 }
 0x752   :  { %5041 = vmatpush3.msra.mxu0 %v1839_v57 }
 0x778   :  { %v942_v60 = vpop.f32.mrf.mxu0 }
 0x779   :  { %947 = vrot.lane.b32.xlu1 %v942_v60, %s5430_s29 }
 0x77a   :  { %v4979_v62 = vpop.f32.mrf.mxu0 }
 0x77c   :  { %v1121_v63 = vpop.f32.mrf.mxu0 }
 0x77d   :  { %1125 = vst.msk [vmem:[#allocation3 + $0x10] sm:$0xff] %vm257_vm3, %v1121_v63 }
 0x77e   :  { %v4989_v0 = vpop.f32.mrf.mxu0 }
 0x780   :  { %v1291_v1 = vpop.f32.mrf.mxu0 }
 0x781   :  { %1296 = vrot.lane.b32.xlu0 %v1291_v1, %s5430_s29 }
 0x782   :  { %v4999_v3 = vpop.f32.mrf.mxu0 }
 0x784   :  { %v1470_v4 = vpop.f32.mrf.mxu0 }
 0x785   :  { %1474 = vst.msk [vmem:[#allocation3 + $0x18] sm:$0xff] %vm257_vm3, %v1470_v4 }
 0x786   :  { %v5009_v6 = vpop.f32.mrf.mxu0 }
 0x788   :  { %v1640_v7 = vpop.f32.mrf.mxu0 }
 0x789   :  { %1645 = vrot.lane.b32.xlu1 %v1640_v7, %s5430_s29  ;;  %v4680_v7 = vld [vmem:[%s6280_s8] ss:$0 sm:$0xff] }
 0x78a   :  { %v5019_v12 = vpop.f32.mrf.mxu0 }
 0x7b6   :  { %v598_v8 = vpop.permute.xlu0 %597 }
 0x7b7   :  { %601 = vst.msk [vmem:[#allocation3] sm:$0xff] %vm600_vm5, %v598_v8 }
 0x7be   :  { %v1649_v9 = vld [vmem:[#allocation3] sm:$0xff] }
 0x7bf   :  { %5028 = vmatprep.mubr.msk.f32.mxu1 %vm63_vm0, %v1649_v9 }
 0x7eb   :  { %v948_v10 = vpop.permute.xlu1 %947 }
 0x7ec   :  { %950 = vst.msk [vmem:[#allocation3 + $0x8] sm:$0xff] %vm600_vm5, %v948_v10 }
 0x7f3   :  { %v1650_v61 = vld [vmem:[#allocation3 + $0x8] sm:$0xff]  ;;  %v1297_v11 = vpop.permute.xlu0 %1296 }
 0x7f4   :  { %5029 = vmatmul.mubr.msk.f32.vlgmr.msra.gmra.mxu1 %vm63_vm0, %v1650_v61  ;;  %1299 = vst.msk [vmem:[#allocation3 + $0x10] sm:$0xff] %vm600_vm5, %v1297_v11 }
 0x7fb   :  { %v1646_v15 = vpop.permute.xlu1 %1645  ;;  %v1651_v16 = vld [vmem:[#allocation3 + $0x10] sm:$0xff] }
 0x7fc   :  { %1648 = vst.msk [vmem:[#allocation3 + $0x18] sm:$0xff] %vm600_vm5, %v1646_v15  ;;  %5031 = vmatprep.mubr.msk.f32.mxu1 %vm63_vm0, %v1651_v16  ;;  %v4681_v15 = vld [vmem:[%s6281_s9] ss:$0 sm:$0xff] }
 0x803   :  { %v1652_v18 = vld [vmem:[#allocation3 + $0x18] sm:$0xff] }
 0x804   :  { %5032 = vmatmul.mubr.msk.f32.gmra.mxu1 %vm63_vm0, %v1652_v18 }
 0x8b4   :  { %v5030_v21 = vpop.f32.mrf.mxu1 }
 0x8b5   :  { %v1748_v22 = vadd.f32 %v5030_v21, %v4675_v20 }
 0x8b6   :  { %v1742_v23 = vpop.f32.mrf.mxu1 }
 0x8b7   :  { %v1743_v24 = vadd.f32 %v4675_v20, %v1742_v23  ;;  %v1762_v25 = vadd.f32 %v1748_v22, %v5563_v37 }
 0x8b9   :  { %v1770_v26 = vsel %vm63_vm0, %v1762_v25, 0.0  ;;  %v1761_v27 = vadd.f32 %v1743_v24, %v5559_v34 }
 0x8ba   :  { %1771 = vadd.xlane.f32.xlu1 %v1770_v26 }
 0x8bb   :  { %v1767_v28 = vsel %vm63_vm0, %v1761_v27, 0.0 }
 0x8bc   :  { %1768 = vadd.xlane.f32.xlu0 %v1767_v28 }
 0x8c4   :  { %v5033_v29 = vpop.f32.mrf.mxu1 }
 0x8c5   :  { %v1758_v31 = vadd.f32 %v5033_v29, %v4675_v20 }
 0x8c6   :  { %v1752_v30 = vpop.f32.mrf.mxu1 }
 0x8c7   :  { %v1753_v13 = vadd.f32 %v4675_v20, %v1752_v30  ;;  %v1764_v35 = vadd.f32 %v1758_v31, %v5598_v5  ;;  %v1974_v31 = vld [vmem:[%s6284_s12 + $0x38] sm:$0xff] }
 0x8c8   :  { %5048 = vmatprep.subr.mxu1 %v1974_v31 }
 0x8c9   :  { %v1763_v32 = vadd.f32 %v1753_v13, %v5592_v2  ;;  %v1776_v37 = vsel %vm63_vm0, %v1764_v35, 0.0  ;;  %5049 = vmatpush3.msra.mxu1 %v1974_v31  ;;  %v1973_v13 = vld [vmem:[%s6284_s12 + $0x30] sm:$0xff] }
 0x8ca   :  { %5050 = vmatprep.subr.mxu1 %v1973_v13 }
 0x8cb   :  { %v1773_v33 = vsel %vm63_vm0, %v1763_v32, 0.0  ;;  %5051 = vmatpush3.msra.mxu1 %v1973_v13 }
 0x8cc   :  { %1774 = vadd.xlane.f32.xlu0 %v1773_v33  ;;  %v1971_v33 = vld [vmem:[%s6284_s12 + $0x20] sm:$0xff] }
 0x8d0   :  { %1777 = vadd.xlane.f32.xlu0 %v1776_v37  ;;  %v1969_v37 = vld [vmem:[%s6284_s12 + $0x10] sm:$0xff] }
 0x943   :  { %v1772_v36 = vpop.xlane.xlu1 %1771 }
 0x944   :  { %v1780_v34 = vmul.f32 0.03125, %v1772_v36  ;;  %v1968_v36 = vld [vmem:[%s6284_s12 + $0x8] sm:$0xff] }
 0x945   :  { %v1769_v38 = vpop.xlane.xlu0 %1768 }
 0x946   :  { %v1784_v39 = vsub.f32 %v1762_v25, %v1780_v34  ;;  %v1779_v40 = vmul.f32 0.03125, %v1769_v38  ;;  %v1967_v34 = vld [vmem:[%s6284_s12] sm:$0xff] }
 0x947   :  { %v4682_v38 = vld [vmem:[%s6283_s11] ss:$0 sm:$0xff] }
 0x948   :  { %v1783_v41 = vsub.f32 %v1761_v27, %v1779_v40  ;;  %v1788_v42 = vmul.f32 %v1784_v39, %v1784_v39 }
 0x94a   :  { %v1794_v43 = vsel %vm63_vm0, %v1788_v42, 0.0  ;;  %v1787_v44 = vmul.f32 %v1783_v41, %v1783_v41 }
 0x94b   :  { %1795 = vadd.xlane.f32.xlu1 %v1794_v43 }
 0x94c   :  { %v1791_v2 = vsel %vm63_vm0, %v1787_v44, 0.0 }
 0x94d   :  { %1792 = vadd.xlane.f32.xlu0 %v1791_v2 }
 0x955   :  { %v1775_v45 = vpop.xlane.xlu0 %1774 }
 0x956   :  { %v1781_v5 = vmul.f32 0.03125, %v1775_v45 }
 0x958   :  { %v1785_v46 = vsub.f32 %v1763_v32, %v1781_v5  ;;  %v1972_v32 = vld [vmem:[%s6284_s12 + $0x28] sm:$0xff] }
 0x959   :  { %v1778_v47 = vpop.xlane.xlu0 %1777  ;;  %5052 = vmatprep.subr.mxu1 %v1972_v32 }
 0x95a   :  { %v1782_v49 = vmul.f32 0.03125, %v1778_v47  ;;  %v1789_v50 = vmul.f32 %v1785_v46, %v1785_v46  ;;  %5053 = vmatpush3.msra.mxu1 %v1972_v32 }
 0x95b   :  { %5054 = vmatprep.subr.mxu1 %v1971_v33 }
 0x95c   :  { %v1786_v58 = vsub.f32 %v1764_v35, %v1782_v49  ;;  %v1797_v51 = vsel %vm63_vm0, %v1789_v50, 0.0  ;;  %5055 = vmatpush3.msra.mxu1 %v1971_v33  ;;  %v1970_v35 = vld [vmem:[%s6284_s12 + $0x18] sm:$0xff] }
 0x95d   :  { %1798 = vadd.xlane.f32.xlu0 %v1797_v51  ;;  %5056 = vmatprep.subr.mxu1 %v1970_v35 }
 0x95e   :  { %v1790_v52 = vmul.f32 %v1786_v58, %v1786_v58  ;;  %5057 = vmatpush3.msra.mxu1 %v1970_v35 }
 0x95f   :  { %5058 = vmatprep.subr.mxu1 %v1969_v37 }
 0x960   :  { %v1800_v53 = vsel %vm63_vm0, %v1790_v52, 0.0  ;;  %5059 = vmatpush3.msra.mxu1 %v1969_v37 }
 0x961   :  { %1801 = vadd.xlane.f32.xlu1 %v1800_v53  ;;  %5060 = vmatprep.subr.mxu1 %v1968_v36 }
 0x962   :  { %5061 = vmatpush3.msra.mxu1 %v1968_v36 }
 0x963   :  { %5062 = vmatprep.subr.mxu1 %v1967_v34 }
 0x964   :  { %5063 = vmatpush3.msra.mxu1 %v1967_v34 }
 0x965   :  { %5094 = vmatprep.subr.mxu1 %v5423_v48 }
 0x9d4   :  { %v1796_v59 = vpop.xlane.xlu1 %1795 }
 0x9d5   :  { %v1804_v60 = vmul.f32 0.03125, %v1796_v59 }
 0x9d6   :  { %v1793_v62 = vpop.xlane.xlu0 %1792 }
 0x9d7   :  { %v1808_v63 = vadd.f32 1e-12, %v1804_v60  ;;  %v1803_v0 = vmul.f32 0.03125, %v1793_v62 }
 0x9d9   :  { %5289 = vrsqrt.f32 %v1808_v63  ;;  %v1807_v1 = vadd.f32 1e-12, %v1803_v0 }
 0x9db   :  { %5291 = vrsqrt.f32 %v1807_v1 }
 0x9e6   :  { %v5290_v3 = vpop.eup %5289  ;;  %v1799_v6 = vpop.xlane.xlu0 %1798 }
 0x9e7   :  { %v1816_v4 = vmul.f32 %v5290_v3, %v1784_v39  ;;  %v1805_v8 = vmul.f32 0.03125, %v1799_v6 }
 0x9e8   :  { %v5292_v12 = vpop.eup %5291 }
 0x9e9   :  { %v1815_v9 = vmul.f32 %v5292_v12, %v1783_v41  ;;  %v1809_v10 = vadd.f32 1e-12, %v1805_v8  ;;  %v1826_v61 = vmul.f32 %v4680_v7, %v1816_v4  ;;  %v4687_v4 = vld [vmem:[%s6285_s13] ss:$0 sm:$0xff] }
 0x9ea   :  { %v1802_v11 = vpop.xlane.xlu1 %1801 }
 0x9eb   :  { %v1825_v16 = vmul.f32 %v4680_v7, %v1815_v9  ;;  %5293 = vrsqrt.f32 %v1809_v10  ;;  %v1806_v18 = vmul.f32 0.03125, %v1802_v11  ;;  %v5813_v22 = vadd.f32 %v4681_v15, %v1826_v61 }
 0x9ed   :  { %v5811_v20 = vadd.f32 %v4681_v15, %v1825_v16  ;;  %v1810_v21 = vadd.f32 1e-12, %v1806_v18 }
 0x9ef   :  { %5042 = vmatprep.mubr.msk.f32.mxu0 %vm63_vm0, %v5811_v20  ;;  %5295 = vrsqrt.f32 %v1810_v21 }
 0x9f0   :  { %5043 = vmatmul.mubr.msk.f32.vlgmr.msra.gmra.mxu0 %vm63_vm0, %v5813_v22 }
 0x9f8   :  { %v5294_v23 = vpop.eup %5293 }
 0x9f9   :  { %v1817_v24 = vmul.f32 %v5294_v23, %v1785_v46 }
 0x9fb   :  { %v1827_v25 = vmul.f32 %v4680_v7, %v1817_v24 }
 0x9fc   :  { %v5296_v26 = vpop.eup %5295 }
 0x9fd   :  { %v5819_v27 = vadd.f32 %v4681_v15, %v1827_v25  ;;  %v1818_v28 = vmul.f32 %v5296_v26, %v1786_v58 }
 0x9ff   :  { %5045 = vmatprep.mubr.msk.f32.mxu0 %vm63_vm0, %v5819_v27  ;;  %v1828_v29 = vmul.f32 %v4680_v7, %v1818_v28 }
 0xa01   :  { %v5823_v30 = vadd.f32 %v4681_v15, %v1828_v29 }
 0xa03   :  { %5046 = vmatmul.mubr.msk.f32.gmra.mxu0 %vm63_vm0, %v5823_v30 }
 0xab0   :  { %v5044_v39 = vpop.f32.mrf.mxu0 }
 0xab1   :  { %v1934_v40 = vadd.f32 %v5044_v39, %v4682_v38 }
 0xab2   :  { %v1928_v41 = vpop.f32.mrf.mxu0 }
 0xab3   :  { %v1952_v42 = vmul.f32 0.70710677, %v1934_v40  ;;  %v1929_v43 = vadd.f32 %v4682_v38, %v1928_v41  ;;  %v1948_v58 = vmul.f32 0.5, %v1934_v40 }
 0xab5   :  { %5297 = verf.f32 %v1952_v42  ;;  %v1951_v44 = vmul.f32 0.70710677, %v1929_v43  ;;  %v1947_v47 = vmul.f32 0.5, %v1929_v43 }
 0xab7   :  { %5299 = verf.f32 %v1951_v44  ;;  %v4697_v44 = vld [vmem:[%s6276_s4 + $0x38] sm:$0xff] }
 0xab8   :  { %5070 = vmatprep.subr.mxu0 %v4697_v44 }
 0xab9   :  { %5071 = vmatpush3.msra.mxu0 %v4697_v44 }
 0xac2   :  { %v5298_v2 = vpop.eup %5297 }
 0xac3   :  { %v1960_v5 = vadd.f32 1.0, %v5298_v2  ;;  %v5047_v46 = vpop.f32.mrf.mxu0  ;;  %v4696_v2 = vld [vmem:[%s6276_s4 + $0x30] sm:$0xff] }
 0xac4   :  { %v5300_v45 = vpop.eup %5299  ;;  %v1944_v50 = vadd.f32 %v5047_v46, %v4682_v38  ;;  %5072 = vmatprep.subr.mxu0 %v4696_v2 }
 0xac5   :  { %v1959_v49 = vadd.f32 1.0, %v5300_v45  ;;  %v1938_v51 = vpop.f32.mrf.mxu0  ;;  %v1964_v55 = vmul.f32 %v1960_v5, %v1948_v58  ;;  %5073 = vmatpush3.msra.mxu0 %v4696_v2  ;;  %v4695_v45 = vld [vmem:[%s6276_s4 + $0x28] sm:$0xff]  ;;  %v4694_v5 = vld [vmem:[%s6276_s4 + $0x20] sm:$0xff] }
 0xac6   :  { %v1954_v53 = vmul.f32 0.70710677, %v1944_v50  ;;  %v1939_v54 = vadd.f32 %v4682_v38, %v1938_v51  ;;  %v1950_v0 = vmul.f32 0.5, %v1944_v50  ;;  %5074 = vmatprep.subr.mxu0 %v4695_v45 }
 0xac7   :  { %v1963_v52 = vmul.f32 %v1959_v49, %v1947_v47  ;;  %5075 = vmatpush3.msra.mxu0 %v4695_v45  ;;  %v2621_v45 = vld [vmem:[%s6295_s21 + $0x1] sm:$0x1] }
 0xac8   :  { %5301 = verf.f32 %v1954_v53  ;;  %v1953_v56 = vmul.f32 0.70710677, %v1939_v54  ;;  %v1949_v62 = vmul.f32 0.5, %v1939_v54  ;;  %5076 = vmatprep.subr.mxu0 %v4694_v5  ;;  %v4692_v54 = vld [vmem:[%s6286_s14] ss:$0 sm:$0xff] }
 0xac9   :  { %5064 = vmatprep.mubr.msk.f32.mxu1 %vm1982_vm6, %v1963_v52  ;;  %5077 = vmatpush3.msra.mxu0 %v4694_v5 }
 0xaca   :  { %5065 = vmatmul.mubr.msk.f32.vlgmr.msra.gmra.mxu1 %vm1982_vm6, %v1964_v55  ;;  %5303 = verf.f32 %v1953_v56  ;;  %5084 = vmatprep.subr.mxu0 %v5423_v48 }
 0xad5   :  { %v5302_v57 = vpop.eup %5301 }
 0xad6   :  { %v1962_v60 = vadd.f32 1.0, %v5302_v57 }
 0xad7   :  { %v5304_v59 = vpop.eup %5303 }
 0xad8   :  { %v1961_v63 = vadd.f32 1.0, %v5304_v59  ;;  %v1966_v3 = vmul.f32 %v1962_v60, %v1950_v0 }
 0xada   :  { %v1965_v1 = vmul.f32 %v1961_v63, %v1949_v62 }
 0xadc   :  { %5067 = vmatprep.mubr.msk.f32.mxu1 %vm1982_vm6, %v1965_v1  ;;  %v4693_v1 = vld [vmem:[%s6287_s15] ss:$0 sm:$0xff] }
 0xadd   :  { %5068 = vmatmul.mubr.msk.f32.gmra.mxu1 %vm1982_vm6, %v1966_v3 }
 0xade   :  { %5096 = vmatprep.mubr.msk.f32.mxu1 %vm5424_vm2, %v5423_v48 }
 0xb8a   :  { %v5066_v6 = vpop.f32.mrf.mxu1 }
 0xb8b   :  { %v2067_v7 = vadd.f32 %v5066_v6, %v4687_v4 }
 0xb8c   :  { %v2061_v12 = vpop.f32.mrf.mxu1 }
 0xb8d   :  { %v2062_v8 = vadd.f32 %v4687_v4, %v2061_v12  ;;  %v2081_v9 = vadd.f32 %v2067_v7, %v5813_v22 }
 0xb8f   :  { %v2089_v10 = vsel %vm63_vm0, %v2081_v9, 0.0  ;;  %v2080_v61 = vadd.f32 %v2062_v8, %v5811_v20 }
 0xb90   :  { %2090 = vadd.xlane.f32.xlu1 %v2089_v10 }
 0xb91   :  { %v2086_v11 = vsel %vm63_vm0, %v2080_v61, 0.0 }
 0xb92   :  { %2087 = vadd.xlane.f32.xlu0 %v2086_v11 }
 0xb9d   :  { %v5069_v15 = vpop.f32.mrf.mxu1 }
 0xb9e   :  { %v2077_v16 = vadd.f32 %v5069_v15, %v4687_v4 }
 0xb9f   :  { %v2071_v18 = vpop.f32.mrf.mxu1 }
 0xba0   :  { %v2072_v21 = vadd.f32 %v4687_v4, %v2071_v18  ;;  %v2083_v23 = vadd.f32 %v2077_v16, %v5823_v30  ;;  %v4699_v18 = vld [vmem:[%s6277_s5 + $0x1] ss:$0 sm:$0xff] }
 0xba2   :  { %v2095_v24 = vsel %vm63_vm0, %v2083_v23, 0.0  ;;  %v2082_v25 = vadd.f32 %v2072_v21, %v5819_v27 }
 0xba3   :  { %2096 = vadd.xlane.f32.xlu1 %v2095_v24 }
 0xba4   :  { %v2092_v22 = vsel %vm63_vm0, %v2082_v25, 0.0 }
 0xba5   :  { %2093 = vadd.xlane.f32.xlu0 %v2092_v22 }
 0xc19   :  { %v2091_v26 = vpop.xlane.xlu1 %2090 }
 0xc1a   :  { %v2099_v20 = vmul.f32 0.03125, %v2091_v26 }
 0xc1b   :  { %v2088_v28 = vpop.xlane.xlu0 %2087 }
 0xc1c   :  { %v2103_v29 = vsub.f32 %v2081_v9, %v2099_v20  ;;  %v2098_v31 = vmul.f32 0.03125, %v2088_v28 }
 0xc1e   :  { %v2102_v13 = vsub.f32 %v2080_v61, %v2098_v31  ;;  %v2107_v32 = vmul.f32 %v2103_v29, %v2103_v29 }
 0xc20   :  { %v2113_v33 = vsel %vm63_vm0, %v2107_v32, 0.0  ;;  %v2106_v35 = vmul.f32 %v2102_v13, %v2102_v13 }
 0xc21   :  { %2114 = vadd.xlane.f32.xlu1 %v2113_v33 }
 0xc22   :  { %v2110_v30 = vsel %vm63_vm0, %v2106_v35, 0.0 }
 0xc23   :  { %2111 = vadd.xlane.f32.xlu0 %v2110_v30 }
 0xc2c   :  { %v2097_v37 = vpop.xlane.xlu1 %2096 }
 0xc2d   :  { %v2101_v27 = vmul.f32 0.03125, %v2097_v37 }
 0xc2e   :  { %v2094_v36 = vpop.xlane.xlu0 %2093 }
 0xc2f   :  { %v2105_v34 = vsub.f32 %v2083_v23, %v2101_v27  ;;  %v2100_v38 = vmul.f32 0.03125, %v2094_v36 }
 0xc31   :  { %v2104_v39 = vsub.f32 %v2082_v25, %v2100_v38  ;;  %v2109_v40 = vmul.f32 %v2105_v34, %v2105_v34 }
 0xc33   :  { %v2119_v41 = vsel %vm63_vm0, %v2109_v40, 0.0  ;;  %v2108_v42 = vmul.f32 %v2104_v39, %v2104_v39 }
 0xc34   :  { %2120 = vadd.xlane.f32.xlu1 %v2119_v41 }
 0xc35   :  { %v2116_v43 = vsel %vm63_vm0, %v2108_v42, 0.0 }
 0xc36   :  { %2117 = vadd.xlane.f32.xlu0 %v2116_v43  ;;  %v2272_v43 = vld [vmem:[%s6295_s21] sm:$0x1] }
 0xc37   :  { %v4704_v44 = vadd.f32 -1.0, %v2272_v43 }
 0xc39   :  { %v2274_v2 = vmul.f32 10000.0, %v4704_v44 }
 0xc3b   :  { %v2357_v5 = vrot.slane %v2274_v2, %v5630_v19 }
 0xcaa   :  { %v2115_v46 = vpop.xlane.xlu1 %2114 }
 0xcab   :  { %v2123_v47 = vmul.f32 0.03125, %v2115_v46  ;;  %v4711_v46 = vadd.f32 -1.0, %v2621_v45 }
 0xcac   :  { %v2112_v49 = vpop.xlane.xlu0 %2111 }
 0xcad   :  { %v2127_v50 = vadd.f32 1e-12, %v2123_v47  ;;  %v2122_v58 = vmul.f32 0.03125, %v2112_v49 }
 0xcaf   :  { %5305 = vrsqrt.f32 %v2127_v50  ;;  %v2126_v51 = vadd.f32 1e-12, %v2122_v58 }
 0xcb1   :  { %5307 = vrsqrt.f32 %v2126_v51 }
 0xcbc   :  { %v5306_v52 = vpop.eup %5305 }
 0xcbd   :  { %v2135_v53 = vmul.f32 %v5306_v52, %v2103_v29  ;;  %v2121_v56 = vpop.xlane.xlu1 %2120 }
 0xcbe   :  { %v5308_v55 = vpop.eup %5307  ;;  %v2125_v57 = vmul.f32 0.03125, %v2121_v56 }
 0xcbf   :  { %v2134_v59 = vmul.f32 %v5308_v55, %v2102_v13  ;;  %v2118_v60 = vpop.xlane.xlu0 %2117  ;;  %v2145_v62 = vmul.f32 %v4692_v54, %v2135_v53 }
 0xcc0   :  { %v2129_v63 = vadd.f32 1e-12, %v2125_v57  ;;  %v2124_v0 = vmul.f32 0.03125, %v2118_v60 }
 0xcc1   :  { %v2144_v3 = vmul.f32 %v4692_v54, %v2134_v59  ;;  %v5897_v7 = vadd.f32 %v4693_v1, %v2145_v62  ;;  %v2970_v62 = vld [vmem:[%s6295_s21 + $0x2] sm:$0x1] }
 0xcc2   :  { %5309 = vrsqrt.f32 %v2129_v63  ;;  %v2128_v4 = vadd.f32 1e-12, %v2124_v0 }
 0xcc3   :  { %v5895_v6 = vadd.f32 %v4693_v1, %v2144_v3  ;;  %v4718_v3 = vadd.f32 -1.0, %v2970_v62 }
 0xcc4   :  { %5311 = vrsqrt.f32 %v2128_v4 }
 0xcc5   :  { %5078 = vmatprep.mubr.msk.f32.mxu0 %vm63_vm0, %v5895_v6 }
 0xcc6   :  { %5079 = vmatmul.mubr.msk.f32.vlgmr.msra.gmra.mxu0 %vm63_vm0, %v5897_v7 }
 0xccf   :  { %v5310_v12 = vpop.eup %5309 }
 0xcd0   :  { %v2137_v8 = vmul.f32 %v5310_v12, %v2105_v34 }
 0xcd1   :  { %v5312_v9 = vpop.eup %5311 }
 0xcd2   :  { %v2136_v10 = vmul.f32 %v5312_v9, %v2104_v39  ;;  %v2147_v61 = vmul.f32 %v4692_v54, %v2137_v8 }
 0xcd4   :  { %v2146_v11 = vmul.f32 %v4692_v54, %v2136_v10  ;;  %v5905_v16 = vadd.f32 %v4693_v1, %v2147_v61  ;;  %v2623_v54 = vmul.f32 10000.0, %v4711_v46  ;;  %v2972_v61 = vmul.f32 10000.0, %v4718_v3 }
 0xcd6   :  { %v5903_v15 = vadd.f32 %v4693_v1, %v2146_v11  ;;  %v2706_v59 = vrot.slane %v2623_v54, %v5630_v19  ;;  %v3319_v11 = vld [vmem:[%s6295_s21 + $0x3] sm:$0x1] }
 0xcd8   :  { %5081 = vmatprep.mubr.msk.f32.mxu0 %vm63_vm0, %v5903_v15 }
 0xcd9   :  { %5082 = vmatmul.mubr.msk.f32.gmra.mxu0 %vm63_vm0, %v5905_v16 }
 0xcda   :  { %5086 = vmatprep.mubr.msk.f32.mxu0 %vm5424_vm2, %v5423_v48 }
 0xd86   :  { %v5080_v21 = vpop.f32.mrf.mxu0 }
 0xd87   :  { %v2255_v23 = vadd.f32 %v5080_v21, %v4699_v18  ;;  %v3055_v21 = vrot.slane %v2972_v61, %v5630_v19 }
 0xd88   :  { %v2249_v24 = vpop.f32.mrf.mxu0 }
 0xd89   :  { %2269 = vst.msk [vmem:[#allocation2 + $0x8] sm:$0xff] %vm245_vm1, %v2255_v23  ;;  %v2250_v25 = vadd.f32 %v4699_v18, %v2249_v24  ;;  %v4725_v23 = vadd.f32 -1.0, %v3319_v11 }
 0xd8b   :  { %2268 = vst.msk [vmem:[#allocation2] sm:$0xff] %vm245_vm1, %v2250_v25 }
 0xd90   :  { %v5924_v26 = vld [vmem:[#allocation2 + $0x8] sm:$0xff] }
 0xd92   :  { %v5918_v22 = vld [vmem:[#allocation2] sm:$0xff] }
 0xd93   :  { %2451 = vrot.lane.b32.xlu1 %v5918_v22, %s5428_s19  ;;  %2277 = vrot.lane.b32.xlu0 %v5918_v22, %s5425_s0 }
 0xd97   :  { %2449 = vrot.lane.b32.xlu1 %v5918_v22, %s5427_s18  ;;  %2800 = vrot.lane.b32.xlu0 %v5924_v26, %s5428_s19 }
 0xd99   :  { %v5083_v20 = vpop.f32.mrf.mxu0 }
 0xd9a   :  { %v2265_v28 = vadd.f32 %v5083_v20, %v4699_v18 }
 0xd9b   :  { %2626 = vrot.lane.b32.xlu1 %v5924_v26, %s5425_s0  ;;  %v2259_v29 = vpop.f32.mrf.mxu0 }
 0xd9c   :  { %2271 = vst.msk [vmem:[#allocation2 + $0x18] sm:$0xff] %vm245_vm1, %v2265_v28  ;;  %v2260_v31 = vadd.f32 %v4699_v18, %v2259_v29  ;;  %v3321_v29 = vmul.f32 10000.0, %v4725_v23 }
 0xd9e   :  { %2270 = vst.msk [vmem:[#allocation2 + $0x10] sm:$0xff] %vm245_vm1, %v2260_v31 }
 0xd9f   :  { %2798 = vrot.lane.b32.xlu1 %v5924_v26, %s5427_s18 }
 0xda3   :  { %v5942_v32 = vld [vmem:[#allocation2 + $0x18] sm:$0xff] }
 0xda5   :  { %v5936_v13 = vld [vmem:[#allocation2 + $0x10] sm:$0xff] }
 0xda6   :  { %3149 = vrot.lane.b32.xlu1 %v5936_v13, %s5428_s19  ;;  %2975 = vrot.lane.b32.xlu0 %v5936_v13, %s5425_s0 }
 0xdaa   :  { %3324 = vrot.lane.b32.xlu1 %v5942_v32, %s5425_s0  ;;  %3147 = vrot.lane.b32.xlu0 %v5936_v13, %s5427_s18 }
 0xdae   :  { %3496 = vrot.lane.b32.xlu1 %v5942_v32, %s5427_s18  ;;  %3498 = vrot.lane.b32.xlu0 %v5942_v32, %s5428_s19 }
 0xe05   :  { %v2278_v33 = vpop.permute.xlu0 %2277  ;;  %v2452_v35 = vpop.permute.xlu1 %2451 }
 0xe06   :  { %5085 = vmatpush3.xpose.msk.msra.mxu0 %vm257_vm3, %v2278_v33  ;;  %5095 = vmatpush3.xpose.msk.msra.mxu1 %vm257_vm3, %v2452_v35 }
 0xe07   :  { %5104 = vmatprep.subr.mxu1 %v5423_v48  ;;  %5089 = vmatprep.subr.mxu0 %v5423_v48 }
 0xe09   :  { %5087 = vmatmul.mubr.msk.f32.vlgmr.msra.gmra.mxu0 %vm257_vm3, %v5918_v22  ;;  %v2450_v30 = vpop.permute.xlu1 %2449  ;;  %v2801_v27 = vpop.permute.xlu0 %2800 }
 0xe0a   :  { %5097 = vmatmul.mubr.msk.f32.vlgmr.msra.gmra.mxu1 %vm257_vm3, %v2450_v30  ;;  %5091 = vmatprep.mubr.msk.f32.mxu0 %vm5424_vm2, %v5423_v48 }
 0xe0b   :  { %5106 = vmatprep.mubr.msk.f32.mxu1 %vm5424_vm2, %v5423_v48 }
 0xe0d   :  { %v2627_v37 = vpop.permute.xlu1 %2626 }
 0xe0e   :  { %5105 = vmatpush3.xpose.msk.msra.mxu1 %vm257_vm3, %v2627_v37 }
 0xe0f   :  { %5114 = vmatprep.subr.mxu1 %v5423_v48 }
 0xe11   :  { %5107 = vmatmul.mubr.msk.f32.vlgmr.msra.gmra.mxu1 %vm257_vm3, %v5924_v26  ;;  %v2799_v36 = vpop.permute.xlu1 %2798 }
 0xe12   :  { %5115 = vmatpush3.xpose.msk.msra.mxu1 %vm257_vm3, %v2801_v27  ;;  %5116 = vmatprep.mubr.msk.f32.mxu1 %vm5424_vm2, %v5423_v48  ;;  %v3404_v27 = vrot.slane %v3321_v29, %v5630_v19 }
 0xe13   :  { %5124 = vmatprep.subr.mxu1 %v5423_v48 }
 0xe15   :  { %5117 = vmatmul.mubr.msk.f32.vlgmr.msra.gmra.mxu1 %vm257_vm3, %v2799_v36 }
 0xe16   :  { %5126 = vmatprep.mubr.msk.f32.mxu1 %vm5424_vm2, %v5423_v48 }
 0xe18   :  { %v2976_v34 = vpop.permute.xlu0 %2975  ;;  %v3150_v38 = vpop.permute.xlu1 %3149 }
 0xe19   :  { %5125 = vmatpush3.xpose.msk.msra.mxu1 %vm257_vm3, %v2976_v34 }
 0xe1a   :  { %5134 = vmatprep.subr.mxu1 %v5423_v48 }
 0xe1c   :  { %5127 = vmatmul.mubr.msk.f32.vlgmr.msra.gmra.mxu1 %vm257_vm3, %v5936_v13  ;;  %v3148_v39 = vpop.permute.xlu0 %3147  ;;  %v3325_v40 = vpop.permute.xlu1 %3324 }
 0xe1d   :  { %5135 = vmatpush3.xpose.msk.msra.mxu1 %vm257_vm3, %v3150_v38  ;;  %5136 = vmatprep.mubr.msk.f32.mxu1 %vm5424_vm2, %v5423_v48 }
 0xe1e   :  { %5144 = vmatprep.subr.mxu1 %v5423_v48 }
 0xe20   :  { %5137 = vmatmul.mubr.msk.f32.vlgmr.msra.gmra.mxu1 %vm257_vm3, %v3148_v39  ;;  %v3499_v41 = vpop.permute.xlu0 %3498  ;;  %v3497_v42 = vpop.permute.xlu1 %3496 }
 0xe21   :  { %5145 = vmatpush3.xpose.msk.msra.mxu1 %vm257_vm3, %v3325_v40  ;;  %5146 = vmatprep.mubr.msk.f32.mxu1 %vm5424_vm2, %v5423_v48 }
 0xe22   :  { %5154 = vmatprep.subr.mxu1 %v5423_v48 }
 0xe24   :  { %5147 = vmatmul.mubr.msk.f32.vlgmr.msra.gmra.mxu1 %vm257_vm3, %v5942_v32 }
 0xe25   :  { %5155 = vmatpush3.xpose.msk.msra.mxu1 %vm257_vm3, %v3499_v41  ;;  %5156 = vmatprep.mubr.msk.f32.mxu1 %vm5424_vm2, %v5423_v48 }
 0xe28   :  { %5157 = vmatmul.mubr.msk.f32.vlgmr.msra.gmra.mxu1 %vm257_vm3, %v3497_v42 }
 0xec9   :  { %v2349_v47 = vpop.f32.mrf.mxu0 }
 0xeca   :  { %v2353_v49 = vmul.f32 0.25, %v2349_v47  ;;  %v2523_v50 = vpop.f32.mrf.mxu1 }
 0xecb   :  { %v2527_v58 = vmul.f32 0.25, %v2523_v50  ;;  %v5088_v51 = vpop.f32.mrf.mxu0 }
 0xecc   :  { %v5098_v52 = vpop.f32.mrf.mxu1  ;;  %v2358_v53 = vadd.f32 %v2357_v5, %v2353_v49 }
 0xecd   :  { %v2528_v55 = vadd.f32 %v2527_v58, %v2357_v5 }
 0xece   :  { %v2359_v56 = vsel %vm338_vm4, %v2358_v53, -inf }
 0xecf   :  { %2360 = vmax.xlane.f32.xlu0 %v2359_v56  ;;  %v2529_v57 = vsel %vm338_vm4, %v2528_v55, -inf }
 0xed0   :  { %2530 = vmax.xlane.f32.xlu1 %v2529_v57 }
 0xed1   :  { %v2698_v60 = vpop.f32.mrf.mxu1 }
 0xed2   :  { %v2702_v63 = vmul.f32 0.25, %v2698_v60 }
 0xed3   :  { %v5108_v0 = vpop.f32.mrf.mxu1 }
 0xed4   :  { %v6006_v1 = vadd.f32 %v2706_v59, %v2702_v63 }
 0xed5   :  { %v2872_v4 = vpop.f32.mrf.mxu1 }
 0xed6   :  { %v2876_v12 = vmul.f32 0.25, %v2872_v4  ;;  %v2708_v8 = vsel %vm338_vm4, %v6006_v1, -inf }
 0xed7   :  { %2709 = vmax.xlane.f32.xlu0 %v2708_v8  ;;  %v5118_v9 = vpop.f32.mrf.mxu1 }
 0xed8   :  { %v2877_v10 = vadd.f32 %v2876_v12, %v2706_v59 }
 0xeda   :  { %v2878_v18 = vsel %vm338_vm4, %v2877_v10, -inf }
 0xedb   :  { %2879 = vmax.xlane.f32.xlu0 %v2878_v18 }
 0xedc   :  { %v3047_v24 = vpop.f32.mrf.mxu1 }
 0xedd   :  { %v3051_v25 = vmul.f32 0.25, %v3047_v24 }
 0xede   :  { %v5128_v20 = vpop.f32.mrf.mxu1 }
 0xedf   :  { %v3056_v28 = vadd.f32 %v3055_v21, %v3051_v25 }
 0xee0   :  { %v3221_v31 = vpop.f32.mrf.mxu1 }
 0xee1   :  { %v3225_v33 = vmul.f32 0.25, %v3221_v31  ;;  %v3057_v35 = vsel %vm338_vm4, %v3056_v28, -inf }
 0xee2   :  { %3058 = vmax.xlane.f32.xlu0 %v3057_v35  ;;  %v5138_v30 = vpop.f32.mrf.mxu1 }
 0xee3   :  { %v3226_v37 = vadd.f32 %v3225_v33, %v3055_v21 }
 0xee4   :  { %v3396_v36 = vpop.f32.mrf.mxu1 }
 0xee5   :  { %v3400_v34 = vmul.f32 0.25, %v3396_v36  ;;  %v3227_v38 = vsel %vm338_vm4, %v3226_v37, -inf }
 0xee6   :  { %3228 = vmax.xlane.f32.xlu1 %v3227_v38  ;;  %v5148_v39 = vpop.f32.mrf.mxu1 }
 0xee7   :  { %v3405_v40 = vadd.f32 %v3404_v27, %v3400_v34 }
 0xee8   :  { %v3570_v41 = vpop.f32.mrf.mxu1 }
 0xee9   :  { %v3406_v42 = vsel %vm338_vm4, %v3405_v40, -inf  ;;  %v3574_v44 = vmul.f32 0.25, %v3570_v41 }
 0xeea   :  { %3407 = vmax.xlane.f32.xlu0 %v3406_v42  ;;  %v5158_v43 = vpop.f32.mrf.mxu1 }
 0xeeb   :  { %v3575_v2 = vadd.f32 %v3574_v44, %v3404_v27 }
 0xeed   :  { %v3576_v45 = vsel %vm338_vm4, %v3575_v2, -inf }
 0xef7   :  { %2370 = vrot.lane.b32.xlu1 %v5918_v22, %s5426_s30 }
 0xf1b   :  { %3577 = vmax.xlane.f32.xlu1 %v3576_v45 }
 0xf2c   :  { %2719 = vrot.lane.b32.xlu1 %v5924_v26, %s5426_s30 }
 0xf30   :  { %2889 = vrot.lane.b32.xlu1 %v5924_v26, %s5429_s26 }
 0xf34   :  { %3068 = vrot.lane.b32.xlu1 %v5936_v13, %s5426_s30 }
 0xf58   :  { %v2361_v19 = vpop.xlane.xlu0 %2360 }
 0xf59   :  { %v2362_v5 = vsub.f32 %v2358_v53, %v2361_v19  ;;  %v2531_v46 = vpop.xlane.xlu1 %2530 }
 0xf5a   :  { %v2532_v47 = vsub.f32 %v2528_v55, %v2531_v46 }
 0xf5b   :  { %v2363_v49 = vmul.f32 1.442695, %v2362_v5 }
 0xf5c   :  { %v2533_v50 = vmul.f32 1.442695, %v2532_v47 }
 0xf5d   :  { %5313 = vpow2.f32 %v2363_v49 }
 0xf5e   :  { %5315 = vpow2.f32 %v2533_v50 }
 0xf60   :  { %v2710_v58 = vpop.xlane.xlu0 %2709 }
 0xf61   :  { %v2711_v63 = vsub.f32 %v6006_v1, %v2710_v58 }
 0xf63   :  { %v2712_v3 = vmul.f32 1.442695, %v2711_v63 }
 0xf64   :  { %v2880_v51 = vpop.xlane.xlu0 %2879 }
 0xf65   :  { %v2881_v52 = vsub.f32 %v2877_v10, %v2880_v51 }
 0xf67   :  { %v2882_v54 = vmul.f32 1.442695, %v2881_v52 }
 0xf69   :  { %5317 = vpow2.f32 %v2882_v54 }
 0xf6a   :  { %v5314_v56 = vpop.eup %5313  ;;  %5319 = vpow2.f32 %v2712_v3  ;;  %v4734_v3 = vld [vmem:[%s6278_s6 + $0x30] sm:$0xff] }
 0xf6b   :  { %v6028_v57 = vpop.eup %5315  ;;  %v2365_v26 = vsel %vm338_vm4, %v5314_v56, 0.0  ;;  %v3059_v0 = vpop.xlane.xlu0 %3058 }
 0xf6c   :  { %2366 = vadd.xlane.f32.xlu0 %v2365_v26  ;;  %v2535_v53 = vsel %vm338_vm4, %v6028_v57, 0.0  ;;  %v3060_v4 = vsub.f32 %v3056_v28, %v3059_v0  ;;  %v4735_v0 = vld [vmem:[%s6278_s6 + $0x38] sm:$0xff] }
 0xf6d   :  { %2536 = vadd.xlane.f32.xlu1 %v2535_v53  ;;  %5164 = vmatprep.subr.mxu1 %v4735_v0 }
 0xf6e   :  { %v3061_v8 = vmul.f32 1.442695, %v3060_v4  ;;  %5165 = vmatpush3.msra.mxu1 %v4735_v0  ;;  %v4733_v4 = vld [vmem:[%s6278_s6 + $0x28] sm:$0xff]  ;;  %v4749_v0 = vld [vmem:[%s6282_s10 + $0x38] sm:$0xff] }
 0xf6f   :  { %v3229_v55 = vpop.xlane.xlu1 %3228  ;;  %5166 = vmatprep.subr.mxu1 %v4734_v3 }
 0xf70   :  { %5321 = vpow2.f32 %v3061_v8  ;;  %v3230_v10 = vsub.f32 %v3226_v37, %v3229_v55  ;;  %5167 = vmatpush3.msra.mxu1 %v4734_v3  ;;  %v4748_v3 = vld [vmem:[%s6282_s10 + $0x30] sm:$0xff] }
 0xf71   :  { %5168 = vmatprep.subr.mxu1 %v4733_v4 }
 0xf72   :  { %v3231_v11 = vmul.f32 1.442695, %v3230_v10  ;;  %5169 = vmatpush3.msra.mxu1 %v4733_v4  ;;  %v4747_v4 = vld [vmem:[%s6282_s10 + $0x28] sm:$0xff] }
 0xf73   :  { %v2371_v59 = vpop.permute.xlu1 %2370  ;;  %v3408_v12 = vpop.xlane.xlu0 %3407 }
 0xf74   :  { %5090 = vmatpush3.msra.mxu0 %v2371_v59  ;;  %v3409_v9 = vsub.f32 %v3405_v40, %v3408_v12  ;;  %v4732_v12 = vld [vmem:[%s6278_s6 + $0x20] sm:$0xff] }
 0xf75   :  { %5099 = vmatprep.subr.mxu0 %v5423_v48  ;;  %5170 = vmatprep.subr.mxu1 %v4732_v12 }
 0xf76   :  { %v6033_v60 = vpop.eup %5317  ;;  %v3410_v61 = vmul.f32 1.442695, %v3409_v9  ;;  %5171 = vmatpush3.msra.mxu1 %v4732_v12  ;;  %v4746_v12 = vld [vmem:[%s6282_s10 + $0x20] sm:$0xff] }
 0xf77   :  { %v2884_v62 = vsel %vm338_vm4, %v6033_v60, 0.0  ;;  %v5320_v18 = vpop.eup %5319 }
 0xf78   :  { %2885 = vadd.xlane.f32.xlu1 %v2884_v62  ;;  %5323 = vpow2.f32 %v3410_v61 }
 0xf79   :  { %5325 = vpow2.f32 %v3231_v11 }
 0xf7d   :  { %v6044_v1 = vpop.eup %5321 }
 0xf82   :  { %2540 = vrot.lane.b32.xlu0 %v5918_v22, %s5429_s26  ;;  %v2714_v22 = vsel %vm338_vm4, %v5320_v18, 0.0 }
 0xf85   :  { %v6048_v21 = vpop.eup %5323 }
 0xf86   :  { %v3412_v20 = vsel %vm338_vm4, %v6048_v21, 0.0  ;;  %v5326_v28 = vpop.eup %5325 }
 0xf87   :  { %v3233_v29 = vsel %vm338_vm4, %v5326_v28, 0.0 }
 0xf89   :  { %3238 = vrot.lane.b32.xlu1 %v5936_v13, %s5429_s26  ;;  %v3063_v13 = vsel %vm338_vm4, %v6044_v1, 0.0 }
 0xfa1   :  { %2715 = vadd.xlane.f32.xlu0 %v2714_v22 }
 0xfa4   :  { %v3578_v23 = vpop.xlane.xlu1 %3577 }
 0xfa5   :  { %3064 = vadd.xlane.f32.xlu0 %v3063_v13  ;;  %v3579_v24 = vsub.f32 %v3575_v2, %v3578_v23 }
 0xfa7   :  { %v3580_v25 = vmul.f32 1.442695, %v3579_v24 }
 0xfa8   :  { %v2720_v35 = vpop.permute.xlu1 %2719 }
 0xfa9   :  { %3413 = vadd.xlane.f32.xlu0 %v3412_v20  ;;  %5327 = vpow2.f32 %v3580_v25 }
 0xfac   :  { %v2890_v30 = vpop.permute.xlu1 %2889 }
 0xfad   :  { %3234 = vadd.xlane.f32.xlu1 %v3233_v29 }
 0xfb0   :  { %v3069_v37 = vpop.permute.xlu1 %3068 }
 0xfb6   :  { %v6053_v31 = vpop.eup %5327 }
 0xfb7   :  { %v3582_v33 = vsel %vm338_vm4, %v6053_v31, 0.0 }
 0xfb8   :  { %3583 = vadd.xlane.f32.xlu0 %v3582_v33 }
 0xfbe   :  { %3587 = vrot.lane.b32.xlu1 %v5942_v32, %s5429_s26 }
 0xfce   :  { %3417 = vrot.lane.b32.xlu0 %v5942_v32, %s5426_s30 }
 0xff5   :  { %v2367_v27 = vpop.xlane.xlu0 %2366 }
 0xff6   :  { %5329 = vrcp.f32 %v2367_v27  ;;  %v2537_v36 = vpop.xlane.xlu1 %2536 }
 0xff7   :  { %5331 = vrcp.f32 %v2537_v36 }
 0xff9   :  { %v2541_v40 = vpop.permute.xlu0 %2540 }
0x1001   :  { %v2886_v41 = vpop.xlane.xlu1 %2885 }
0x1003   :  { %v5330_v34 = vpop.eup %5329 }
0x1004   :  { %v2369_v38 = vmul.f32 %v5330_v34, %v5314_v56  ;;  %v5332_v39 = vpop.eup %5331 }
0x1005   :  { %v2539_v32 = vmul.f32 %v5332_v39, %v6028_v57  ;;  %v3239_v44 = vpop.permute.xlu1 %3238 }
0x1006   :  { %5092 = vmatmul.mubr.msk.f32.vlgmr.msra.gmra.mxu0 %vm338_vm4, %v2369_v38 }
0x1007   :  { %5100 = vmatpush3.msra.mxu0 %v2541_v40  ;;  %5101 = vmatprep.mubr.msk.f32.mxu0 %vm5424_vm2, %v5423_v48 }
0x1008   :  { %5109 = vmatprep.subr.mxu0 %v5423_v48 }
0x100a   :  { %5102 = vmatmul.mubr.msk.f32.vlgmr.msra.gmra.mxu0 %vm338_vm4, %v2539_v32 }
0x100b   :  { %5110 = vmatpush3.msra.mxu0 %v2720_v35  ;;  %5111 = vmatprep.mubr.msk.f32.mxu0 %vm5424_vm2, %v5423_v48 }
0x100c   :  { %5119 = vmatprep.subr.mxu0 %v5423_v48 }
0x102a   :  { %v2716_v42 = vpop.xlane.xlu0 %2715 }
0x102b   :  { %5333 = vrcp.f32 %v2716_v42 }
0x102c   :  { %5335 = vrcp.f32 %v2886_v41 }
0x102e   :  { %v3065_v43 = vpop.xlane.xlu0 %3064 }
0x102f   :  { %5337 = vrcp.f32 %v3065_v43 }
0x1032   :  { %v3414_v2 = vpop.xlane.xlu0 %3413 }
0x1036   :  { %v3235_v45 = vpop.xlane.xlu1 %3234 }
0x1037   :  { %5339 = vrcp.f32 %v3235_v45 }
0x1038   :  { %v5334_v19 = vpop.eup %5333  ;;  %5341 = vrcp.f32 %v3414_v2 }
0x1039   :  { %v2718_v5 = vmul.f32 %v5334_v19, %v5320_v18  ;;  %v5336_v46 = vpop.eup %5335 }
0x103a   :  { %v2888_v47 = vmul.f32 %v5336_v46, %v6033_v60  ;;  %v3588_v26 = vpop.permute.xlu1 %3587 }
0x103b   :  { %5112 = vmatmul.mubr.msk.f32.vlgmr.msra.gmra.mxu0 %vm338_vm4, %v2718_v5 }
0x103c   :  { %5120 = vmatpush3.msra.mxu0 %v2890_v30  ;;  %5121 = vmatprep.mubr.msk.f32.mxu0 %vm5424_vm2, %v5423_v48  ;;  %v5338_v49 = vpop.eup %5337 }
0x103d   :  { %5129 = vmatprep.subr.mxu0 %v5423_v48  ;;  %v3067_v50 = vmul.f32 %v5338_v49, %v6044_v1 }
0x103f   :  { %5122 = vmatmul.mubr.msk.f32.vlgmr.msra.gmra.mxu0 %vm338_vm4, %v2888_v47 }
0x1040   :  { %5130 = vmatpush3.msra.mxu0 %v3069_v37  ;;  %5131 = vmatprep.mubr.msk.f32.mxu0 %vm5424_vm2, %v5423_v48  ;;  %v4737_v37 = vld [vmem:[%s6279_s7 + $0x1] ss:$0 sm:$0xff] }
0x1041   :  { %5139 = vmatprep.subr.mxu0 %v5423_v48  ;;  %v3584_v58 = vpop.xlane.xlu0 %3583 }
0x1042   :  { %5343 = vrcp.f32 %v3584_v58 }
0x1043   :  { %5132 = vmatmul.mubr.msk.f32.vlgmr.msra.gmra.mxu0 %vm338_vm4, %v3067_v50 }
0x1044   :  { %v5340_v51 = vpop.eup %5339  ;;  %5140 = vmatpush3.msra.mxu0 %v3239_v44  ;;  %5141 = vmatprep.mubr.msk.f32.mxu0 %vm5424_vm2, %v5423_v48 }
0x1045   :  { %5149 = vmatprep.subr.mxu0 %v5423_v48  ;;  %v3237_v52 = vmul.f32 %v5340_v51, %v5326_v28  ;;  %v5342_v54 = vpop.eup %5341  ;;  %v3418_v56 = vpop.permute.xlu0 %3417 }
0x1046   :  { %v3416_v57 = vmul.f32 %v5342_v54, %v6048_v21 }
0x1047   :  { %5142 = vmatmul.mubr.msk.f32.vlgmr.msra.gmra.mxu0 %vm338_vm4, %v3237_v52 }
0x1048   :  { %5150 = vmatpush3.msra.mxu0 %v3418_v56  ;;  %5151 = vmatprep.mubr.msk.f32.mxu0 %vm5424_vm2, %v5423_v48 }
0x1049   :  { %5159 = vmatprep.subr.mxu0 %v5423_v48 }
0x104b   :  { %5152 = vmatmul.mubr.msk.f32.vlgmr.msra.gmra.mxu0 %vm338_vm4, %v3416_v57 }
0x104c   :  { %5160 = vmatpush3.msra.mxu0 %v3588_v26  ;;  %5161 = vmatprep.mubr.msk.f32.mxu0 %vm5424_vm2, %v5423_v48 }
0x104d   :  { %5178 = vmatprep.subr.mxu0 %v4749_v0 }
0x104f   :  { %v5344_v53 = vpop.eup %5343 }
0x1050   :  { %v3586_v55 = vmul.f32 %v5344_v53, %v6053_v31 }
0x1052   :  { %5162 = vmatmul.mubr.msk.f32.vlgmr.msra.gmra.mxu0 %vm338_vm4, %v3586_v55 }
0x1053   :  { %5179 = vmatpush3.msra.mxu0 %v4749_v0 }
0x1054   :  { %5180 = vmatprep.subr.mxu0 %v4748_v3 }
0x1055   :  { %5181 = vmatpush3.msra.mxu0 %v4748_v3 }
0x1056   :  { %5182 = vmatprep.subr.mxu0 %v4747_v4 }
0x1057   :  { %5183 = vmatpush3.msra.mxu0 %v4747_v4 }
0x1058   :  { %5184 = vmatprep.subr.mxu0 %v4746_v12 }
0x1059   :  { %5185 = vmatpush3.msra.mxu0 %v4746_v12 }
0x105a   :  { %5214 = vmatprep.subr.mxu0 %v5423_v48 }
0x10c6   :  { %v2442_v59 = vpop.f32.mrf.mxu0 }
0x10c7   :  { %2446 = vst.msk [vmem:[#allocation3] sm:$0xff] %vm257_vm3, %v2442_v59 }
0x10c8   :  { %v5093_v60 = vpop.f32.mrf.mxu0 }
0x10ca   :  { %v2612_v62 = vpop.f32.mrf.mxu0 }
0x10cb   :  { %2617 = vrot.lane.b32.xlu0 %v2612_v62, %s5430_s29 }
0x10cc   :  { %v5103_v63 = vpop.f32.mrf.mxu0 }
0x10fb   :  { %v2791_v8 = vpop.f32.mrf.mxu0 }
0x10fc   :  { %2795 = vst.msk [vmem:[#allocation3 + $0x8] sm:$0xff] %vm257_vm3, %v2791_v8 }
0x10fd   :  { %v5113_v9 = vpop.f32.mrf.mxu0 }
0x10ff   :  { %v2961_v10 = vpop.f32.mrf.mxu0 }
0x1100   :  { %2966 = vrot.lane.b32.xlu1 %v2961_v10, %s5430_s29 }
0x1101   :  { %v5123_v61 = vpop.f32.mrf.mxu0 }
0x1103   :  { %v3140_v11 = vpop.f32.mrf.mxu0 }
0x1104   :  { %3144 = vst.msk [vmem:[#allocation3 + $0x10] sm:$0xff] %vm257_vm3, %v3140_v11 }
0x1105   :  { %v5133_v18 = vpop.f32.mrf.mxu0 }
0x1107   :  { %v3310_v22 = vpop.f32.mrf.mxu0 }
0x1108   :  { %3315 = vrot.lane.b32.xlu0 %v3310_v22, %s5430_s29 }
0x1109   :  { %v5143_v1 = vpop.f32.mrf.mxu0 }
0x110b   :  { %v3489_v13 = vpop.f32.mrf.mxu0 }
0x110c   :  { %3493 = vst.msk [vmem:[#allocation3 + $0x18] sm:$0xff] %vm257_vm3, %v3489_v13  ;;  %v4744_v13 = vld [vmem:[%s6280_s8 + $0x1] ss:$0 sm:$0xff] }
0x110d   :  { %v5153_v21 = vpop.f32.mrf.mxu0 }
0x1112   :  { %v3659_v23 = vpop.f32.mrf.mxu0 }
0x1113   :  { %3664 = vrot.lane.b32.xlu1 %v3659_v23, %s5430_s29 }
0x1114   :  { %v5163_v24 = vpop.f32.mrf.mxu0 }
0x113d   :  { %v2618_v25 = vpop.permute.xlu0 %2617 }
0x113e   :  { %2620 = vst.msk [vmem:[#allocation3] sm:$0xff] %vm600_vm5, %v2618_v25 }
0x1145   :  { %v3668_v20 = vld [vmem:[#allocation3] sm:$0xff] }
0x1146   :  { %5172 = vmatprep.mubr.msk.f32.mxu1 %vm63_vm0, %v3668_v20 }
0x1172   :  { %v2967_v28 = vpop.permute.xlu1 %2966 }
0x1173   :  { %2969 = vst.msk [vmem:[#allocation3 + $0x8] sm:$0xff] %vm600_vm5, %v2967_v28  ;;  %v4745_v28 = vld [vmem:[%s6281_s9 + $0x1] ss:$0 sm:$0xff] }
0x117a   :  { %v3316_v29 = vpop.permute.xlu0 %3315  ;;  %v3669_v31 = vld [vmem:[#allocation3 + $0x8] sm:$0xff] }
0x117b   :  { %3318 = vst.msk [vmem:[#allocation3 + $0x10] sm:$0xff] %vm600_vm5, %v3316_v29  ;;  %5173 = vmatmul.mubr.msk.f32.vlgmr.msra.gmra.mxu1 %vm63_vm0, %v3669_v31 }
0x1182   :  { %v3670_v33 = vld [vmem:[#allocation3 + $0x10] sm:$0xff] }
0x1183   :  { %5175 = vmatprep.mubr.msk.f32.mxu1 %vm63_vm0, %v3670_v33 }
0x1185   :  { %v3665_v35 = vpop.permute.xlu1 %3664 }
0x1186   :  { %3667 = vst.msk [vmem:[#allocation3 + $0x18] sm:$0xff] %vm600_vm5, %v3665_v35 }
0x118d   :  { %v3671_v30 = vld [vmem:[#allocation3 + $0x18] sm:$0xff] }
0x118e   :  { %5176 = vmatmul.mubr.msk.f32.gmra.mxu1 %vm63_vm0, %v3671_v30 }
0x123b   :  { %v5174_v27 = vpop.f32.mrf.mxu1 }
0x123c   :  { %v3769_v36 = vadd.f32 %v5174_v27, %v4737_v37 }
0x123d   :  { %v3763_v34 = vpop.f32.mrf.mxu1 }
0x123e   :  { %v3783_v38 = vadd.f32 %v3769_v36, %v5897_v7  ;;  %v3764_v39 = vadd.f32 %v4737_v37, %v3763_v34 }
0x1240   :  { %v3782_v40 = vadd.f32 %v3764_v39, %v5895_v6  ;;  %v3793_v32 = vsel %vm63_vm0, %v3783_v38, 0.0 }
0x1241   :  { %3794 = vadd.xlane.f32.xlu1 %v3793_v32 }
0x1242   :  { %v3790_v41 = vsel %vm63_vm0, %v3782_v40, 0.0 }
0x1243   :  { %3791 = vadd.xlane.f32.xlu0 %v3790_v41 }
0x124e   :  { %v5177_v42 = vpop.f32.mrf.mxu1 }
0x124f   :  { %v3779_v44 = vadd.f32 %v5177_v42, %v4737_v37 }
0x1250   :  { %v3773_v43 = vpop.f32.mrf.mxu1 }
0x1251   :  { %v3774_v2 = vadd.f32 %v4737_v37, %v3773_v43  ;;  %v3785_v19 = vadd.f32 %v3779_v44, %v5905_v16  ;;  %v4763_v43 = vld [vmem:[%s6284_s12 + $0x78] sm:$0xff]  ;;  %v4762_v44 = vld [vmem:[%s6284_s12 + $0x70] sm:$0xff] }
0x1252   :  { %5192 = vmatprep.subr.mxu1 %v4763_v43 }
0x1253   :  { %v3784_v45 = vadd.f32 %v3774_v2, %v5903_v15  ;;  %v3799_v7 = vsel %vm63_vm0, %v3785_v19, 0.0  ;;  %5193 = vmatpush3.msra.mxu1 %v4763_v43  ;;  %v4761_v2 = vld [vmem:[%s6284_s12 + $0x68] sm:$0xff] }
0x1254   :  { %5194 = vmatprep.subr.mxu1 %v4762_v44 }
0x1255   :  { %v3796_v5 = vsel %vm63_vm0, %v3784_v45, 0.0  ;;  %5195 = vmatpush3.msra.mxu1 %v4762_v44 }
0x1256   :  { %3797 = vadd.xlane.f32.xlu0 %v3796_v5  ;;  %5196 = vmatprep.subr.mxu1 %v4761_v2  ;;  %v4758_v5 = vld [vmem:[%s6284_s12 + $0x50] sm:$0xff] }
0x1257   :  { %5197 = vmatpush3.msra.mxu1 %v4761_v2 }
0x125a   :  { %3800 = vadd.xlane.f32.xlu0 %v3799_v7  ;;  %v4757_v7 = vld [vmem:[%s6284_s12 + $0x48] sm:$0xff] }
0x12ca   :  { %v3795_v6 = vpop.xlane.xlu1 %3794 }
0x12cb   :  { %v3803_v46 = vmul.f32 0.03125, %v3795_v6  ;;  %v4756_v6 = vld [vmem:[%s6284_s12 + $0x40] sm:$0xff] }
0x12cc   :  { %v3792_v47 = vpop.xlane.xlu0 %3791 }
0x12cd   :  { %v3807_v49 = vsub.f32 %v3783_v38, %v3803_v46  ;;  %v3802_v50 = vmul.f32 0.03125, %v3792_v47  ;;  %v4751_v46 = vld [vmem:[%s6283_s11 + $0x1] ss:$0 sm:$0xff] }
0x12cf   :  { %v3806_v58 = vsub.f32 %v3782_v40, %v3802_v50  ;;  %v3811_v51 = vmul.f32 %v3807_v49, %v3807_v49 }
0x12d1   :  { %v3817_v52 = vsel %vm63_vm0, %v3811_v51, 0.0  ;;  %v3810_v54 = vmul.f32 %v3806_v58, %v3806_v58 }
0x12d2   :  { %3818 = vadd.xlane.f32.xlu1 %v3817_v52 }
0x12d3   :  { %v3814_v15 = vsel %vm63_vm0, %v3810_v54, 0.0 }
0x12d4   :  { %3815 = vadd.xlane.f32.xlu0 %v3814_v15 }
0x12df   :  { %v3798_v16 = vpop.xlane.xlu0 %3797 }
0x12e0   :  { %v3804_v56 = vmul.f32 0.03125, %v3798_v16 }
0x12e2   :  { %v3808_v57 = vsub.f32 %v3784_v45, %v3804_v56  ;;  %v4760_v45 = vld [vmem:[%s6284_s12 + $0x60] sm:$0xff] }
0x12e3   :  { %v3801_v26 = vpop.xlane.xlu0 %3800  ;;  %5198 = vmatprep.subr.mxu1 %v4760_v45 }
0x12e4   :  { %v3805_v53 = vmul.f32 0.03125, %v3801_v26  ;;  %v3812_v55 = vmul.f32 %v3808_v57, %v3808_v57  ;;  %5199 = vmatpush3.msra.mxu1 %v4760_v45 }
0x12e6   :  { %v3809_v59 = vsub.f32 %v3785_v19, %v3805_v53  ;;  %v3820_v60 = vsel %vm63_vm0, %v3812_v55, 0.0  ;;  %v4759_v19 = vld [vmem:[%s6284_s12 + $0x58] sm:$0xff] }
0x12e7   :  { %3821 = vadd.xlane.f32.xlu0 %v3820_v60  ;;  %5200 = vmatprep.subr.mxu1 %v4759_v19 }
0x12e8   :  { %v3813_v62 = vmul.f32 %v3809_v59, %v3809_v59  ;;  %5201 = vmatpush3.msra.mxu1 %v4759_v19 }
0x12e9   :  { %5202 = vmatprep.subr.mxu1 %v4758_v5 }
0x12ea   :  { %v3823_v63 = vsel %vm63_vm0, %v3813_v62, 0.0  ;;  %5203 = vmatpush3.msra.mxu1 %v4758_v5 }
0x12eb   :  { %3824 = vadd.xlane.f32.xlu1 %v3823_v63  ;;  %5204 = vmatprep.subr.mxu1 %v4757_v7 }
0x12ec   :  { %5205 = vmatpush3.msra.mxu1 %v4757_v7 }
0x12ed   :  { %5206 = vmatprep.subr.mxu1 %v4756_v6 }
0x12ee   :  { %5207 = vmatpush3.msra.mxu1 %v4756_v6 }
0x12ef   :  { %5234 = vmatprep.subr.mxu1 %v5423_v48 }
0x135b   :  { %v3819_v8 = vpop.xlane.xlu1 %3818 }
0x135c   :  { %v3827_v9 = vmul.f32 0.03125, %v3819_v8 }
0x135d   :  { %v3816_v10 = vpop.xlane.xlu0 %3815 }
0x135e   :  { %v3831_v61 = vadd.f32 1e-12, %v3827_v9  ;;  %v3826_v11 = vmul.f32 0.03125, %v3816_v10 }
0x1360   :  { %5345 = vrsqrt.f32 %v3831_v61  ;;  %v3830_v18 = vadd.f32 1e-12, %v3826_v11 }
0x1362   :  { %5347 = vrsqrt.f32 %v3830_v18 }
0x136d   :  { %v5346_v22 = vpop.eup %5345 }
0x136e   :  { %v3839_v1 = vmul.f32 %v5346_v22, %v3807_v49  ;;  %v4765_v22 = vld [vmem:[%s6285_s13 + $0x1] ss:$0 sm:$0xff] }
0x136f   :  { %v5348_v21 = vpop.eup %5347 }
0x1370   :  { %v3838_v23 = vmul.f32 %v5348_v21, %v3806_v58  ;;  %v3822_v24 = vpop.xlane.xlu0 %3821  ;;  %v3849_v25 = vmul.f32 %v4744_v13, %v3839_v1 }
0x1371   :  { %v3828_v20 = vmul.f32 0.03125, %v3822_v24 }
0x1372   :  { %v3848_v29 = vmul.f32 %v4744_v13, %v3838_v23  ;;  %v6158_v30 = vadd.f32 %v4745_v28, %v3849_v25 }
0x1373   :  { %v3832_v31 = vadd.f32 1e-12, %v3828_v20 }
0x1374   :  { %v6156_v33 = vadd.f32 %v4745_v28, %v3848_v29  ;;  %v3825_v35 = vpop.xlane.xlu1 %3824 }
0x1375   :  { %5349 = vrsqrt.f32 %v3832_v31  ;;  %v3829_v37 = vmul.f32 0.03125, %v3825_v35 }
0x1376   :  { %5186 = vmatprep.mubr.msk.f32.mxu0 %vm63_vm0, %v6156_v33 }
0x1377   :  { %5187 = vmatmul.mubr.msk.f32.vlgmr.msra.gmra.mxu0 %vm63_vm0, %v6158_v30  ;;  %v3833_v27 = vadd.f32 1e-12, %v3829_v37 }
0x1379   :  { %5351 = vrsqrt.f32 %v3833_v27 }
0x1382   :  { %v5350_v36 = vpop.eup %5349 }
0x1383   :  { %v3840_v34 = vmul.f32 %v5350_v36, %v3808_v57 }
0x1385   :  { %v3850_v38 = vmul.f32 %v4744_v13, %v3840_v34 }
0x1386   :  { %v5352_v39 = vpop.eup %5351 }
0x1387   :  { %v6164_v40 = vadd.f32 %v4745_v28, %v3850_v38  ;;  %v3841_v32 = vmul.f32 %v5352_v39, %v3809_v59 }
0x1389   :  { %5189 = vmatprep.mubr.msk.f32.mxu0 %vm63_vm0, %v6164_v40  ;;  %v3851_v41 = vmul.f32 %v4744_v13, %v3841_v32 }
0x138b   :  { %v6168_v42 = vadd.f32 %v4745_v28, %v3851_v41 }
0x138d   :  { %5190 = vmatmul.mubr.msk.f32.gmra.mxu0 %vm63_vm0, %v6168_v42 }
0x138e   :  { %5216 = vmatprep.mubr.msk.f32.mxu0 %vm5424_vm2, %v5423_v48 }
0x1437   :  { %v5188_v47 = vpop.f32.mrf.mxu0 }
0x1438   :  { %v3959_v49 = vadd.f32 %v5188_v47, %v4751_v46 }
0x1439   :  { %v3953_v50 = vpop.f32.mrf.mxu0 }
0x143a   :  { %v3977_v58 = vmul.f32 0.70710677, %v3959_v49  ;;  %v3954_v51 = vadd.f32 %v4751_v46, %v3953_v50  ;;  %v3973_v26 = vmul.f32 0.5, %v3959_v49 }
0x143c   :  { %5353 = verf.f32 %v3977_v58  ;;  %v3976_v52 = vmul.f32 0.70710677, %v3954_v51  ;;  %v3972_v56 = vmul.f32 0.5, %v3954_v51  ;;  %v4186_v51 = vld [vmem:[%s6295_s21] sm:$0x1] }
0x143e   :  { %5355 = verf.f32 %v3976_v52  ;;  %v4269_v52 = vld [vmem:[%s6295_s21 + $0x1] sm:$0x1] }
0x1449   :  { %v5354_v54 = vpop.eup %5353 }
0x144a   :  { %v3985_v16 = vadd.f32 1.0, %v5354_v54  ;;  %v4261_v54 = vsel %vm4260_vm7, %v4186_v51, 0.0 }
0x144b   :  { %v5356_v15 = vpop.eup %5355 }
0x144c   :  { %v3984_v57 = vadd.f32 1.0, %v5356_v15  ;;  %v3989_v59 = vmul.f32 %v3985_v16, %v3973_v26  ;;  %v4343_v15 = vsel %vm4260_vm7, %v4269_v52, 0.0  ;;  %v4350_v16 = vld [vmem:[%s6295_s21 + $0x2] sm:$0x1] }
0x144d   :  { %v5191_v55 = vpop.f32.mrf.mxu0 }
0x144e   :  { %v3988_v53 = vmul.f32 %v3984_v57, %v3972_v56  ;;  %v3969_v60 = vadd.f32 %v5191_v55, %v4751_v46  ;;  %v4431_v56 = vld [vmem:[%s6295_s21 + $0x3] sm:$0x1]  ;;  %v4424_v57 = vsel %vm4260_vm7, %v4350_v16, 0.0 }
0x144f   :  { %v3963_v62 = vpop.f32.mrf.mxu0  ;;  %v4505_v26 = vsel %vm4260_vm7, %v4431_v56, 0.0 }
0x1450   :  { %5208 = vmatprep.mubr.msk.f32.mxu1 %vm1982_vm6, %v3988_v53  ;;  %v3979_v63 = vmul.f32 0.70710677, %v3969_v60  ;;  %v3964_v0 = vadd.f32 %v4751_v46, %v3963_v62  ;;  %v3975_v61 = vmul.f32 0.5, %v3969_v60 }
0x1451   :  { %5209 = vmatmul.mubr.msk.f32.vlgmr.msra.gmra.mxu1 %vm1982_vm6, %v3989_v59 }
0x1452   :  { %5357 = verf.f32 %v3979_v63  ;;  %v3978_v3 = vmul.f32 0.70710677, %v3964_v0  ;;  %v3974_v9 = vmul.f32 0.5, %v3964_v0 }
0x1454   :  { %5359 = verf.f32 %v3978_v3 }
0x145f   :  { %v5358_v4 = vpop.eup %5357 }
0x1460   :  { %v3987_v8 = vadd.f32 1.0, %v5358_v4 }
0x1461   :  { %v5360_v12 = vpop.eup %5359 }
0x1462   :  { %v3986_v10 = vadd.f32 1.0, %v5360_v12  ;;  %v3991_v18 = vmul.f32 %v3987_v8, %v3975_v61  ;;  %v4772_v12 = vld [vmem:[%s6286_s14 + $0x1] ss:$0 sm:$0xff]  ;;  %s5431_s14 = smov [#allocation7]  }
0x1464   :  { %v3990_v11 = vmul.f32 %v3986_v10, %v3974_v9 }
0x1466   :  { %5211 = vmatprep.mubr.msk.f32.mxu1 %vm1982_vm6, %v3990_v11 }
0x1467   :  { %5212 = vmatmul.mubr.msk.f32.gmra.mxu1 %vm1982_vm6, %v3991_v18  ;;  %v4773_v18 = vld [vmem:[%s6287_s15 + $0x1] ss:$0 sm:$0xff]  ;;  %s4628_s15 = sshll.u32 %s5431_s14, 4  ;;  %s4629_s15 = int_to_ptr.vmem [resolvable:$true] %s4628_s15 }
0x1468   :  { %5236 = vmatprep.mubr.msk.f32.mxu1 %vm5424_vm2, %v5423_v48  ;;  %s5379_s3 = scalar_lea.vmem %s4629_s15, 32  ;;  %p5384_p1 = scmp.lt.s32.totalorder %s4629_s15, %s4629_s15 }
0x1469   :  { %p5380_p0 = scmp.ne.s32.totalorder %s4629_s15, %s5379_s3  ;;  %p5385_p2 = scmp.lt.s32.totalorder %s5379_s3, %s5379_s3 }
0x146b   :  { %p5386_p3 = por %p5385_p2, %p5384_p1 }
0x146d   :  { %p5387_p4 = pnand %p5386_p3, %p5380_p0 }
0x1511   :  { %v5210_v1 = vpop.f32.mrf.mxu1 }
0x1512   :  { %v4093_v13 = vadd.f32 %v5210_v1, %v4765_v22 }
0x1513   :  { %v4087_v21 = vpop.f32.mrf.mxu1 }
0x1514   :  { %v4107_v23 = vadd.f32 %v4093_v13, %v6158_v30  ;;  %v4088_v24 = vadd.f32 %v4765_v22, %v4087_v21 }
0x1516   :  { %v4106_v25 = vadd.f32 %v4088_v24, %v6156_v33  ;;  %v4117_v20 = vsel %vm63_vm0, %v4107_v23, 0.0 }
0x1517   :  { %4118 = vadd.xlane.f32.xlu1 %v4117_v20 }
0x1518   :  { %v4114_v28 = vsel %vm63_vm0, %v4106_v25, 0.0 }
0x1519   :  { %4115 = vadd.xlane.f32.xlu0 %v4114_v28 }
0x1527   :  { %v5213_v29 = vpop.f32.mrf.mxu1 }
0x1528   :  { %v4103_v31 = vadd.f32 %v5213_v29, %v4765_v22 }
0x1529   :  { %v4097_v35 = vpop.f32.mrf.mxu1 }
0x152a   :  { %v4109_v37 = vadd.f32 %v4103_v31, %v6168_v42  ;;  %v4098_v27 = vadd.f32 %v4765_v22, %v4097_v35 }
0x152c   :  { %v4108_v36 = vadd.f32 %v4098_v27, %v6164_v40  ;;  %v4123_v34 = vsel %vm63_vm0, %v4109_v37, 0.0 }
0x152d   :  { %4124 = vadd.xlane.f32.xlu1 %v4123_v34 }
0x152e   :  { %v4120_v30 = vsel %vm63_vm0, %v4108_v36, 0.0 }
0x152f   :  { %4121 = vadd.xlane.f32.xlu0 %v4120_v30 }
0x15a0   :  { %v4119_v33 = vpop.xlane.xlu1 %4118 }
0x15a1   :  { %v4127_v38 = vmul.f32 0.03125, %v4119_v33 }
0x15a2   :  { %v4116_v39 = vpop.xlane.xlu0 %4115 }
0x15a3   :  { %v4131_v32 = vsub.f32 %v4107_v23, %v4127_v38  ;;  %v4126_v41 = vmul.f32 0.03125, %v4116_v39 }
0x15a5   :  { %v4130_v43 = vsub.f32 %v4106_v25, %v4126_v41  ;;  %v4135_v44 = vmul.f32 %v4131_v32, %v4131_v32 }
0x15a7   :  { %v4141_v2 = vsel %vm63_vm0, %v4135_v44, 0.0  ;;  %v4134_v45 = vmul.f32 %v4130_v43, %v4130_v43 }
0x15a8   :  { %4142 = vadd.xlane.f32.xlu1 %v4141_v2 }
0x15a9   :  { %v4138_v42 = vsel %vm63_vm0, %v4134_v45, 0.0 }
0x15aa   :  { %4139 = vadd.xlane.f32.xlu0 %v4138_v42 }
0x15b6   :  { %v4125_v40 = vpop.xlane.xlu1 %4124 }
0x15b7   :  { %v4129_v19 = vmul.f32 0.03125, %v4125_v40 }
0x15b8   :  { %v4122_v5 = vpop.xlane.xlu0 %4121 }
0x15b9   :  { %v4133_v7 = vsub.f32 %v4109_v37, %v4129_v19  ;;  %v4128_v6 = vmul.f32 0.03125, %v4122_v5 }
0x15bb   :  { %v4132_v46 = vsub.f32 %v4108_v36, %v4128_v6  ;;  %v4137_v47 = vmul.f32 %v4133_v7, %v4133_v7 }
0x15bd   :  { %v4147_v49 = vsel %vm63_vm0, %v4137_v47, 0.0  ;;  %v4136_v50 = vmul.f32 %v4132_v46, %v4132_v46 }
0x15be   :  { %4148 = vadd.xlane.f32.xlu1 %v4147_v49 }
0x15bf   :  { %v4144_v58 = vsel %vm63_vm0, %v4136_v50, 0.0 }
0x15c0   :  { %4145 = vadd.xlane.f32.xlu0 %v4144_v58 }
0x15c2   :  { %4344 = vadd.xlane.f32.xlu1 %v4343_v15 }
0x15c4   :  { %4262 = vadd.xlane.f32.xlu0 %v4261_v54  ;;  %v4602_v54 = vand.u32 127, %v333_v14 }
0x15c6   :  { %4506 = vadd.xlane.f32.xlu1 %v4505_v26  ;;  %vm4603_vm10 = vcmp.eq.s32.totalorder %v5627_v17, %v4602_v54 }
0x15c8   :  { %4425 = vadd.xlane.f32.xlu0 %v4424_v57 }
0x1631   :  { %v4143_v53 = vpop.xlane.xlu1 %4142 }
0x1632   :  { %v4151_v55 = vmul.f32 0.03125, %v4143_v53 }
0x1633   :  { %v4140_v59 = vpop.xlane.xlu0 %4139 }
0x1634   :  { %v4155_v60 = vadd.f32 1e-12, %v4151_v55  ;;  %v4150_v62 = vmul.f32 0.03125, %v4140_v59 }
0x1636   :  { %5361 = vrsqrt.f32 %v4155_v60  ;;  %v4154_v63 = vadd.f32 1e-12, %v4150_v62 }
0x1638   :  { %5363 = vrsqrt.f32 %v4154_v63 }
0x1643   :  { %v5362_v0 = vpop.eup %5361 }
0x1644   :  { %v4163_v3 = vmul.f32 %v5362_v0, %v4131_v32 }
0x1645   :  { %v5364_v4 = vpop.eup %5363 }
0x1646   :  { %v4162_v8 = vmul.f32 %v5364_v4, %v4130_v43  ;;  %v4173_v61 = vmul.f32 %v4772_v12, %v4163_v3 }
0x1647   :  { %v4149_v9 = vpop.xlane.xlu1 %4148 }
0x1648   :  { %v4172_v10 = vmul.f32 %v4772_v12, %v4162_v8  ;;  %v4153_v11 = vmul.f32 0.03125, %v4149_v9  ;;  %v4183_v23 = vadd.f32 %v4773_v18, %v4173_v61 }
0x1649   :  { %v4146_v22 = vpop.xlane.xlu0 %4145 }
0x164a   :  { %v4182_v1 = vadd.f32 %v4773_v18, %v4172_v10  ;;  %v4157_v13 = vadd.f32 1e-12, %v4153_v11  ;;  %v4152_v21 = vmul.f32 0.03125, %v4146_v22 }
0x164b   :  { %v4345_v30 = vpop.xlane.xlu1 %4344 }
0x164c   :  { %5215 = vmatpush3.msra.mxu0 %v4182_v1  ;;  %5365 = vrsqrt.f32 %v4157_v13  ;;  %v4156_v24 = vadd.f32 1e-12, %v4152_v21  ;;  %v4346_v33 = vmax.f32 %v4345_v30, 1e-09 }
0x164d   :  { %5219 = vmatprep.subr.mxu0 %v5423_v48  ;;  %5217 = vmatmul.mubr.msk.f32.vlgmr.msra.gmra.mxu0 %vm338_vm4, %v4186_v51  ;;  %v4263_v36 = vpop.xlane.xlu0 %4262 }
0x164e   :  { %5220 = vmatpush3.msra.mxu0 %v4183_v23  ;;  %5221 = vmatprep.mubr.msk.f32.mxu0 %vm5424_vm2, %v5423_v48  ;;  %5367 = vrsqrt.f32 %v4156_v24  ;;  %v4264_v34 = vmax.f32 %v4263_v36, 1e-09 }
0x164f   :  { %5224 = vmatprep.subr.mxu0 %v5423_v48 }
0x1650   :  { %5369 = vrcp.f32 %v4264_v34 }
0x1651   :  { %5222 = vmatmul.mubr.msk.f32.vlgmr.msra.gmra.mxu0 %vm338_vm4, %v4269_v52  ;;  %5371 = vrcp.f32 %v4346_v33  ;;  %v4426_v32 = vpop.xlane.xlu0 %4425 }
0x1652   :  { %5226 = vmatprep.mubr.msk.f32.mxu0 %vm5424_vm2, %v5423_v48  ;;  %v4427_v2 = vmax.f32 %v4426_v32, 1e-09 }
0x1654   :  { %5373 = vrcp.f32 %v4427_v2 }
0x1659   :  { %v5366_v25 = vpop.eup %5365 }
0x165a   :  { %v4165_v20 = vmul.f32 %v5366_v25, %v4133_v7 }
0x165b   :  { %v5368_v28 = vpop.eup %5367 }
0x165c   :  { %v4164_v29 = vmul.f32 %v5368_v28, %v4132_v46  ;;  %v4175_v35 = vmul.f32 %v4772_v12, %v4165_v20 }
0x165d   :  { %v5370_v38 = vpop.eup %5369 }
0x165e   :  { %v4174_v31 = vmul.f32 %v4772_v12, %v4164_v29  ;;  %v4185_v27 = vadd.f32 %v4773_v18, %v4175_v35  ;;  %v5372_v43 = vpop.eup %5371 }
0x1660   :  { %v4184_v37 = vadd.f32 %v4773_v18, %v4174_v31 }
0x1661   :  { %v5374_v7 = vpop.eup %5373 }
0x1662   :  { %5225 = vmatpush3.msra.mxu0 %v4184_v37 }
0x1663   :  { %5227 = vmatmul.mubr.msk.f32.vlgmr.msra.gmra.mxu0 %vm338_vm4, %v4350_v16  ;;  %5229 = vmatprep.subr.mxu0 %v5423_v48 }
0x1664   :  { %5230 = vmatpush3.msra.mxu0 %v4185_v27  ;;  %5231 = vmatprep.mubr.msk.f32.mxu0 %vm5424_vm2, %v5423_v48  ;;  %v4507_v48 = vpop.xlane.xlu1 %4506 }
0x1665   :  { %v4508_v19 = vmax.f32 %v4507_v48, 1e-09 }
0x1667   :  { %5232 = vmatmul.mubr.msk.f32.vlgmr.msra.gmra.mxu0 %vm338_vm4, %v4431_v56  ;;  %5375 = vrcp.f32 %v4508_v19 }
0x1674   :  { %v5376_v47 = vpop.eup %5375 }
0x170d   :  { %v4256_v39 = vpop.f32.mrf.mxu0 }
0x170e   :  { %v4266_v41 = vmul.f32 %v5370_v38, %v4256_v39 }
0x170f   :  { %v5218_v44 = vpop.f32.mrf.mxu0 }
0x1710   :  { %4268 = vst.msk [vmem:[#allocation4] sm:$0x1] %vm4267_vm8, %v4266_v41 }
0x1711   :  { %v4339_v45 = vpop.f32.mrf.mxu0 }
0x1712   :  { %v4348_v42 = vmul.f32 %v5372_v43, %v4339_v45 }
0x1713   :  { %v5223_v40 = vpop.f32.mrf.mxu0 }
0x1714   :  { %4349 = vst.msk [vmem:[#allocation4 + $0x1] sm:$0x1] %vm4267_vm8, %v4348_v42 }
0x171b   :  { %v4512_v5 = vld [vmem:[#allocation4] sm:$0x3] }
0x171c   :  { %5235 = vmatpush3.xpose.msk.msra.mxu1 %vm63_vm0, %v4512_v5 }
0x1723   :  { %v4420_v6 = vpop.f32.mrf.mxu0 }
0x1724   :  { %v4429_v46 = vmul.f32 %v5374_v7, %v4420_v6 }
0x1725   :  { %v5228_v49 = vpop.f32.mrf.mxu0 }
0x1726   :  { %4430 = vst.msk [vmem:[#allocation4 + $0x2] sm:$0x1] %vm4267_vm8, %v4429_v46 }
0x1727   :  { %v4501_v50 = vpop.f32.mrf.mxu0 }
0x1728   :  { %v4510_v58 = vmul.f32 %v5376_v47, %v4501_v50 }
0x1729   :  { %v5233_v51 = vpop.f32.mrf.mxu0 }
0x172a   :  { %4511 = vst.msk [vmem:[#allocation4 + $0x3] sm:$0x1] %vm4267_vm8, %v4510_v58 }
0x1731   :  { %v4513_v52 = vld [vmem:[#allocation4 + $0x2] sm:$0x3] }
0x1732   :  { %5237 = vmatmul.mubr.msk.f32.vlgmr.msra.gmra.mxu1 %vm63_vm0, %v4513_v52 }
0x17f2   :  { %v4586_v15 = vpop.f32.mrf.mxu1 }
0x17f3   :  { %4591 = vst.msk [vmem:[#allocation7] sm:$0x3] %vm4590_vm9, %v4586_v15  ;;  %v4604_v16 = vsel %vm4603_vm10, %v4586_v15, 0.0 }
0x17f4   :  { %v5238_v56 = vpop.f32.mrf.mxu1  ;;  %v4605_v57 = vsel %vm4590_vm9, %v4604_v16, 0.0 }
0x17f5   :  { %4606 = vadd.xlane.f32.xlu0 %v4605_v57 }
0x17f6   :  { %5390 = shalt.err (!%p5387_p4)
}
0x17f7   :  { %4631 = dma.vmem_to_hbm [thread:$0]  %s4629_s15, 32, %s6289_s17, [#allocation8]   ;;  %v4592_v14 = vsel %vm4590_vm9, %v4586_v15, 0.0 }
0x17f8   :  { %v4593_v17 = vrot.slane %v4592_v14, 4  ;;  %s5432_s20 = smov [#allocation5]  }
0x17f9   :  { %s4618_s6 = sshll.u32 %s5432_s20, 4  ;;  %s4619_s6 = int_to_ptr.vmem [resolvable:$true] %s4618_s6 }
0x17fa   :  { %v4594_v26 = vadd.f32 %v4593_v17, %v4592_v14  ;;  %s5399_s29 = scalar_lea.vmem %s4619_s6, 32  ;;  %p5404_p6 = scmp.lt.s32.totalorder %s4619_s6, %s4619_s6 }
0x17fb   :  { %p5400_p5 = scmp.ne.s32.totalorder %s4619_s6, %s5399_s29  ;;  %p5405_p7 = scmp.lt.s32.totalorder %s5399_s29, %s5399_s29 }
0x17fc   :  { %v4595_v53 = vrot.slane %v4594_v26, 2 }
0x17fd   :  { %p5406_p8 = por %p5405_p7, %p5404_p6 }
0x17fe   :  { %v4596_v55 = vadd.f32 %v4595_v53, %v4594_v26 }
0x17ff   :  { %p5407_p9 = pnand %p5406_p8, %p5400_p5 }
0x1800   :  { %v4597_v59 = vrot.slane %v4596_v55, 1 }
0x1802   :  { %v4598_v60 = vadd.f32 %v4597_v59, %v4596_v55 }
0x1804   :  { %5377 = vrcp.f32 %v4598_v60 }
0x1811   :  { %v5378_v62 = vpop.eup %5377 }
0x187e   :  { %v4607_v63 = vpop.xlane.xlu0 %4606 }
0x187f   :  { %v4609_v0 = vmul.f32 %v5378_v62, %v4607_v63 }
0x1881   :  { %v4610_v3 = vadd.f32 %v4609_v0, %v4607_v63 }
0x1883   :  { %4611 = vst.msk [vmem:[#allocation5] sm:$0x3] %vm4590_vm9, %v4610_v3 }
0x1884   :  { %5410 = shalt.err (!%p5407_p9)
}
0x1885   :  { %4621 = dma.vmem_to_hbm [thread:$0]  %s4619_s6, 32, %s6288_s16, [#allocation6]  }
0x1886   :  { %5419 = dma.done.wait [#allocation6], 32  }
0x1887   :  { %5420 = vsyncadd [#allocation6], 4294967264 }
0x1888   :  { %5421 = dma.done.wait [#allocation8], 32  }
0x1889   :  { %5422 = vsyncadd [#allocation8], 4294967264 }
0x188a   :  { %4638 = vsyncpa [#allocation6], 1 }
0x188b   :  { %4639 = vsyncpa [#allocation8], 1 }

</bundles_post_ra>
